<compile_context>
chip_gen: v6e
topology: v6e:2x2x1
jax: 0.10.0
libtpu: 0.0.40
codegen_flags: <defaults>
</compile_context>

<pallas_src>
import functools

import jax
import jax.numpy as jnp
from jax.experimental import pallas as pl
from jax.experimental.pallas import tpu as pltpu

_LANE = 128


def _round_up(x, m):
    return ((x + m - 1) // m) * m


def _lgnn_main_kernel(
    fa_ref, deg_ref, adj_ref, pm_ref, fb_ref, wb_ref, wr_ref, b_ref,   # in
    y_ref, stats_ref,                                                  # out
    z0, z1, zrow, acc,                                                 # scratch
    *, radius, tm, tk, f_pad, n_valid, half, num_hops,
):
    h = pl.program_id(0)          # hop index (sequential applications of A)
    i = pl.program_id(1)          # output-row tile
    k = pl.program_id(2)          # contraction tile (cols of A / rows of z)
    nk = pl.num_programs(2)

    roff = pl.multiple_of(i * tm, tm)
    koff = pl.multiple_of(k * tk, tk)
    row_done = k == nk - 1
    parity = jax.lax.rem(h, 2)    # hop h reads z{parity}, next hop reads z{1-parity}

    # One-time init: z0 <- padded feat_a (source of hop 0).
    @pl.when((h == 0) & (i == 0) & (k == 0))
    def _():
        z0[...] = fa_ref[...]

    a_tile = adj_ref[...].astype(jnp.float32)     # 0/1 adjacency: bf16 exact

    def _accumulate(src):
        part = jnp.dot(a_tile, src[pl.ds(koff, tk), :],
                       preferred_element_type=jnp.float32)

        @pl.when(k == 0)
        def _():
            zrow[...] = part

        @pl.when(k > 0)
        def _():
            zrow[...] = zrow[...] + part

    # Parity-selected source buffer (static refs -> no per-hop full copy).
    @pl.when(parity == 0)
    def _():
        _accumulate(z0)

    @pl.when(parity == 1)
    def _():
        _accumulate(z1)

    @pl.when(row_done)
    def _():
        z_new = zrow[...]        # rows [roff, roff+tm) of A^(h+1) @ feat_a

        # Store into the other buffer as the source of the next hop
        # (skipped on the last hop: nobody reads it).
        not_last = h < num_hops - 1

        @pl.when(not_last & (parity == 0))
        def _():
            z1[pl.ds(roff, tm), :] = z_new

        @pl.when(not_last & (parity == 1))
        def _():
            z0[pl.ds(roff, tm), :] = z_new

        # Hop 0: initialize the result accumulator with all hop-independent
        # terms fused into one lane-dense matmul: [fa | deg*fa | pm_pd@fb].
        @pl.when(h == 0)
        def _():
            fa_i = fa_ref[pl.ds(roff, tm), :]
            deg_i = deg_ref[pl.ds(roff, tm), :]
            data_i = jnp.dot(pm_ref[...], fb_ref[...],
                             preferred_element_type=jnp.float32)
            x = jnp.concatenate([fa_i, deg_i * fa_i, data_i], axis=1)
            acc[pl.ds(roff, tm), :] = (
                jnp.dot(x, wb_ref[...], preferred_element_type=jnp.float32)
                + b_ref[...])

        # aggregate_radius level l completes at hop 2^l - 1: fold in its
        # projection immediately (overlaps with later-hop adjacency DMAs).
        for l in range(radius):
            @pl.when(h == 2 ** l - 1)
            def _(l=l):
                w_l = wr_ref[l * f_pad:(l + 1) * f_pad, :]
                acc[pl.ds(roff, tm), :] = acc[pl.ds(roff, tm), :] + jnp.dot(
                    z_new, w_l, preferred_element_type=jnp.float32)

        # Final hop: half-ReLU, emit pre-BN rows + global BN statistics.
        @pl.when(h == num_hops - 1)
        def _():
            y = acc[pl.ds(roff, tm), :]
            # cat([y[:, :half], relu(y[:, half:])], dim=1) without slicing.
            col = jax.lax.broadcasted_iota(jnp.int32, y.shape, 1)
            y = jnp.where(col < half, y, jnp.maximum(y, 0.0))
            y_ref[...] = y

            # Global BatchNorm statistics (exclude zero-padded rows).
            rows = roff + jax.lax.broadcasted_iota(jnp.int32, (tm, 1), 0)
            yv = jnp.where(rows < n_valid, y, 0.0)
            contrib = jnp.concatenate(
                [jnp.sum(yv, axis=0, keepdims=True),
                 jnp.sum(yv * yv, axis=0, keepdims=True)], axis=0)

            @pl.when(i == 0)
            def _():
                stats_ref[...] = contrib

            @pl.when(i > 0)
            def _():
                stats_ref[...] = stats_ref[...] + contrib


def _lgnn_bn_kernel(y_ref, stats_ref, gamma_ref, beta_ref, out_ref, *, n_valid):
    # Training-mode BatchNorm1d (batch mean, biased variance, eps=1e-5).
    # TODO(synk): running_mean / running_var buffer updates (a training-time
    #             side effect of nn.BatchNorm1d) are not materialized.
    st = stats_ref[...]
    inv_n = jnp.float32(1.0 / n_valid)
    mean = st[0:1, :] * inv_n
    var = jnp.maximum(st[1:2, :] * inv_n - mean * mean, 0.0)
    inv_std = jax.lax.rsqrt(var + 1e-5)
    out_ref[...] = (y_ref[...] - mean) * inv_std * gamma_ref[...] + beta_ref[...]


def lgnn_core_forward(feat_a, feat_b, deg, adj, pm_pd, params,
                      radius: int, out_feats: int, block_n: int = 256):
    """LGNNCore forward.  adj is the dense message-passing matrix replacing
    the DGL graph (copy_src + sum)."""
    assert radius >= 1
    assert out_feats % 2 == 0
    assert block_n % _LANE == 0

    N, f_in = feat_a.shape
    fb2 = jnp.squeeze(feat_b, axis=0)                 # [M, FB], like PyTorch
    M, fb_dim = fb2.shape

    n_pad = _round_up(N, block_n)
    f_pad = _round_up(f_in, _LANE)
    fb_pad = _round_up(fb_dim, _LANE)
    fo_pad = _round_up(out_feats, _LANE)
    m_pad = _round_up(M, _LANE)
    tm = tk = block_n
    ni = n_pad // tm
    nk = n_pad // tk
    num_hops = 2 ** (radius - 1)
    last_hop = num_hops - 1

    # ---- layout plumbing: zero-pad to lane-dense shapes, bf16 adjacency ----
    fa_p = jnp.pad(feat_a, ((0, n_pad - N), (0, f_pad - f_in)))
    deg_p = jnp.pad(deg, ((0, n_pad - N), (0, 0)))
    adj_p = jnp.pad(adj, ((0, n_pad - N), (0, n_pad - N))).astype(jnp.bfloat16)
    pm_p = jnp.pad(pm_pd, ((0, n_pad - N), (0, m_pad - M)))
    fb_p = jnp.pad(fb2, ((0, m_pad - M), (0, fb_pad - fb_dim)))

    def pad_w(w, rows):
        return jnp.pad(w, ((0, rows - w.shape[0]), (0, fo_pad - w.shape[1])))

    # Block-stacked fused weight for the hop-independent terms:
    # rows = [prev | deg | fuse].
    w_base = jnp.concatenate(
        [pad_w(params["w_prev"], f_pad),
         pad_w(params["w_deg"], f_pad),
         pad_w(params["w_fuse"], fb_pad)], axis=0)
    k_base = 2 * f_pad + fb_pad
    assert w_base.shape == (k_base, fo_pad)

    # Per-level radius weights, row-stacked (static slice per level in-kernel).
    w_rad = jnp.concatenate(
        [pad_w(params["w_rad"][l], f_pad) for l in range(radius)], axis=0)

    # Single pre-combined bias.
    b_fused = (params["b_prev"] + params["b_deg"]
               + jnp.sum(params["b_rad"], axis=0) + params["b_fuse"])
    b_fused = jnp.pad(b_fused, ((0, 0), (0, fo_pad - out_feats)))
    gamma_p = jnp.pad(params["gamma"], ((0, 0), (0, fo_pad - out_feats)),
                      constant_values=1.0)
    beta_p = jnp.pad(params["beta"], ((0, 0), (0, fo_pad - out_feats)))

    main_kernel = functools.partial(
        _lgnn_main_kernel, radius=radius, tm=tm, tk=tk, f_pad=f_pad,
        n_valid=N, half=out_feats // 2, num_hops=num_hops)

    y_pre, stats = pl.pallas_call(
        main_kernel,
        out_shape=(jax.ShapeDtypeStruct((n_pad, fo_pad), jnp.float32),
                   jax.ShapeDtypeStruct((2, fo_pad), jnp.float32)),
        grid_spec=pltpu.PrefetchScalarGridSpec(
            num_scalar_prefetch=0,
            grid=(num_hops, ni, nk),
            in_specs=[
                # feat_a / deg / feat_b / weights / bias: VMEM resident.
                pl.BlockSpec((n_pad, f_pad), lambda h, i, k: (0, 0)),
                pl.BlockSpec((n_pad, 1), lambda h, i, k: (0, 0)),
                # adjacency: streamed (tm, tk) bf16 tiles.
                pl.BlockSpec((tm, tk), lambda h, i, k: (i, k)),
                # pm_pd: only needed on hop 0 -> pin afterwards (no re-DMA).
                pl.BlockSpec((tm, m_pad),
                             lambda h, i, k: (jnp.where(h == 0, i, ni - 1), 0)),
                pl.BlockSpec((m_pad, fb_pad), lambda h, i, k: (0, 0)),
                pl.BlockSpec((k_base, fo_pad), lambda h, i, k: (0, 0)),
                pl.BlockSpec((radius * f_pad, fo_pad), lambda h, i, k: (0, 0)),
                pl.BlockSpec((1, fo_pad), lambda h, i, k: (0, 0)),
            ],
            out_specs=(
                # pre-BN result: written once per row tile on the last hop.
                pl.BlockSpec((tm, fo_pad),
                             lambda h, i, k: (jnp.where(h == last_hop, i, 0), 0)),
                # global (sum, sum_sq) statistics: resident accumulator.
                pl.BlockSpec((2, fo_pad), lambda h, i, k: (0, 0)),
            ),
            scratch_shapes=[
                pltpu.VMEM((n_pad, f_pad), jnp.float32),    # z0 (parity buf)
                pltpu.VMEM((n_pad, f_pad), jnp.float32),    # z1 (parity buf)
                pltpu.VMEM((tm, f_pad), jnp.float32),       # zrow (k-accum)
                pltpu.VMEM((n_pad, fo_pad), jnp.float32),   # result accum
            ]),
        compiler_params=pltpu.CompilerParams(
            # Hop chain carries state in VMEM scratch across row tiles, so
            # every axis must stay sequential on one core.
            dimension_semantics=("arbitrary", "arbitrary", "arbitrary"),
            vmem_limit_bytes=32 * 1024 * 1024),
    )(fa_p, deg_p, adj_p, pm_p, fb_p, w_base, w_rad, b_fused)

    bn_kernel = functools.partial(_lgnn_bn_kernel, n_valid=N)
    y_norm = pl.pallas_call(
        bn_kernel,
        out_shape=jax.ShapeDtypeStruct((n_pad, fo_pad), jnp.float32),
        grid_spec=pltpu.PrefetchScalarGridSpec(
            num_scalar_prefetch=0,
            grid=(ni,),
            in_specs=[
                pl.BlockSpec((tm, fo_pad), lambda i: (i, 0)),
                pl.BlockSpec((2, fo_pad), lambda i: (0, 0)),
                pl.BlockSpec((1, fo_pad), lambda i: (0, 0)),
                pl.BlockSpec((1, fo_pad), lambda i: (0, 0)),
            ],
            out_specs=pl.BlockSpec((tm, fo_pad), lambda i: (i, 0))),
        compiler_params=pltpu.CompilerParams(
            dimension_semantics=("parallel",)),
    )(y_pre, stats, gamma_p, beta_p)

    return y_norm[:N, :out_feats]


def _reference_forward(feat_a, feat_b, deg, adj, pm_pd, params,
                       radius: int, out_feats: int):
    """Pure-JAX f32 reference mirroring the PyTorch forward."""
    fb = jnp.squeeze(feat_b, axis=0)
    prev = feat_a @ params["w_prev"] + params["b_prev"]
    degp = (deg * feat_a) @ params["w_deg"] + params["b_deg"]
    z = feat_a
    rad = jnp.zeros_like(prev)
    for l in range(radius):
        hops = 1 if l == 0 else 2 ** (l - 1)
        for _ in range(hops):
            z = adj @ z
        rad = rad + z @ params["w_rad"][l] + params["b_rad"][l]
    fuse = (pm_pd @ fb) @ params["w_fuse"] + params["b_fuse"]
    res = prev + degp + rad + fuse
    half = out_feats // 2
    res = jnp.concatenate([res[:, :half], jnp.maximum(res[:, half:], 0.0)],
                          axis=1)
    mean = jnp.mean(res, axis=0, keepdims=True)
    var = jnp.mean((res - mean) ** 2, axis=0, keepdims=True)
    return (res - mean) / jnp.sqrt(var + 1e-5) * params["gamma"] + params["beta"]


if __name__ == "__main__":
    # Small shapes consistent with the module (non-multiple-of-tile N on
    # purpose, to exercise the padding / row-masking path).
    N, M = 250, 60
    F_IN, F_OUT, FB = 16, 16, 16
    RADIUS = 3                       # -> 2^(radius-1) = 4 hops, 3 levels

    key = jax.random.PRNGKey(0)
    ks = jax.random.split(key, 16)

    feat_a = jax.random.normal(ks[0], (N, F_IN), jnp.float32)
    feat_b = jax.random.normal(ks[1], (1, M, FB), jnp.float32)
    pm_pd = jax.random.normal(ks[3], (N, M), jnp.float32)
    # Deterministic sparse symmetric 0/1 adjacency (no self loops).
    adj_rand = jax.random.uniform(ks[4], (N, N), jnp.float32)
    adj = ((adj_rand + adj_rand.T) > 1.8).astype(jnp.float32)
    adj = adj * (1.0 - jnp.eye(N, dtype=jnp.float32))
    deg = jnp.sum(adj, axis=1, keepdims=True)

    def linear_init(kw, kb, fan_in, fan_out):
        bound = 1.0 / (fan_in ** 0.5)
        w = jax.random.uniform(kw, (fan_in, fan_out), jnp.float32, -bound, bound)
        b = jax.random.uniform(kb, (1, fan_out), jnp.float32, -bound, bound)
        return w, b

    w_prev, b_prev = linear_init(ks[5], ks[6], F_IN, F_OUT)
    w_deg, b_deg = linear_init(ks[7], ks[8], F_IN, F_OUT)
    w_rad_list, b_rad_list = [], []
    for r in range(RADIUS):
        wr, br = linear_init(jax.random.fold_in(ks[9], r),
                             jax.random.fold_in(ks[10], r), F_IN, F_OUT)
        w_rad_list.append(wr)
        b_rad_list.append(br)
    # linear_fuse is re-created in forward with in_features = feat_b dim (FB);
    # here it is treated as a provided parameter.
    w_fuse, b_fuse = linear_init(ks[11], ks[12], FB, F_OUT)

    params = {
        "w_prev": w_prev, "b_prev": b_prev,
        "w_deg": w_deg, "b_deg": b_deg,
        "w_rad": jnp.stack(w_rad_list, axis=0),        # [radius, F_IN, F_OUT]
        "b_rad": jnp.stack(b_rad_list, axis=0),        # [radius, 1, F_OUT]
        "w_fuse": w_fuse, "b_fuse": b_fuse,
        "gamma": jnp.ones((1, F_OUT), jnp.float32),    # fresh BatchNorm1d
        "beta": jnp.zeros((1, F_OUT), jnp.float32),
    }

    out = lgnn_core_forward(feat_a, feat_b, deg, adj, pm_pd, params,
                            radius=RADIUS, out_feats=F_OUT, block_n=128)
    out = jax.block_until_ready(out)

    ref = _reference_forward(feat_a, feat_b, deg, adj, pm_pd, params,
                             radius=RADIUS, out_feats=F_OUT)
    assert out.shape == (N, F_OUT)
    assert jnp.allclose(out, ref, atol=1e-3, rtol=1e-3)

    print("KERNEL_OK")
</pallas_src>

<mosaic_0001>
module attributes {stable_mosaic.version = 11 : i64} {
  func.func @_lgnn_main_kernel(%arg0: i32, %arg1: i32, %arg2: i32, %arg3: memref<256x128xf32, #tpu.memory_space<vmem>>, %arg4: memref<256x1xf32, #tpu.memory_space<vmem>>, %arg5: memref<128x128xbf16, #tpu.memory_space<vmem>>, %arg6: memref<128x128xf32, #tpu.memory_space<vmem>>, %arg7: memref<128x128xf32, #tpu.memory_space<vmem>>, %arg8: memref<384x128xf32, #tpu.memory_space<vmem>>, %arg9: memref<384x128xf32, #tpu.memory_space<vmem>>, %arg10: memref<1x128xf32, #tpu.memory_space<vmem>>, %arg11: memref<128x128xf32, #tpu.memory_space<vmem>>, %arg12: memref<2x128xf32, #tpu.memory_space<vmem>>, %arg13: memref<256x128xf32, #tpu.memory_space<vmem>>, %arg14: memref<256x128xf32, #tpu.memory_space<vmem>>, %arg15: memref<128x128xf32, #tpu.memory_space<vmem>>, %arg16: memref<256x128xf32, #tpu.memory_space<vmem>>) attributes {dimension_semantics = [#tpu.dimension_semantics<arbitrary>, #tpu.dimension_semantics<arbitrary>, #tpu.dimension_semantics<arbitrary>], iteration_bounds = array<i64: 4, 2, 2>, scalar_prefetch = 0 : i64, scratch_operands = 4 : i64, tpu.core_type = #tpu.core_type<tc>, window_params = [{pipeline_mode = #tpu.pipeline_mode<synchronous>, transform_indices = @transform_0, window_bounds = array<i64: 256, 128>}, {pipeline_mode = #tpu.pipeline_mode<synchronous>, transform_indices = @transform_1, window_bounds = array<i64: 256, 1>}, {transform_indices = @transform_2, window_bounds = array<i64: 128, 128>}, {transform_indices = @transform_3, window_bounds = array<i64: 128, 128>}, {pipeline_mode = #tpu.pipeline_mode<synchronous>, transform_indices = @transform_4, window_bounds = array<i64: 128, 128>}, {pipeline_mode = #tpu.pipeline_mode<synchronous>, transform_indices = @transform_5, window_bounds = array<i64: 384, 128>}, {pipeline_mode = #tpu.pipeline_mode<synchronous>, transform_indices = @transform_6, window_bounds = array<i64: 384, 128>}, {pipeline_mode = #tpu.pipeline_mode<synchronous>, transform_indices = @transform_7, window_bounds = array<i64: 1, 128>}, {transform_indices = @transform_8, window_bounds = array<i64: 128, 128>}, {pipeline_mode = #tpu.pipeline_mode<synchronous>, transform_indices = @transform_9, window_bounds = array<i64: 2, 128>}]} {
    %c128_i32 = arith.constant 128 : i32
    %0 = arith.muli %arg1, %c128_i32 : i32
    %1 = tpu.assume_multiple %0, 128 : i32
    %c128_i32_0 = arith.constant 128 : i32
    %2 = arith.muli %arg2, %c128_i32_0 : i32
    %3 = tpu.assume_multiple %2, 128 : i32
    %c1_i32 = arith.constant 1 : i32
    %4 = arith.cmpi eq, %arg2, %c1_i32 : i32
    %c2_i32 = arith.constant 2 : i32
    %5 = arith.remsi %arg0, %c2_i32 : i32
    %c0_i32 = arith.constant 0 : i32
    %6 = arith.cmpi eq, %arg0, %c0_i32 : i32
    %c0_i32_1 = arith.constant 0 : i32
    %7 = arith.cmpi eq, %arg1, %c0_i32_1 : i32
    %8 = arith.andi %6, %7 : i1
    %c0_i32_2 = arith.constant 0 : i32
    %9 = arith.cmpi eq, %arg2, %c0_i32_2 : i32
    %10 = arith.andi %8, %9 : i1
    %11 = arith.extui %10 : i1 to i32
    %c0_i32_3 = arith.constant 0 : i32
    %12 = arith.cmpi ne, %11, %c0_i32_3 : i32
    scf.if %12 {
      %c0_10 = arith.constant 0 : index
      %c0_11 = arith.constant 0 : index
      %23 = vector.load %arg3[%c0_10, %c0_11] : memref<256x128xf32, #tpu.memory_space<vmem>>, vector<256x128xf32>
      %c0_12 = arith.constant 0 : index
      %c0_13 = arith.constant 0 : index
      %24 = vector.load %arg13[%c0_12, %c0_13] : memref<256x128xf32, #tpu.memory_space<vmem>>, vector<256x128xf32>
      tpu.vector_store %arg13[%c0_12, %c0_13], %23 {strides = array<i32>} : memref<256x128xf32, #tpu.memory_space<vmem>>, vector<256x128xf32>,
    } else {
    }
    %c0 = arith.constant 0 : index
    %c0_4 = arith.constant 0 : index
    %13 = vector.load %arg5[%c0, %c0_4] : memref<128x128xbf16, #tpu.memory_space<vmem>>, vector<128x128xbf16>
    %14 = arith.extf %13 : vector<128x128xbf16> to vector<128x128xf32>
    %c0_i32_5 = arith.constant 0 : i32
    %15 = arith.cmpi eq, %5, %c0_i32_5 : i32
    %16 = arith.extui %15 : i1 to i32
    %c0_i32_6 = arith.constant 0 : i32
    %17 = arith.cmpi ne, %16, %c0_i32_6 : i32
    scf.if %17 {
      %23 = arith.index_cast %3 : i32 to index
      %c0_10 = arith.constant 0 : index
      %24 = vector.load %arg13[%23, %c0_10] : memref<256x128xf32, #tpu.memory_space<vmem>>, vector<128x128xf32>
      %cst = arith.constant dense<0.000000e+00> : vector<128x128xf32>
      %25 = tpu.matmul %14, %24, %cst {dimension_numbers = #tpu.dot_dimension_numbers<[1], [0], [0], [1], [0, 0, 1, 1], [], []>} : vector<128x128xf32>, vector<128x128xf32>, vector<128x128xf32> -> vector<128x128xf32>
      %c0_i32_11 = arith.constant 0 : i32
      %26 = arith.cmpi eq, %arg2, %c0_i32_11 : i32
      %27 = arith.extui %26 : i1 to i32
      %c0_i32_12 = arith.constant 0 : i32
      %28 = arith.cmpi ne, %27, %c0_i32_12 : i32
      scf.if %28 {
        %c0_15 = arith.constant 0 : index
        %c0_16 = arith.constant 0 : index
        %32 = vector.load %arg15[%c0_15, %c0_16] : memref<128x128xf32, #tpu.memory_space<vmem>>, vector<128x128xf32>
        tpu.vector_store %arg15[%c0_15, %c0_16], %25 {strides = array<i32>} : memref<128x128xf32, #tpu.memory_space<vmem>>, vector<128x128xf32>,
      } else {
      }
      %c0_i32_13 = arith.constant 0 : i32
      %29 = arith.cmpi sgt, %arg2, %c0_i32_13 : i32
      %30 = arith.extui %29 : i1 to i32
      %c0_i32_14 = arith.constant 0 : i32
      %31 = arith.cmpi ne, %30, %c0_i32_14 : i32
      scf.if %31 {
        %c0_15 = arith.constant 0 : index
        %c0_16 = arith.constant 0 : index
        %32 = vector.load %arg15[%c0_15, %c0_16] : memref<128x128xf32, #tpu.memory_space<vmem>>, vector<128x128xf32>
        %33 = arith.addf %32, %25 : vector<128x128xf32>
        %c0_17 = arith.constant 0 : index
        %c0_18 = arith.constant 0 : index
        %34 = vector.load %arg15[%c0_17, %c0_18] : memref<128x128xf32, #tpu.memory_space<vmem>>, vector<128x128xf32>
        tpu.vector_store %arg15[%c0_17, %c0_18], %33 {strides = array<i32>} : memref<128x128xf32, #tpu.memory_space<vmem>>, vector<128x128xf32>,
      } else {
      }
    } else {
    }
    %c1_i32_7 = arith.constant 1 : i32
    %18 = arith.cmpi eq, %5, %c1_i32_7 : i32
    %19 = arith.extui %18 : i1 to i32
    %c0_i32_8 = arith.constant 0 : i32
    %20 = arith.cmpi ne, %19, %c0_i32_8 : i32
    scf.if %20 {
      %23 = arith.index_cast %3 : i32 to index
      %c0_10 = arith.constant 0 : index
      %24 = vector.load %arg14[%23, %c0_10] : memref<256x128xf32, #tpu.memory_space<vmem>>, vector<128x128xf32>
      %cst = arith.constant dense<0.000000e+00> : vector<128x128xf32>
      %25 = tpu.matmul %14, %24, %cst {dimension_numbers = #tpu.dot_dimension_numbers<[1], [0], [0], [1], [0, 0, 1, 1], [], []>} : vector<128x128xf32>, vector<128x128xf32>, vector<128x128xf32> -> vector<128x128xf32>
      %c0_i32_11 = arith.constant 0 : i32
      %26 = arith.cmpi eq, %arg2, %c0_i32_11 : i32
      %27 = arith.extui %26 : i1 to i32
      %c0_i32_12 = arith.constant 0 : i32
      %28 = arith.cmpi ne, %27, %c0_i32_12 : i32
      scf.if %28 {
        %c0_15 = arith.constant 0 : index
        %c0_16 = arith.constant 0 : index
        %32 = vector.load %arg15[%c0_15, %c0_16] : memref<128x128xf32, #tpu.memory_space<vmem>>, vector<128x128xf32>
        tpu.vector_store %arg15[%c0_15, %c0_16], %25 {strides = array<i32>} : memref<128x128xf32, #tpu.memory_space<vmem>>, vector<128x128xf32>,
      } else {
      }
      %c0_i32_13 = arith.constant 0 : i32
      %29 = arith.cmpi sgt, %arg2, %c0_i32_13 : i32
      %30 = arith.extui %29 : i1 to i32
      %c0_i32_14 = arith.constant 0 : i32
      %31 = arith.cmpi ne, %30, %c0_i32_14 : i32
      scf.if %31 {
        %c0_15 = arith.constant 0 : index
        %c0_16 = arith.constant 0 : index
        %32 = vector.load %arg15[%c0_15, %c0_16] : memref<128x128xf32, #tpu.memory_space<vmem>>, vector<128x128xf32>
        %33 = arith.addf %32, %25 : vector<128x128xf32>
        %c0_17 = arith.constant 0 : index
        %c0_18 = arith.constant 0 : index
        %34 = vector.load %arg15[%c0_17, %c0_18] : memref<128x128xf32, #tpu.memory_space<vmem>>, vector<128x128xf32>
        tpu.vector_store %arg15[%c0_17, %c0_18], %33 {strides = array<i32>} : memref<128x128xf32, #tpu.memory_space<vmem>>, vector<128x128xf32>,
      } else {
      }
    } else {
    }
    %21 = arith.extui %4 : i1 to i32
    %c0_i32_9 = arith.constant 0 : i32
    %22 = arith.cmpi ne, %21, %c0_i32_9 : i32
    scf.if %22 {
      %c0_10 = arith.constant 0 : index
      %c0_11 = arith.constant 0 : index
      %23 = vector.load %arg15[%c0_10, %c0_11] : memref<128x128xf32, #tpu.memory_space<vmem>>, vector<128x128xf32>
      %c3_i32 = arith.constant 3 : i32
      %24 = arith.cmpi slt, %arg0, %c3_i32 : i32
      %c0_i32_12 = arith.constant 0 : i32
      %25 = arith.cmpi eq, %5, %c0_i32_12 : i32
      %26 = arith.andi %24, %25 : i1
      %27 = arith.extui %26 : i1 to i32
      %c0_i32_13 = arith.constant 0 : i32
      %28 = arith.cmpi ne, %27, %c0_i32_13 : i32
      scf.if %28 {
        %48 = arith.index_cast %1 : i32 to index
        %c0_26 = arith.constant 0 : index
        %49 = vector.load %arg14[%48, %c0_26] : memref<256x128xf32, #tpu.memory_space<vmem>>, vector<128x128xf32>
        tpu.vector_store %arg14[%48, %c0_26], %23 {strides = array<i32>} : memref<256x128xf32, #tpu.memory_space<vmem>>, vector<128x128xf32>,
      } else {
      }
      %c1_i32_14 = arith.constant 1 : i32
      %29 = arith.cmpi eq, %5, %c1_i32_14 : i32
      %30 = arith.andi %24, %29 : i1
      %31 = arith.extui %30 : i1 to i32
      %c0_i32_15 = arith.constant 0 : i32
      %32 = arith.cmpi ne, %31, %c0_i32_15 : i32
      scf.if %32 {
        %48 = arith.index_cast %1 : i32 to index
        %c0_26 = arith.constant 0 : index
        %49 = vector.load %arg13[%48, %c0_26] : memref<256x128xf32, #tpu.memory_space<vmem>>, vector<128x128xf32>
        tpu.vector_store %arg13[%48, %c0_26], %23 {strides = array<i32>} : memref<256x128xf32, #tpu.memory_space<vmem>>, vector<128x128xf32>,
      } else {
      }
      %c0_i32_16 = arith.constant 0 : i32
      %33 = arith.cmpi eq, %arg0, %c0_i32_16 : i32
      %34 = arith.extui %33 : i1 to i32
      %c0_i32_17 = arith.constant 0 : i32
      %35 = arith.cmpi ne, %34, %c0_i32_17 : i32
      scf.if %35 {
        %48 = arith.index_cast %1 : i32 to index
        %c0_26 = arith.constant 0 : index
        %49 = vector.load %arg3[%48, %c0_26] : memref<256x128xf32, #tpu.memory_space<vmem>>, vector<128x128xf32>
        %50 = arith.index_cast %1 : i32 to index
        %c0_27 = arith.constant 0 : index
        %51 = vector.load %arg4[%50, %c0_27] : memref<256x1xf32, #tpu.memory_space<vmem>>, vector<128x1xf32>
        %c0_28 = arith.constant 0 : index
        %c0_29 = arith.constant 0 : index
        %52 = vector.load %arg6[%c0_28, %c0_29] : memref<128x128xf32, #tpu.memory_space<vmem>>, vector<128x128xf32>
        %c0_30 = arith.constant 0 : index
        %c0_31 = arith.constant 0 : index
        %53 = vector.load %arg7[%c0_30, %c0_31] : memref<128x128xf32, #tpu.memory_space<vmem>>, vector<128x128xf32>
        %cst = arith.constant dense<0.000000e+00> : vector<128x128xf32>
        %54 = tpu.matmul %52, %53, %cst {dimension_numbers = #tpu.dot_dimension_numbers<[1], [0], [0], [1], [0, 0, 1, 1], [], []>} : vector<128x128xf32>, vector<128x128xf32>, vector<128x128xf32> -> vector<128x128xf32>
        %55 = vector.broadcast %51 : vector<128x1xf32> to vector<128x128xf32>
        %56 = arith.mulf %55, %49 : vector<128x128xf32>
        %57 = tpu.concatenate %49, %56, %54 in 1 : vector<128x128xf32>, vector<128x128xf32>, vector<128x128xf32> -> vector<128x384xf32>
        %c0_32 = arith.constant 0 : index
        %c0_33 = arith.constant 0 : index
        %58 = vector.load %arg8[%c0_32, %c0_33] : memref<384x128xf32, #tpu.memory_space<vmem>>, vector<384x128xf32>
        %cst_34 = arith.constant dense<0.000000e+00> : vector<128x128xf32>
        %59 = tpu.matmul %57, %58, %cst_34 {dimension_numbers = #tpu.dot_dimension_numbers<[1], [0], [0], [1], [0, 0, 1, 1], [], []>} : vector<128x384xf32>, vector<384x128xf32>, vector<128x128xf32> -> vector<128x128xf32>
        %c0_35 = arith.constant 0 : index
        %c0_36 = arith.constant 0 : index
        %60 = vector.load %arg10[%c0_35, %c0_36] : memref<1x128xf32, #tpu.memory_space<vmem>>, vector<1x128xf32>
        %61 = vector.broadcast %60 : vector<1x128xf32> to vector<128x128xf32>
        %62 = arith.addf %59, %61 : vector<128x128xf32>
        %63 = arith.index_cast %1 : i32 to index
        %c0_37 = arith.constant 0 : index
        %64 = vector.load %arg16[%63, %c0_37] : memref<256x128xf32, #tpu.memory_space<vmem>>, vector<128x128xf32>
        tpu.vector_store %arg16[%63, %c0_37], %62 {strides = array<i32>} : memref<256x128xf32, #tpu.memory_space<vmem>>, vector<128x128xf32>,
      } else {
      }
      %c0_i32_18 = arith.constant 0 : i32
      %36 = arith.cmpi eq, %arg0, %c0_i32_18 : i32
      %37 = arith.extui %36 : i1 to i32
      %c0_i32_19 = arith.constant 0 : i32
      %38 = arith.cmpi ne, %37, %c0_i32_19 : i32
      scf.if %38 {
        %c0_26 = arith.constant 0 : index
        %c0_27 = arith.constant 0 : index
        %48 = vector.load %arg9[%c0_26, %c0_27] : memref<384x128xf32, #tpu.memory_space<vmem>>, vector<128x128xf32>
        %49 = arith.index_cast %1 : i32 to index
        %c0_28 = arith.constant 0 : index
        %50 = vector.load %arg16[%49, %c0_28] : memref<256x128xf32, #tpu.memory_space<vmem>>, vector<128x128xf32>
        %cst = arith.constant dense<0.000000e+00> : vector<128x128xf32>
        %51 = tpu.matmul %23, %48, %cst {dimension_numbers = #tpu.dot_dimension_numbers<[1], [0], [0], [1], [0, 0, 1, 1], [], []>} : vector<128x128xf32>, vector<128x128xf32>, vector<128x128xf32> -> vector<128x128xf32>
        %52 = arith.addf %50, %51 : vector<128x128xf32>
        %53 = arith.index_cast %1 : i32 to index
        %c0_29 = arith.constant 0 : index
        %54 = vector.load %arg16[%53, %c0_29] : memref<256x128xf32, #tpu.memory_space<vmem>>, vector<128x128xf32>
        tpu.vector_store %arg16[%53, %c0_29], %52 {strides = array<i32>} : memref<256x128xf32, #tpu.memory_space<vmem>>, vector<128x128xf32>,
      } else {
      }
      %c1_i32_20 = arith.constant 1 : i32
      %39 = arith.cmpi eq, %arg0, %c1_i32_20 : i32
      %40 = arith.extui %39 : i1 to i32
      %c0_i32_21 = arith.constant 0 : i32
      %41 = arith.cmpi ne, %40, %c0_i32_21 : i32
      scf.if %41 {
        %c128 = arith.constant 128 : index
        %c0_26 = arith.constant 0 : index
        %48 = vector.load %arg9[%c128, %c0_26] : memref<384x128xf32, #tpu.memory_space<vmem>>, vector<128x128xf32>
        %49 = arith.index_cast %1 : i32 to index
        %c0_27 = arith.constant 0 : index
        %50 = vector.load %arg16[%49, %c0_27] : memref<256x128xf32, #tpu.memory_space<vmem>>, vector<128x128xf32>
        %cst = arith.constant dense<0.000000e+00> : vector<128x128xf32>
        %51 = tpu.matmul %23, %48, %cst {dimension_numbers = #tpu.dot_dimension_numbers<[1], [0], [0], [1], [0, 0, 1, 1], [], []>} : vector<128x128xf32>, vector<128x128xf32>, vector<128x128xf32> -> vector<128x128xf32>
        %52 = arith.addf %50, %51 : vector<128x128xf32>
        %53 = arith.index_cast %1 : i32 to index
        %c0_28 = arith.constant 0 : index
        %54 = vector.load %arg16[%53, %c0_28] : memref<256x128xf32, #tpu.memory_space<vmem>>, vector<128x128xf32>
        tpu.vector_store %arg16[%53, %c0_28], %52 {strides = array<i32>} : memref<256x128xf32, #tpu.memory_space<vmem>>, vector<128x128xf32>,
      } else {
      }
      %c3_i32_22 = arith.constant 3 : i32
      %42 = arith.cmpi eq, %arg0, %c3_i32_22 : i32
      %43 = arith.extui %42 : i1 to i32
      %c0_i32_23 = arith.constant 0 : i32
      %44 = arith.cmpi ne, %43, %c0_i32_23 : i32
      scf.if %44 {
        %c256 = arith.constant 256 : index
        %c0_26 = arith.constant 0 : index
        %48 = vector.load %arg9[%c256, %c0_26] : memref<384x128xf32, #tpu.memory_space<vmem>>, vector<128x128xf32>
        %49 = arith.index_cast %1 : i32 to index
        %c0_27 = arith.constant 0 : index
        %50 = vector.load %arg16[%49, %c0_27] : memref<256x128xf32, #tpu.memory_space<vmem>>, vector<128x128xf32>
        %cst = arith.constant dense<0.000000e+00> : vector<128x128xf32>
        %51 = tpu.matmul %23, %48, %cst {dimension_numbers = #tpu.dot_dimension_numbers<[1], [0], [0], [1], [0, 0, 1, 1], [], []>} : vector<128x128xf32>, vector<128x128xf32>, vector<128x128xf32> -> vector<128x128xf32>
        %52 = arith.addf %50, %51 : vector<128x128xf32>
        %53 = arith.index_cast %1 : i32 to index
        %c0_28 = arith.constant 0 : index
        %54 = vector.load %arg16[%53, %c0_28] : memref<256x128xf32, #tpu.memory_space<vmem>>, vector<128x128xf32>
        tpu.vector_store %arg16[%53, %c0_28], %52 {strides = array<i32>} : memref<256x128xf32, #tpu.memory_space<vmem>>, vector<128x128xf32>,
      } else {
      }
      %c3_i32_24 = arith.constant 3 : i32
      %45 = arith.cmpi eq, %arg0, %c3_i32_24 : i32
      %46 = arith.extui %45 : i1 to i32
      %c0_i32_25 = arith.constant 0 : i32
      %47 = arith.cmpi ne, %46, %c0_i32_25 : i32
      scf.if %47 {
        %48 = arith.index_cast %1 : i32 to index
        %c0_26 = arith.constant 0 : index
        %49 = vector.load %arg16[%48, %c0_26] : memref<256x128xf32, #tpu.memory_space<vmem>>, vector<128x128xf32>
        %50 = tpu.iota {dimensions = array<i32: 1>} : vector<128x128xi32>
        %c8_i32 = arith.constant 8 : i32
        %51 = vector.broadcast %c8_i32 : i32 to vector<128x128xi32>
        %52 = arith.cmpi slt, %50, %51 : vector<128x128xi32>
        %cst = arith.constant 0.000000e+00 : f32
        %53 = vector.broadcast %cst : f32 to vector<128x128xf32>
        %54 = arith.maximumf %49, %53 : vector<128x128xf32>
        %55 = arith.select %52, %49, %54 : vector<128x128xi1>, vector<128x128xf32>
        %c0_27 = arith.constant 0 : index
        %c0_28 = arith.constant 0 : index
        %56 = vector.load %arg11[%c0_27, %c0_28] : memref<128x128xf32, #tpu.memory_space<vmem>>, vector<128x128xf32>
        tpu.vector_store %arg11[%c0_27, %c0_28], %55 {strides = array<i32>} : memref<128x128xf32, #tpu.memory_space<vmem>>, vector<128x128xf32>,
        %57 = tpu.iota {dimensions = array<i32: 0>} : vector<128x1xi32>
        %58 = vector.broadcast %1 : i32 to vector<128x1xi32>
        %59 = arith.addi %58, %57 : vector<128x1xi32>
        %c250_i32 = arith.constant 250 : i32
        %60 = vector.broadcast %c250_i32 : i32 to vector<128x1xi32>
        %61 = arith.cmpi slt, %59, %60 : vector<128x1xi32>
        %cst_29 = arith.constant 0.000000e+00 : f32
        %62 = vector.shape_cast %61 : vector<128x1xi1> to vector<128x1xi1>
        %63 = vector.broadcast %62 : vector<128x1xi1> to vector<128x128xi1>
        %64 = vector.broadcast %cst_29 : f32 to vector<128x128xf32>
        %65 = arith.select %63, %55, %64 : vector<128x128xi1>, vector<128x128xf32>
        %cst_30 = arith.constant dense<0.000000e+00> : vector<128xf32>
        %66 = vector.multi_reduction <add>, %65, %cst_30 [0] : vector<128x128xf32> to vector<128xf32>
        %67 = vector.shape_cast %66 : vector<128xf32> to vector<1x128xf32>
        %68 = arith.mulf %65, %65 : vector<128x128xf32>
        %cst_31 = arith.constant dense<0.000000e+00> : vector<128xf32>
        %69 = vector.multi_reduction <add>, %68, %cst_31 [0] : vector<128x128xf32> to vector<128xf32>
        %70 = vector.shape_cast %69 : vector<128xf32> to vector<1x128xf32>
        %71 = tpu.concatenate %67, %70 in 0 : vector<1x128xf32>, vector<1x128xf32> -> vector<2x128xf32>
        %c0_i32_32 = arith.constant 0 : i32
        %72 = arith.cmpi eq, %arg1, %c0_i32_32 : i32
        %73 = arith.extui %72 : i1 to i32
        %c0_i32_33 = arith.constant 0 : i32
        %74 = arith.cmpi ne, %73, %c0_i32_33 : i32
        scf.if %74 {
          %c0_36 = arith.constant 0 : index
          %c0_37 = arith.constant 0 : index
          %78 = vector.load %arg12[%c0_36, %c0_37] : memref<2x128xf32, #tpu.memory_space<vmem>>, vector<2x128xf32>
          tpu.vector_store %arg12[%c0_36, %c0_37], %71 {strides = array<i32>} : memref<2x128xf32, #tpu.memory_space<vmem>>, vector<2x128xf32>,
        } else {
        }
        %c0_i32_34 = arith.constant 0 : i32
        %75 = arith.cmpi sgt, %arg1, %c0_i32_34 : i32
        %76 = arith.extui %75 : i1 to i32
        %c0_i32_35 = arith.constant 0 : i32
        %77 = arith.cmpi ne, %76, %c0_i32_35 : i32
        scf.if %77 {
          %c0_36 = arith.constant 0 : index
          %c0_37 = arith.constant 0 : index
          %78 = vector.load %arg12[%c0_36, %c0_37] : memref<2x128xf32, #tpu.memory_space<vmem>>, vector<2x128xf32>
          %79 = arith.addf %78, %71 : vector<2x128xf32>
          %c0_38 = arith.constant 0 : index
          %c0_39 = arith.constant 0 : index
          %80 = vector.load %arg12[%c0_38, %c0_39] : memref<2x128xf32, #tpu.memory_space<vmem>>, vector<2x128xf32>
          tpu.vector_store %arg12[%c0_38, %c0_39], %79 {strides = array<i32>} : memref<2x128xf32, #tpu.memory_space<vmem>>, vector<2x128xf32>,
        } else {
        }
      } else {
      }
    } else {
    }
    return
  }
  func.func @transform_0(%arg0: i32, %arg1: i32, %arg2: i32) -> (i32, i32) {
    %c0_i32 = arith.constant 0 : i32
    %c0_i32_0 = arith.constant 0 : i32
    %c0_i32_1 = arith.constant 0 : i32
    return %c0_i32, %c0_i32_0 : i32, i32
  }
  func.func @transform_1(%arg0: i32, %arg1: i32, %arg2: i32) -> (i32, i32) {
    %c0_i32 = arith.constant 0 : i32
    %c0_i32_0 = arith.constant 0 : i32
    %c0_i32_1 = arith.constant 0 : i32
    return %c0_i32, %c0_i32_0 : i32, i32
  }
  func.func @transform_2(%arg0: i32, %arg1: i32, %arg2: i32) -> (i32, i32) {
    %c0_i32 = arith.constant 0 : i32
    return %arg1, %arg2 : i32, i32
  }
  func.func @transform_3(%arg0: i32, %arg1: i32, %arg2: i32) -> (i32, i32) {
    %c0_i32 = arith.constant 0 : i32
    %0 = arith.cmpi eq, %arg0, %c0_i32 : i32
    %c1_i32 = arith.constant 1 : i32
    %1 = arith.select %0, %arg1, %c1_i32 : i32
    %c0_i32_0 = arith.constant 0 : i32
    %c0_i32_1 = arith.constant 0 : i32
    return %1, %c0_i32_0 : i32, i32
  }
  func.func @transform_4(%arg0: i32, %arg1: i32, %arg2: i32) -> (i32, i32) {
    %c0_i32 = arith.constant 0 : i32
    %c0_i32_0 = arith.constant 0 : i32
    %c0_i32_1 = arith.constant 0 : i32
    return %c0_i32, %c0_i32_0 : i32, i32
  }
  func.func @transform_5(%arg0: i32, %arg1: i32, %arg2: i32) -> (i32, i32) {
    %c0_i32 = arith.constant 0 : i32
    %c0_i32_0 = arith.constant 0 : i32
    %c0_i32_1 = arith.constant 0 : i32
    return %c0_i32, %c0_i32_0 : i32, i32
  }
  func.func @transform_6(%arg0: i32, %arg1: i32, %arg2: i32) -> (i32, i32) {
    %c0_i32 = arith.constant 0 : i32
    %c0_i32_0 = arith.constant 0 : i32
    %c0_i32_1 = arith.constant 0 : i32
    return %c0_i32, %c0_i32_0 : i32, i32
  }
  func.func @transform_7(%arg0: i32, %arg1: i32, %arg2: i32) -> (i32, i32) {
    %c0_i32 = arith.constant 0 : i32
    %c0_i32_0 = arith.constant 0 : i32
    %c0_i32_1 = arith.constant 0 : i32
    return %c0_i32, %c0_i32_0 : i32, i32
  }
  func.func @transform_8(%arg0: i32, %arg1: i32, %arg2: i32) -> (i32, i32) {
    %c3_i32 = arith.constant 3 : i32
    %0 = arith.cmpi eq, %arg0, %c3_i32 : i32
    %c0_i32 = arith.constant 0 : i32
    %1 = arith.select %0, %arg1, %c0_i32 : i32
    %c0_i32_0 = arith.constant 0 : i32
    %c0_i32_1 = arith.constant 0 : i32
    return %1, %c0_i32_0 : i32, i32
  }
  func.func @transform_9(%arg0: i32, %arg1: i32, %arg2: i32) -> (i32, i32) {
    %c0_i32 = arith.constant 0 : i32
    %c0_i32_0 = arith.constant 0 : i32
    %c0_i32_1 = arith.constant 0 : i32
    return %c0_i32, %c0_i32_0 : i32, i32
  }
}

</mosaic_0001>

<bundles_post_ra>
// kernel: tpu_custom_call.1
= control target key start
LH: loop header
LB: loop body
LE: loop exit
PB: predicated region body
PF: predicated region fallthrough
CT: control target
= control target key end

     0   :  { %s5686_s0 = inlined_call_operand.vmem [shape: f32[256,128], index: 0, kind: input, shape index: {}]   ;;  %s5687_s1 = inlined_call_operand.vmem [shape: f32[256,1], index: 1, kind: input, shape index: {}]   ;;  %s5688_s2 = inlined_call_operand.hbm [shape: bf16[256,256], index: 2, kind: input, shape index: {}]   ;;  %s5689_s3 = inlined_call_operand.hbm [shape: f32[256,128], index: 3, kind: input, shape index: {}]   ;;  %s5690_s4 = inlined_call_operand.hbm [shape: f32[128,128], index: 4, kind: input, shape index: {}]   ;;  %s5691_s5 = inlined_call_operand.hbm [shape: f32[384,128], index: 5, kind: input, shape index: {}]   ;;  %s5692_s6 = inlined_call_operand.hbm [shape: f32[384,128], index: 6, kind: input, shape index: {}]   ;;  %s5693_s7 = inlined_call_operand.vmem [shape: f32[1,128], index: 7, kind: input, shape index: {}]   ;;  %s5694_s8 = inlined_call_operand.hbm [shape: f32[256,128], index: 8, kind: output, shape index: {0}]   ;;  %s5695_s9 = inlined_call_operand.hbm [shape: f32[2,128], index: 9, kind: output, shape index: {1}]  }
   0x1   :  { %5736 = sst [smem:[#allocation45_spill]] %s5686_s0 }
   0x2   :  { %5737 = sst [smem:[#allocation46_spill]] %s5687_s1 }
   0x3   :  { %5738 = sst [smem:[#allocation47_spill]] %s5688_s2 }
   0x4   :  { %5739 = sst [smem:[#allocation48_spill]] %s5690_s4 }
   0x5   :  { %5740 = sst [smem:[#allocation49_spill]] %s5691_s5 }
   0x6   :  { %5741 = sst [smem:[#allocation50_spill]] %s5692_s6 }
   0x7   :  { %5742 = sst [smem:[#allocation51_spill]] %s5693_s7 }
   0x8   :  { %5743 = sst [smem:[#allocation52_spill]] %s5694_s8 }
   0x9   :  { %5744 = sst [smem:[#allocation53_spill]] %s5695_s9 }
   0xa   :  { %15 = vsyncpa [#allocation7], 0 }
   0xb   :  { %17 = vsyncpa [#allocation7 + $0x1], 0 }
   0xc   :  { %18 = vsyncpa [#allocation10], 0 }
   0xd   :  { %20 = vsyncpa [#allocation10 + $0x1], 0 }
   0xe   :  { %21 = vsyncpa [#allocation13], 0 }
   0xf   :  { %22 = vsyncpa [#allocation8], 0 }
  0x10   :  { %24 = vsyncpa [#allocation8 + $0x1], 0 }
  0x11   :  { %25 = vsyncpa [#allocation17], 0  ;;  %s4403_s30 = smov 0   ;;  %s4405_s10 = smov 0  }
  0x12   :  { %s4407_s11 = smov 0   ;;  %s4409_s12 = smov 0  }
  0x13   :  { %s4411_s13 = smov 0   ;;  %s4413_s14 = smov 0  }
  0x14   :  { %s4415_s15 = smov 0   ;;  %s4417_s16 = smov 0  }
  0x15   :  { %s4419_s17 = smov 0   ;;  %s4421_s18 = smov 0  }
  0x16   :  { %s4423_s19 = smov 0   ;;  %s4425_s20 = smov 0  }
  0x17   :  { %s4427_s21 = smov 0   ;;  %s4429_s22 = smov 0  }
  0x18   :  { %s4431_s23 = smov 0   ;;  %s4433_s24 = smov 0  }
  0x19 LB: > { %5745 = sst [smem:[#allocation24_spill]] %s4277_s30  ;;  %s4480_s25 = sadd.s32 4294967295, %s4337_s24   ;;  %s4337_s24 = sphi %s4433_s24, %s31_s24   ;;  %s4333_s23 = sphi %s4431_s23, %s5847_s23   ;;  %s4329_s22 = sphi %s4429_s22, %s5857_s22   ;;  %s4325_s21 = sphi %s4427_s21, %s5846_s21   ;;  %s4321_s20 = sphi %s4425_s20, %s5845_s20   ;;  %s4317_s19 = sphi %s4423_s19, %s5856_s19   ;;  %s4313_s18 = sphi %s4421_s18, %s5843_s18   ;;  %s4309_s17 = sphi %s4419_s17, %s5855_s17   ;;  %s4305_s16 = sphi %s4417_s16, %s5854_s16   ;;  %s4301_s15 = sphi %s4415_s15, %s5853_s15   ;;  %s4297_s14 = sphi %s4413_s14, %s5852_s14   ;;  %s4293_s13 = sphi %s4411_s13, %s5851_s13   ;;  %s4289_s12 = sphi %s4409_s12, %s5850_s12   ;;  %s4285_s11 = sphi %s4407_s11, %s5849_s11   ;;  %s4281_s10 = sphi %s4405_s10, %s5848_s10   ;;  %s4277_s30 = sphi %s4403_s30, %s5841_s30  }
  0x1a   : > { %5746 = sst [smem:[#allocation25_spill]] %s4281_s10  ;;  %s2868_s26 = sadd.s32 4294967294, %s4337_s24  }
  0x1b   : > { %5747 = sst [smem:[#allocation26_spill]] %s4313_s18  ;;  %p114_p0 = scmp.ne.s32.totalorder %s4305_s16, %s4301_s15 }
  0x1c   : > { %5748 = sst [smem:[#allocation27_spill]] %s4317_s19  ;;  %p5702_p1 = scmp.eq.s32.totalorder %s4480_s25, 0 }
  0x1d   : > { %5749 = sst [smem:[#allocation28_spill]] %s4321_s20  ;;  %p144_p2 = scmp.ne.s32.totalorder %s4293_s13, %s4289_s12 }
  0x1e   : > { %5750 = sst [smem:[#allocation29_spill]] %s4325_s21  ;;  %p4489_p3 = por %p5702_p1, %p114_p0 }
  0x1f   : > { %5751 = sst [smem:[#allocation30_spill]] %s4329_s22  ;;  %p255_p4 = scmp.ne.s32.totalorder %s4285_s11, %s4281_s10 }
  0x20   : > { %5752 = sst [smem:[#allocation31_spill]] %s4333_s23  ;;  %p4497_p5 = por %p144_p2, %p5702_p1 }
  0x21   : > { %5753 = sst [smem:[#allocation32_spill]] %s4480_s25  ;;  %p5701_p6 = scmp.eq.s32.totalorder %s4480_s25, 15 }
  0x22   : > { %s5754_s28 = scalar_select %p4489_p3, 1, 0 }
  0x23   : > { %s5756_s29 = scalar_select %p4497_p5, 1, 0 }
  0x24   : > { %5755 = sst [smem:[#allocation33_spill]] %s5754_s28  ;;  %p261_p7 = scmp.ne.s32.totalorder %s4281_s10, %s4277_s30 }
  0x25   : > { %5757 = sst [smem:[#allocation34_spill]] %s5756_s29  ;;  %p262_p8 = scmp.eq.s32.totalorder %s2868_s26, 15 }
  0x26   : > { %p4506_p9 = por %p5701_p6, %p255_p4  ;;  %p2869_p10 = scmp.ge.s32.totalorder %s4337_s24, 1 }
  0x27   : > { %p4511_p11 = por %p262_p8, %p261_p7  ;;  %p290_p12 = scmp.lt.s32.totalorder %s4337_s24, 17 }
  0x28   : > { %s5758_s15 = scalar_select %p4506_p9, 1, 0 }
  0x29   : > { %s5760_s12 = scalar_select %p4511_p11, 1, 0 }
  0x2a   : > { %5759 = sst [smem:[#allocation35_spill]] %s5758_s15  ;;  %p4516_p13 = pnand %p2869_p10, %p290_p12 }
  0x2b   : > { %5761 = sst [smem:[#allocation36_spill]] %s5760_s12  ;;  %s4339_s9 = smov [#allocation11]  }
  0x2c   : > { %s308_s8 = sshll.u32 %s4339_s9, 4  ;;  %p3831_p0 = pneg %p4516_p13  ;;  %s309_s8 = int_to_ptr.vmem [resolvable:$true] %s308_s8 }
  0x2d   : > { %s4340_s30 = smov [#allocation12]   ;;  %s4341_s15 = smov [#allocation14]  }
  0x2e   : > { %p4524_p2 = pnand %p3831_p0, %p5702_p1  ;;  %s321_s12 = sshll.u32 %s4340_s30, 4  ;;  %s322_s12 = int_to_ptr.vmem [resolvable:$true] %s321_s12 }
  0x2f   : > { %s334_s7 = sshll.u32 %s4341_s15, 4  ;;  %s4014_s1 = scalar_lea.vmem %s309_s8, 2048  ;;  %s335_s7 = int_to_ptr.vmem [resolvable:$true] %s334_s7 }
  0x30   : > { %p4005_p4 = pneg %p4524_p2  ;;  %p4015_p7 = scmp.ne.s32.totalorder %s309_s8, %s4014_s1 }
  0x31   : > { %p4022_p12 = scmp.lt.s32.totalorder %s309_s8, %s309_s8  ;;  %p4023_p0 = scmp.lt.s32.totalorder %s4014_s1, %s4014_s1 }
  0x32   : > { %p4017_p8 = pnand %p4015_p7, %p4005_p4 }
  0x33   : > { %p4024_p6 = por %p4023_p0, %p4022_p12 }
  0x34   : > { %p4018_p10 = pneg %p4017_p8 }
  0x36   : > { %p4025_p1 = pnand %p4024_p6, %p4018_p10 }
  0x38   : > { %4028 = shalt.err (!%p4025_p1)
}
  0x39   : > { %s5710_s9 = smov 128   ;;  %s5709_s30 = smov 8  }
  0x3a   : > { %s5764_s4 = sld [smem:[#allocation48_spill]]  ;;  %s4040_s20 = scalar_lea.vmem %s322_s12, 6144 }
  0x3b   : > { %p4041_p7 = scmp.ne.s32.totalorder %s322_s12, %s4040_s20  ;;  %p4048_p6 = scmp.lt.s32.totalorder %s322_s12, %s322_s12 }
  0x3c   : > { %p4049_p1 = scmp.lt.s32.totalorder %s4040_s20, %s4040_s20 }
  0x3d   : > { %p4043_p8 = pnand %p4041_p7, %p4005_p4 }
  0x3e   : > { %p4050_p10 = por %p4049_p1, %p4048_p6 }
  0x3f   : > { %p4044_p12 = pneg %p4043_p8 }
  0x40   : > { %3834 = dma.hbm_to_vmem [thread:$0]  (!%p4524_p2), %s5764_s4, 2048, %s309_s8, [#allocation10], %s5710_s9, %s5710_s9, %s5709_s30  }
  0x41   : > { %p4051_p0 = pnand %p4050_p10, %p4044_p12 }
  0x43   : > { %4054 = shalt.err (!%p4051_p0)
}
  0x44   : > { %s5765_s5 = sld [smem:[#allocation49_spill]]  ;;  %s4066_s0 = scalar_lea.vmem %s335_s7, 6144 }
  0x45   : > { %p4067_p11 = scmp.ne.s32.totalorder %s335_s7, %s4066_s0  ;;  %p4074_p6 = scmp.lt.s32.totalorder %s335_s7, %s335_s7 }
  0x46   : > { %p4075_p12 = scmp.lt.s32.totalorder %s4066_s0, %s4066_s0 }
  0x47   : > { %p4069_p7 = pnand %p4067_p11, %p4005_p4 }
  0x48   : > { %p4076_p1 = por %p4075_p12, %p4074_p6 }
  0x49   : > { %p4070_p8 = pneg %p4069_p7 }
  0x4a   : > { %3837 = dma.hbm_to_vmem [thread:$0]  (!%p4524_p2), %s5765_s5, 6144, %s322_s12, [#allocation13], %s5710_s9, %s5710_s9, %s5709_s30  }
  0x4b   : > { %p4077_p10 = pnand %p4076_p1, %p4070_p8 }
  0x4d   : > { %4080 = shalt.err (!%p4077_p10)
}
  0x4e   : > { %s5766_s6 = sld [smem:[#allocation50_spill]]  ;;  %s43_s20 = sadd.s32 1, %s4325_s21 }
  0x4f   : > { %p44_p11 = scmp.ge.s32.totalorder %s43_s20, 2  ;;  %s46_s12 = sadd.s32 1, %s4329_s22 }
  0x50   : > { %s101_s26 = sadd.s32 1, %s4309_s17  ;;  %p108_p4 = scmp.ne.s32.totalorder %s4309_s17, %s4305_s16 }
  0x51   : > { %s5859_s20 = smov (%p44_p11, %s43_s20), 0  ;;  %s5861_s12 = smov (!%p44_p11, %s46_s12), %s4329_s22 }
  0x52   : > { %5767 = sst [smem:[#allocation37_spill]] %s5859_s20  ;;  %s97_s15 = ssub.s32 %s4325_s21, %s5859_s20 }
  0x53   : > { %p5723_p0 = scmp.eq.s32.totalorder %s4337_s24, 0  ;;  %p3855_p7 = scmp.lt.s32.totalorder %s4337_s24, 16 }
  0x54   : > { %3840 = dma.hbm_to_vmem [thread:$0]  (!%p4524_p2), %s5766_s6, 6144, %s335_s7, [#allocation13], %s5710_s9, %s5710_s9, %s5709_s30  }
  0x55   : > { %p5724_p2 = scmp.ge.s32.totalorder %s5861_s12, 2  ;;  %p4580_p8 = por %p5723_p0, %p108_p4 }
  0x56   : > { %s351_s1 = sand.u32 1, %s4309_s17   ;;  %s2911_s9 = sshll.u32 %s4329_s22, 5 }
  0x57   : > { %s4588_s0 = scalar_select %p5724_p2, 0, %s5861_s12  }
  0x58   : > { %s2874_s8 = sshll.u32 %s351_s1, 6  ;;  %s361_s4 = sadd.s32 %s4325_s21, %s2911_s9 }
  0x59   : > { %s96_s18 = ssub.s32 %s4329_s22, %s4588_s0  ;;  %s2877_s5 = sshll.u32 %s361_s4, 6 }
  0x5a   : > { %s98_s30 = sor.u32 %s97_s15, %s96_s18  ;;  %s355_s6 = scalar_lea.vmem [#allocation6], %s2874_s8 }
  0x5b   : > { %p99_p6 = scmp.eq.s32.totalorder %s98_s30, 0  ;;  %s364_s20 = sshll.u32 %s355_s6, 4  ;;  %s365_s20 = int_to_ptr.vmem [resolvable:$true] %s364_s20 }
  0x5c   : > { %s5769_s2 = sld [smem:[#allocation47_spill]]  ;;  %p4604_p12 = pnand %p3855_p7, %p4580_p8 }
  0x5d   : > { %s4595_s19 = scalar_select %p99_p6, %s4309_s17, %s101_s26  }
  0x5e   : > { %s352_s15 = scalar_lea.sflag [#allocation7], %s351_s1  ;;  %p4083_p1 = pneg %p4604_p12 }
  0x5f   : > { %s4094_s4 = scalar_lea.vmem %s365_s20, 1024  ;;  %s4344_s6 = smov [#allocation6]  }
  0x60   : > { %p4095_p10 = scmp.ne.s32.totalorder %s365_s20, %s4094_s4  ;;  %s4099_s9 = sshll.u32 %s4344_s6, 4  ;;  %s4100_s9 = int_to_ptr.vmem [resolvable:$false] %s4099_s9 }
  0x61   : > { %s4101_s10 = scalar_lea.vmem %s4100_s9, 2048  ;;  %p4102_p6 = scmp.lt.s32.totalorder %s365_s20, %s4100_s9 }
  0x62   : > { %s363_s25 = scalar_lea.hbm %s5769_s2, %s2877_s5  ;;  %p4097_p11 = pnand %p4095_p10, %p4083_p1 }
  0x63   : > { %p4103_p0 = scmp.lt.s32.totalorder %s4101_s10, %s4094_s4 }
  0x64   : > { %p4098_p4 = pneg %p4097_p11 }
  0x65   : > { %p4104_p2 = por %p4103_p0, %p4102_p6 }
  0x67   : > { %p4105_p9 = pnand %p4104_p2, %p4098_p4 }
  0x69   : > { %4108 = shalt.err (!%p4105_p9)
}
  0x6a   : > { %s4345_s5 = smov 64   ;;  %s4346_s29 = smov 4  }
  0x6b   : > { %s5771_s30 = smov 128   ;;  %s50_s26 = sadd.s32 1, %s4333_s23 }
  0x6c   : > { %3844 = dma.hbm_to_vmem [thread:$0]  (!%p4604_p12), %s363_s25, 1024, %s365_s20, %s352_s15, %s5771_s30, %s4345_s5, %s4346_s29  }
  0x6d   : > { %p124_p9 = scmp.eq.s32.totalorder %s4333_s23, 0  ;;  %p5772_p0 = scmp.ge.s32.totalorder %s5861_s12, 2 }
  0x6e   : > { %s131_s1 = sadd.s32 1, %s4297_s14  ;;  %p138_p8 = scmp.ne.s32.totalorder %s4297_s14, %s4293_s13 }
  0x6f   : > { %s5863_s26 = smov (!%p5772_p0, %s50_s26), %s4333_s23  ;;  %p238_p1 = scmp.eq.s32.totalorder %s4333_s23, 3 }
  0x70   : > { %s125_s7 = scalar_select %p124_p9, %s4329_s22, 1 }
  0x71   : > { %p52_p2 = scmp.ge.s32.totalorder %s5863_s26, 4  ;;  %p5774_p10 = scmp.eq.s32.totalorder %s4337_s24, 0 }
  0x72   : > { %s374_s28 = sand.u32 1, %s4337_s24   ;;  %s376_s4 = sand.u32 1, %s4297_s14  }
  0x73   : > { %s5865_s26 = smov (%p52_p2, %s5863_s26), 0  ;;  %p4627_p12 = por %p138_p8, %p5774_p10 }
  0x74   : > { %5773 = sst [smem:[#allocation38_spill]] %s5865_s26  ;;  %p126_p11 = scmp.eq.s32.totalorder %s5865_s26, 0 }
  0x75   : > { %p240_p4 = scmp.eq.s32.totalorder %s5865_s26, 3  ;;  %s5776_s9 = sadd.s32 1, %s4285_s11 }
  0x76   : > { %s239_s20 = scalar_select %p238_p1, %s4329_s22, 0 }
  0x77   : > { %s127_s12 = scalar_select %p126_p11, %s4588_s0, 1 }
  0x78   : > { %s241_s8 = scalar_select %p240_p4, %s4588_s0, 0 }
  0x79   : > { %s128_s18 = ssub.s32 %s125_s7, %s127_s12  ;;  %s2878_s5 = sshll.u32 %s376_s4, 7 }
  0x7a   : > { %p129_p6 = scmp.eq.s32.totalorder %s128_s18, 0  ;;  %s242_s15 = ssub.s32 %s239_s20, %s241_s8 }
  0x7b   : > { %p243_p9 = scmp.eq.s32.totalorder %s242_s15, 0  ;;  %s2912_s29 = sshll.u32 %s125_s7, 11 }
  0x7c   : > { %s4639_s6 = scalar_select %p129_p6, %s4297_s14, %s131_s1  }
  0x7d   : > { %s4644_s10 = scalar_select %p243_p9, %s4285_s11, %s5776_s9  }
  0x7e   : > { %s386_s26 = scalar_lea.hbm %s5689_s3, %s2912_s29  ;;  %s378_s21 = scalar_lea.vmem [#allocation9], %s2878_s5 }
  0x7f   : > { %s387_s22 = sshll.u32 %s378_s21, 4  ;;  %p4653_p0 = pnand %p3855_p7, %p4627_p12  ;;  %s388_s22 = int_to_ptr.vmem [resolvable:$true] %s387_s22 }
  0x80   : > { %s375_s1 = scalar_lea.sflag [#allocation10], %s374_s28  ;;  %s4122_s20 = scalar_lea.vmem %s388_s22, 2048 }
  0x81   : > { %p4111_p2 = pneg %p4653_p0  ;;  %p4123_p8 = scmp.ne.s32.totalorder %s388_s22, %s4122_s20 }
  0x82   : > { %s4347_s7 = smov [#allocation9]  }
  0x83   : > { %p4125_p1 = pnand %p4123_p8, %p4111_p2  ;;  %s4127_s2 = sshll.u32 %s4347_s7, 4  ;;  %s4128_s2 = int_to_ptr.vmem [resolvable:$false] %s4127_s2 }
  0x84   : > { %s4129_s23 = scalar_lea.vmem %s4128_s2, 4096  ;;  %p4130_p11 = scmp.lt.s32.totalorder %s388_s22, %s4128_s2 }
  0x85   : > { %p4126_p10 = pneg %p4125_p1  ;;  %p4131_p4 = scmp.lt.s32.totalorder %s4129_s23, %s4122_s20 }
  0x87   : > { %p4132_p6 = por %p4131_p4, %p4130_p11 }
  0x89   : > { %p4133_p7 = pnand %p4132_p6, %p4126_p10 }
  0x8b   : > { %4136 = shalt.err (!%p4133_p7)
}
  0x8c   : > { %s5778_s21 = smov 8   ;;  %399 = sbr.rel (%p4516_p13) target bundleno = 1916 (0x77c), region = 52 }
  0x8d   : > { %3847 = dma.hbm_to_vmem [thread:$0]  (!%p4653_p0), %s386_s26, 2048, %s388_s22, %s375_s1, %s5771_s30, %s5771_s30, %s5778_s21  }
  0x8e   : > { %s401_s28 = sand.u32 (!%p4516_p13), 1, %s4305_s16  }
  0x8f   : > { %s2882_s8 = sshll.u32 (!%p4516_p13), %s401_s28, 6  ;;  %s402_s18 = scalar_lea.sflag (!%p4516_p13), [#allocation7], %s401_s28 }
  0x90   : > { %s4667_s15 = scalar_lea.vmem (!%p4516_p13), [#allocation6], %s2882_s8 }
  0x91   : > { %4252 = dma.done.wait (%p4489_p3), %s402_s18, 1024  }
  0x92   : > { %4254 = vsyncadd (%p4489_p3), %s402_s18, 4294966272  ;;  %s5780_s4 = sld [smem:[#allocation32_spill]]  ;;  %s412_s22 = sand.u32 1, %s4293_s13  }
  0x93   : > { %s2883_s30 = sshll.u32 %s412_s22, 7 }
  0x94   : > { %s4675_s26 = scalar_lea.vmem [#allocation9], %s2883_s30 }
  0x98   : > { %s410_s5 = sand.u32 1, %s5780_s4  }
  0x99   : > { %s411_s27 = scalar_lea.sflag [#allocation10], %s410_s5 }
  0x9a   : > { %4256 = dma.done.wait (%p4497_p5), %s411_s27, 2048  }
  0x9b   : > { %4258 = vsyncadd (%p4497_p5), %s411_s27, 4294965248  ;;  %p5782_p13 = scmp.eq.s32.totalorder %s5780_s4, 0 }
  0x9d   : > { %4260 = dma.done.wait (%p5782_p13), [#allocation10], 2048   ;;  %p5783_p12 = pmov %p5782_p13 }
  0x9f   : > { %4262 = vsyncadd (%p5783_p12), [#allocation10], 4294965248  ;;  %p5784_p3 = pmov %p5783_p12 }
  0xa1   : > { %4264 = dma.done.wait (%p5784_p3), [#allocation13], 12288   ;;  %p5785_p9 = pmov %p5784_p3 }
  0xa2   : > { %s5786_s29 = sld [smem:[#allocation25_spill]] }
  0xa3   : > { %4266 = vsyncadd (%p5785_p9), [#allocation13], 4294955008  ;;  %s5787_s12 = sld [smem:[#allocation27_spill]] }
  0xa4   : > { %s5788_s1 = sld [smem:[#allocation26_spill]] }
  0xa5   : > { %s5789_s20 = sld [smem:[#allocation28_spill]] }
  0xa8   : > { %s461_s7 = sand.u32 1, %s5786_s29  }
  0xa9   : > { %s4691_s2 = sshll.u32 %s5787_s12, 7  ;;  %s2887_s23 = sshll.u32 %s461_s7, 7 }
  0xaa   : > { %s2889_s21 = sshll.u32 %s5788_s1, 7  ;;  %p483_p2 = scmp.eq.s32.totalorder %s5787_s12, 0 }
  0xab   : > { %p476_p5 = scmp.lt.s32.totalorder %s5789_s20, 0  ;;  %s477_s25 = ssub.s32 0, %s5789_s20 }
  0xac   : > { %p482_p0 = scmp.eq.s32.totalorder %s5789_s20, 0  ;;  %s2890_s28 = smin.u32 %s5789_s20, %s477_s25 }
  0xad   : > { %s479_s8 = sand.u32 1, %s2890_s28   ;;  %p486_p8 = scmp.eq.s32.totalorder %s5788_s1, 0 }
  0xae   : > { %s480_s18 = ssub.s32 0, %s479_s8  ;;  %p484_p1 = pnand %p483_p2, %p482_p0 }
  0xaf   : > { %s5867_s18 = smov (!%p476_p5, %s480_s18), %s479_s8  ;;  %s4704_s4 = scalar_lea.vmem [#allocation15], %s2887_s23 }
  0xb0   : > { %p485_p10 = pneg %p484_p1 }
  0xb2   : > { %p487_p11 = pnand %p486_p8, %p485_p10 }
  0xb3   : > { %s5790_s22 = sld [smem:[#allocation45_spill]] (!%p487_p11) }
  0xb4   : > { %490 = sbr.rel (%p487_p11) target bundleno = 202 (0xca), region = 76 }
  0xb9   : > { %v491_v0 = vld [vmem:[%s5790_s22] sm:$0xff]  ;;  %v492_v1 = vld [vmem:[%s5790_s22 + $0x8] sm:$0xff]  ;;  %v493_v2 = vld [vmem:[%s5790_s22 + $0x10] sm:$0xff] }
  0xba   : > { %523 = vst [vmem:[#allocation2] sm:$0xff] %v491_v0  ;;  %524 = vst [vmem:[#allocation2 + $0x8] sm:$0xff] %v492_v1  ;;  %v494_v3 = vld [vmem:[%s5790_s22 + $0x18] sm:$0xff]  ;;  %v495_v4 = vld [vmem:[%s5790_s22 + $0x20] sm:$0xff] }
  0xbb   : > { %525 = vst [vmem:[#allocation2 + $0x10] sm:$0xff] %v493_v2  ;;  %v496_v5 = vld [vmem:[%s5790_s22 + $0x28] sm:$0xff]  ;;  %526 = vst [vmem:[#allocation2 + $0x18] sm:$0xff] %v494_v3  ;;  %v497_v6 = vld [vmem:[%s5790_s22 + $0x30] sm:$0xff] }
  0xbc   : > { %527 = vst [vmem:[#allocation2 + $0x20] sm:$0xff] %v495_v4  ;;  %528 = vst [vmem:[#allocation2 + $0x28] sm:$0xff] %v496_v5  ;;  %v498_v7 = vld [vmem:[%s5790_s22 + $0x38] sm:$0xff]  ;;  %v499_v8 = vld [vmem:[%s5790_s22 + $0x40] sm:$0xff] }
  0xbd   : > { %529 = vst [vmem:[#allocation2 + $0x30] sm:$0xff] %v497_v6  ;;  %530 = vst [vmem:[#allocation2 + $0x38] sm:$0xff] %v498_v7  ;;  %v500_v9 = vld [vmem:[%s5790_s22 + $0x48] sm:$0xff]  ;;  %v501_v10 = vld [vmem:[%s5790_s22 + $0x50] sm:$0xff] }
  0xbe   : > { %531 = vst [vmem:[#allocation2 + $0x40] sm:$0xff] %v499_v8  ;;  %v502_v11 = vld [vmem:[%s5790_s22 + $0x58] sm:$0xff]  ;;  %532 = vst [vmem:[#allocation2 + $0x48] sm:$0xff] %v500_v9  ;;  %v503_v12 = vld [vmem:[%s5790_s22 + $0x60] sm:$0xff] }
  0xbf   : > { %533 = vst [vmem:[#allocation2 + $0x50] sm:$0xff] %v501_v10  ;;  %534 = vst [vmem:[#allocation2 + $0x58] sm:$0xff] %v502_v11  ;;  %v504_v13 = vld [vmem:[%s5790_s22 + $0x68] sm:$0xff]  ;;  %v505_v14 = vld [vmem:[%s5790_s22 + $0x70] sm:$0xff] }
  0xc0   : > { %535 = vst [vmem:[#allocation2 + $0x60] sm:$0xff] %v503_v12  ;;  %536 = vst [vmem:[#allocation2 + $0x68] sm:$0xff] %v504_v13  ;;  %v506_v15 = vld [vmem:[%s5790_s22 + $0x78] sm:$0xff]  ;;  %v507_v16 = vld [vmem:[%s5790_s22 + $0x80] sm:$0xff] }
  0xc1   : > { %537 = vst [vmem:[#allocation2 + $0x70] sm:$0xff] %v505_v14  ;;  %v508_v17 = vld [vmem:[%s5790_s22 + $0x88] sm:$0xff]  ;;  %538 = vst [vmem:[#allocation2 + $0x78] sm:$0xff] %v506_v15  ;;  %v509_v18 = vld [vmem:[%s5790_s22 + $0x90] sm:$0xff] }
  0xc2   : > { %539 = vst [vmem:[#allocation2 + $0x80] sm:$0xff] %v507_v16  ;;  %540 = vst [vmem:[#allocation2 + $0x88] sm:$0xff] %v508_v17  ;;  %v510_v19 = vld [vmem:[%s5790_s22 + $0x98] sm:$0xff]  ;;  %v511_v20 = vld [vmem:[%s5790_s22 + $0xa0] sm:$0xff] }
  0xc3   : > { %541 = vst [vmem:[#allocation2 + $0x90] sm:$0xff] %v509_v18  ;;  %542 = vst [vmem:[#allocation2 + $0x98] sm:$0xff] %v510_v19  ;;  %v512_v21 = vld [vmem:[%s5790_s22 + $0xa8] sm:$0xff]  ;;  %v513_v22 = vld [vmem:[%s5790_s22 + $0xb0] sm:$0xff] }
  0xc4   : > { %543 = vst [vmem:[#allocation2 + $0xa0] sm:$0xff] %v511_v20  ;;  %v514_v23 = vld [vmem:[%s5790_s22 + $0xb8] sm:$0xff]  ;;  %544 = vst [vmem:[#allocation2 + $0xa8] sm:$0xff] %v512_v21  ;;  %v515_v24 = vld [vmem:[%s5790_s22 + $0xc0] sm:$0xff] }
  0xc5   : > { %545 = vst [vmem:[#allocation2 + $0xb0] sm:$0xff] %v513_v22  ;;  %546 = vst [vmem:[#allocation2 + $0xb8] sm:$0xff] %v514_v23  ;;  %v516_v25 = vld [vmem:[%s5790_s22 + $0xc8] sm:$0xff]  ;;  %v517_v26 = vld [vmem:[%s5790_s22 + $0xd0] sm:$0xff] }
  0xc6   : > { %547 = vst [vmem:[#allocation2 + $0xc0] sm:$0xff] %v515_v24  ;;  %548 = vst [vmem:[#allocation2 + $0xc8] sm:$0xff] %v516_v25  ;;  %v518_v27 = vld [vmem:[%s5790_s22 + $0xd8] sm:$0xff]  ;;  %v519_v28 = vld [vmem:[%s5790_s22 + $0xe0] sm:$0xff] }
  0xc7   : > { %549 = vst [vmem:[#allocation2 + $0xd0] sm:$0xff] %v517_v26  ;;  %v520_v29 = vld [vmem:[%s5790_s22 + $0xe8] sm:$0xff]  ;;  %550 = vst [vmem:[#allocation2 + $0xd8] sm:$0xff] %v518_v27  ;;  %v521_v30 = vld [vmem:[%s5790_s22 + $0xf0] sm:$0xff] }
  0xc8   : > { %551 = vst [vmem:[#allocation2 + $0xe0] sm:$0xff] %v519_v28  ;;  %552 = vst [vmem:[#allocation2 + $0xe8] sm:$0xff] %v520_v29  ;;  %v522_v31 = vld [vmem:[%s5790_s22 + $0xf8] sm:$0xff] }
  0xc9   : > { %553 = vst [vmem:[#allocation2 + $0xf0] sm:$0xff] %v521_v30  ;;  %554 = vst [vmem:[#allocation2 + $0xf8] sm:$0xff] %v522_v31 }
  0xca PF: > { %v4803_v32 = vld [vmem:[%s4667_s15] sm:$0xff]   ;;  %v4806_v33 = vld [vmem:[%s4667_s15 + $0x8] sm:$0xff]   ;;  %v4809_v34 = vld [vmem:[%s4667_s15 + $0x10] sm:$0xff]   ;;  %p587_p4 = scmp.eq.s32.totalorder %s5867_s18, 0  ;;  %p2891_p6 = scmp.ne.s32.totalorder %s5867_s18, 0 }
  0xcb   : > { %v2916_v35 = vunpack.c.l.bf16 %v4803_v32  ;;  %v2917_v36 = vunpack.c.h.bf16 %v4803_v32  ;;  %v2920_v37 = vunpack.c.l.bf16 %v4806_v33  ;;  %v2921_v38 = vunpack.c.h.bf16 %v4806_v33  ;;  %v4817_v39 = vld [vmem:[%s4667_s15 + $0x18] sm:$0xff]   ;;  %v4820_v40 = vld [vmem:[%s4667_s15 + $0x20] sm:$0xff]   ;;  %v4823_v41 = vld [vmem:[%s4667_s15 + $0x28] sm:$0xff]   ;;  %s4850_s22 = scalar_lea.vmem (!%p2891_p6), [#allocation2], %s2889_s21 }
  0xcc   : > { %v2924_v42 = vunpack.c.l.bf16 %v4809_v34  ;;  %v2925_v43 = vunpack.c.h.bf16 %v4809_v34  ;;  %v2928_v44 = vunpack.c.l.bf16 %v4817_v39  ;;  %v2929_v45 = vunpack.c.h.bf16 %v4817_v39  ;;  %v4830_v46 = vld [vmem:[%s4667_s15 + $0x30] sm:$0xff]   ;;  %v4833_v47 = vld [vmem:[%s4667_s15 + $0x38] sm:$0xff]   ;;  %590 = sbr.rel (%p2891_p6) target bundleno = 481 (0x1e1), region = 80  ;;  %s5791_s15 = sld [smem:[#allocation26_spill]] (!%p2891_p6) }
  0xcd   : > { %v2932_v48 = vunpack.c.l.bf16 %v4820_v40  ;;  %v2933_v49 = vunpack.c.h.bf16 %v4820_v40  ;;  %v2936_v50 = vunpack.c.l.bf16 %v4823_v41  ;;  %v2937_v51 = vunpack.c.h.bf16 %v4823_v41 }
  0xce   : > { %v2940_v52 = vunpack.c.l.bf16 %v4830_v46  ;;  %v2941_v53 = vunpack.c.h.bf16 %v4830_v46  ;;  %v2944_v54 = vunpack.c.l.bf16 %v4833_v47  ;;  %v2945_v55 = vunpack.c.h.bf16 %v4833_v47 }
  0xd1   : > { %3289 = vmatprep.mubr.f32.mxu0 %v2916_v35  ;;  %3301 = vmatprep.mubr.f32.mxu1 %v2932_v48  ;;  %v607_v56 = vld [vmem:[%s4850_s22 + $0x78] sm:$0xff]  ;;  %v606_v57 = vld [vmem:[%s4850_s22 + $0x70] sm:$0xff]  ;;  %v605_v58 = vld [vmem:[%s4850_s22 + $0x68] sm:$0xff] }
  0xd2   : > { %3257 = vmatprep.subr.mxu0 %v607_v56  ;;  %3649 = vmatprep.subr.mxu1 %v607_v56  ;;  %v604_v59 = vld [vmem:[%s4850_s22 + $0x60] sm:$0xff]  ;;  %v603_v60 = vld [vmem:[%s4850_s22 + $0x58] sm:$0xff]  ;;  %v602_v61 = vld [vmem:[%s4850_s22 + $0x50] sm:$0xff]  ;;  %p2892_p7 = scmp.ne.s32.totalorder %s5791_s15, 0 }
  0xd3   : > { %3258 = vmatpush3.msra.mxu0 %v607_v56  ;;  %3665 = vmatpush3.msra.mxu1 %v607_v56  ;;  %v601_v62 = vld [vmem:[%s4850_s22 + $0x48] sm:$0xff]  ;;  %v600_v63 = vld [vmem:[%s4850_s22 + $0x40] sm:$0xff]  ;;  %v599_v0 = vld [vmem:[%s4850_s22 + $0x38] sm:$0xff] }
  0xd4   : > { %3259 = vmatprep.subr.mxu0 %v606_v57  ;;  %3650 = vmatprep.subr.mxu1 %v606_v57  ;;  %v598_v1 = vld [vmem:[%s4850_s22 + $0x30] sm:$0xff]  ;;  %v597_v2 = vld [vmem:[%s4850_s22 + $0x28] sm:$0xff]  ;;  %v596_v3 = vld [vmem:[%s4850_s22 + $0x20] sm:$0xff] }
  0xd5   : > { %3260 = vmatpush3.msra.mxu0 %v606_v57  ;;  %3666 = vmatpush3.msra.mxu1 %v606_v57  ;;  %v595_v4 = vld [vmem:[%s4850_s22 + $0x18] sm:$0xff]  ;;  %v594_v5 = vld [vmem:[%s4850_s22 + $0x10] sm:$0xff]  ;;  %v593_v6 = vld [vmem:[%s4850_s22 + $0x8] sm:$0xff] }
  0xd6   : > { %3261 = vmatprep.subr.mxu0 %v605_v58  ;;  %3651 = vmatprep.subr.mxu1 %v605_v58  ;;  %v592_v7 = vld [vmem:[%s4850_s22] sm:$0xff] }
  0xd7   : > { %3262 = vmatpush3.msra.mxu0 %v605_v58  ;;  %3667 = vmatpush3.msra.mxu1 %v605_v58 }
  0xd8   : > { %3263 = vmatprep.subr.mxu0 %v604_v59  ;;  %3652 = vmatprep.subr.mxu1 %v604_v59 }
  0xd9   : > { %3264 = vmatpush3.msra.mxu0 %v604_v59  ;;  %3668 = vmatpush3.msra.mxu1 %v604_v59 }
  0xda   : > { %3265 = vmatprep.subr.mxu0 %v603_v60  ;;  %3653 = vmatprep.subr.mxu1 %v603_v60 }
  0xdb   : > { %3266 = vmatpush3.msra.mxu0 %v603_v60  ;;  %3669 = vmatpush3.msra.mxu1 %v603_v60 }
  0xdc   : > { %3267 = vmatprep.subr.mxu0 %v602_v61  ;;  %3654 = vmatprep.subr.mxu1 %v602_v61 }
  0xdd   : > { %3268 = vmatpush3.msra.mxu0 %v602_v61  ;;  %3670 = vmatpush3.msra.mxu1 %v602_v61 }
  0xde   : > { %3269 = vmatprep.subr.mxu0 %v601_v62  ;;  %3655 = vmatprep.subr.mxu1 %v601_v62 }
  0xdf   : > { %3270 = vmatpush3.msra.mxu0 %v601_v62  ;;  %3671 = vmatpush3.msra.mxu1 %v601_v62 }
  0xe0   : > { %3271 = vmatprep.subr.mxu0 %v600_v63  ;;  %3656 = vmatprep.subr.mxu1 %v600_v63 }
  0xe1   : > { %3272 = vmatpush3.msra.mxu0 %v600_v63  ;;  %3672 = vmatpush3.msra.mxu1 %v600_v63 }
  0xe2   : > { %3273 = vmatprep.subr.mxu0 %v599_v0  ;;  %3657 = vmatprep.subr.mxu1 %v599_v0 }
  0xe3   : > { %3274 = vmatpush3.msra.mxu0 %v599_v0  ;;  %3673 = vmatpush3.msra.mxu1 %v599_v0 }
  0xe4   : > { %3275 = vmatprep.subr.mxu0 %v598_v1  ;;  %3658 = vmatprep.subr.mxu1 %v598_v1 }
  0xe5   : > { %3276 = vmatpush3.msra.mxu0 %v598_v1  ;;  %3674 = vmatpush3.msra.mxu1 %v598_v1 }
  0xe6   : > { %3277 = vmatprep.subr.mxu0 %v597_v2  ;;  %3659 = vmatprep.subr.mxu1 %v597_v2 }
  0xe7   : > { %3278 = vmatpush3.msra.mxu0 %v597_v2  ;;  %3675 = vmatpush3.msra.mxu1 %v597_v2 }
  0xe8   : > { %3279 = vmatprep.subr.mxu0 %v596_v3  ;;  %3660 = vmatprep.subr.mxu1 %v596_v3 }
  0xe9   : > { %3280 = vmatpush3.msra.mxu0 %v596_v3  ;;  %3676 = vmatpush3.msra.mxu1 %v596_v3 }
  0xea   : > { %3281 = vmatprep.subr.mxu0 %v595_v4  ;;  %3661 = vmatprep.subr.mxu1 %v595_v4 }
  0xeb   : > { %3282 = vmatpush3.msra.mxu0 %v595_v4  ;;  %3677 = vmatpush3.msra.mxu1 %v595_v4 }
  0xec   : > { %3283 = vmatprep.subr.mxu0 %v594_v5  ;;  %3662 = vmatprep.subr.mxu1 %v594_v5 }
  0xed   : > { %3284 = vmatpush3.msra.mxu0 %v594_v5  ;;  %3678 = vmatpush3.msra.mxu1 %v594_v5 }
  0xee   : > { %3285 = vmatprep.subr.mxu0 %v593_v6  ;;  %3663 = vmatprep.subr.mxu1 %v593_v6 }
  0xef   : > { %3286 = vmatpush3.msra.mxu0 %v593_v6  ;;  %3679 = vmatpush3.msra.mxu1 %v593_v6 }
  0xf0   : > { %3287 = vmatprep.subr.mxu0 %v592_v7  ;;  %3664 = vmatprep.subr.mxu1 %v592_v7 }
  0xf1   : > { %3288 = vmatpush3.msra.mxu0 %v592_v7  ;;  %3680 = vmatpush3.msra.mxu1 %v592_v7 }
  0xf2   : > { %3290 = vmatmul.mubr.f32.vlgmr.msra.gmra.mxu0 %v2917_v36  ;;  %3302 = vmatmul.mubr.f32.vlgmr.msra.gmra.mxu1 %v2933_v49 }
  0xf3   : > { %3292 = vmatprep.mubr.f32.mxu0 %v2920_v37  ;;  %3304 = vmatprep.mubr.f32.mxu1 %v2936_v50 }
  0xf6   : > { %3293 = vmatmul.mubr.f32.gmra.mxu0 %v2921_v38  ;;  %3305 = vmatmul.mubr.f32.gmra.mxu1 %v2937_v51 }
  0xf7   : > { %3295 = vmatprep.mubr.f32.mxu0 %v2924_v42  ;;  %3307 = vmatprep.mubr.f32.mxu1 %v2940_v52 }
  0xfa   : > { %3296 = vmatmul.mubr.f32.gmra.mxu0 %v2925_v43  ;;  %3308 = vmatmul.mubr.f32.gmra.mxu1 %v2941_v53 }
  0xfb   : > { %3298 = vmatprep.mubr.f32.mxu0 %v2928_v44  ;;  %3310 = vmatprep.mubr.f32.mxu1 %v2944_v54 }
  0xfe   : > { %3299 = vmatmul.mubr.f32.gmra.mxu0 %v2929_v45  ;;  %3311 = vmatmul.mubr.f32.gmra.mxu1 %v2945_v55 }
 0x1b2   : > { %v3291_v8 = vpop.f32.mrf.mxu0  ;;  %v4896_v9 = vpop.f32.mrf.mxu1 }
 0x1b4   : > { %v674_v10 = vpop.f32.mrf.mxu0  ;;  %v714_v11 = vpop.f32.mrf.mxu1 }
 0x1b6   : > { %v3294_v12 = vpop.f32.mrf.mxu0  ;;  %v3306_v13 = vpop.f32.mrf.mxu1 }
 0x1b8   : > { %v684_v14 = vpop.f32.mrf.mxu0  ;;  %v724_v15 = vpop.f32.mrf.mxu1 }
 0x1ba   : > { %v3297_v16 = vpop.f32.mrf.mxu0  ;;  %v4898_v17 = vpop.f32.mrf.mxu1 }
 0x1bc   : > { %v694_v18 = vpop.f32.mrf.mxu0  ;;  %v734_v19 = vpop.f32.mrf.mxu1  ;;  %755 = sbr.rel (%p2892_p7) target bundleno = 457 (0x1c9), region = 84 }
 0x1be   : > { %v3300_v20 = vpop.f32.mrf.mxu0  ;;  %v4900_v21 = vpop.f32.mrf.mxu1 }
 0x1c0   : > { %v704_v22 = vpop.f32.mrf.mxu0  ;;  %v744_v23 = vpop.f32.mrf.mxu1 }
 0x1c1   : > { %756 = vst [vmem:[#allocation4 + $0x30] sm:$0xff] %v674_v10  ;;  %757 = vst [vmem:[#allocation4] sm:$0xff] %v3291_v8 }
 0x1c2   : > { %758 = vst [vmem:[#allocation4 + $0x58] sm:$0xff] %v684_v14  ;;  %759 = vst [vmem:[#allocation4 + $0x18] sm:$0xff] %v3294_v12 }
 0x1c3   : > { %760 = vst [vmem:[#allocation4 + $0x50] sm:$0xff] %v694_v18  ;;  %761 = vst [vmem:[#allocation4 + $0x68] sm:$0xff] %v3297_v16 }
 0x1c4   : > { %762 = vst [vmem:[#allocation4 + $0x8] sm:$0xff] %v704_v22  ;;  %763 = vst [vmem:[#allocation4 + $0x48] sm:$0xff] %v3300_v20 }
 0x1c5   : > { %764 = vst [vmem:[#allocation4 + $0x40] sm:$0xff] %v714_v11  ;;  %765 = vst [vmem:[#allocation4 + $0x20] sm:$0xff] %v4896_v9 }
 0x1c6   : > { %766 = vst [vmem:[#allocation4 + $0x10] sm:$0xff] %v724_v15  ;;  %767 = vst [vmem:[#allocation4 + $0x38] sm:$0xff] %v3306_v13 }
 0x1c7   : > { %768 = vst [vmem:[#allocation4 + $0x60] sm:$0xff] %v734_v19  ;;  %769 = vst [vmem:[#allocation4 + $0x70] sm:$0xff] %v4898_v17 }
 0x1c8   : > { %770 = vst [vmem:[#allocation4 + $0x78] sm:$0xff] %v744_v23  ;;  %771 = vst [vmem:[#allocation4 + $0x28] sm:$0xff] %v4900_v21 }
 0x1c9 PF: > { %s5792_s29 = sld [smem:[#allocation26_spill]] }
 0x1cf   : > { %p2893_p13 = scmp.le.s32.totalorder %s5792_s29, 0 }
 0x1d1   : > { %775 = sbr.rel (%p2893_p13) target bundleno = 481 (0x1e1), region = 88 }
 0x1d6   : > { %v776_v24 = vld [vmem:[#allocation4 + $0x30] sm:$0xff]  ;;  %v777_v25 = vld [vmem:[#allocation4] sm:$0xff]  ;;  %v778_v26 = vld [vmem:[#allocation4 + $0x58] sm:$0xff] }
 0x1d7   : > { %v792_v27 = vadd.f32 %v776_v24, %v674_v10  ;;  %v793_v28 = vadd.f32 %v3291_v8, %v777_v25  ;;  %v794_v29 = vadd.f32 %v778_v26, %v684_v14  ;;  %v779_v30 = vld [vmem:[#allocation4 + $0x18] sm:$0xff]  ;;  %v780_v31 = vld [vmem:[#allocation4 + $0x50] sm:$0xff]  ;;  %v781_v56 = vld [vmem:[#allocation4 + $0x68] sm:$0xff] }
 0x1d8   : > { %v795_v57 = vadd.f32 %v3294_v12, %v779_v30  ;;  %v796_v58 = vadd.f32 %v780_v31, %v694_v18  ;;  %v797_v59 = vadd.f32 %v3297_v16, %v781_v56  ;;  %v782_v60 = vld [vmem:[#allocation4 + $0x8] sm:$0xff]  ;;  %v784_v62 = vld [vmem:[#allocation4 + $0x40] sm:$0xff]  ;;  %v786_v3 = vld [vmem:[#allocation4 + $0x10] sm:$0xff] }
 0x1d9   : > { %v783_v61 = vld [vmem:[#allocation4 + $0x48] sm:$0xff]  ;;  %808 = vst [vmem:[#allocation4 + $0x30] sm:$0xff] %v792_v27  ;;  %809 = vst [vmem:[#allocation4] sm:$0xff] %v793_v28  ;;  %v798_v63 = vadd.f32 %v782_v60, %v704_v22  ;;  %v800_v1 = vadd.f32 %v784_v62, %v714_v11  ;;  %v785_v2 = vld [vmem:[#allocation4 + $0x20] sm:$0xff]  ;;  %v802_v6 = vadd.f32 %v786_v3, %v724_v15 }
 0x1da   : > { %810 = vst [vmem:[#allocation4 + $0x58] sm:$0xff] %v794_v29  ;;  %v799_v0 = vadd.f32 %v3300_v20, %v783_v61  ;;  %v787_v4 = vld [vmem:[#allocation4 + $0x38] sm:$0xff]  ;;  %811 = vst [vmem:[#allocation4 + $0x18] sm:$0xff] %v795_v57  ;;  %v801_v5 = vadd.f32 %v4896_v9, %v785_v2  ;;  %v788_v8 = vld [vmem:[#allocation4 + $0x60] sm:$0xff] }
 0x1db   : > { %812 = vst [vmem:[#allocation4 + $0x50] sm:$0xff] %v796_v58  ;;  %813 = vst [vmem:[#allocation4 + $0x68] sm:$0xff] %v797_v59  ;;  %v803_v7 = vadd.f32 %v3306_v13, %v787_v4  ;;  %v789_v10 = vld [vmem:[#allocation4 + $0x70] sm:$0xff]  ;;  %v790_v12 = vld [vmem:[#allocation4 + $0x78] sm:$0xff]  ;;  %v804_v14 = vadd.f32 %v788_v8, %v734_v19 }
 0x1dc   : > { %814 = vst [vmem:[#allocation4 + $0x8] sm:$0xff] %v798_v63  ;;  %815 = vst [vmem:[#allocation4 + $0x48] sm:$0xff] %v799_v0  ;;  %v805_v16 = vadd.f32 %v4898_v17, %v789_v10  ;;  %v806_v11 = vadd.f32 %v790_v12, %v744_v23  ;;  %v791_v18 = vld [vmem:[#allocation4 + $0x28] sm:$0xff] }
 0x1dd   : > { %816 = vst [vmem:[#allocation4 + $0x40] sm:$0xff] %v800_v1  ;;  %817 = vst [vmem:[#allocation4 + $0x20] sm:$0xff] %v801_v5  ;;  %v807_v20 = vadd.f32 %v4900_v21, %v791_v18 }
 0x1de   : > { %818 = vst [vmem:[#allocation4 + $0x10] sm:$0xff] %v802_v6  ;;  %819 = vst [vmem:[#allocation4 + $0x38] sm:$0xff] %v803_v7 }
 0x1df   : > { %820 = vst [vmem:[#allocation4 + $0x60] sm:$0xff] %v804_v14  ;;  %821 = vst [vmem:[#allocation4 + $0x70] sm:$0xff] %v805_v16 }
 0x1e0   : > { %822 = vst [vmem:[#allocation4 + $0x78] sm:$0xff] %v806_v11  ;;  %823 = vst [vmem:[#allocation4 + $0x28] sm:$0xff] %v807_v20 }
 0x1e1 PF: > { %p824_p12 = scmp.eq.s32.totalorder %s5867_s18, 1  ;;  %p2894_p3 = scmp.ne.s32.totalorder %s5867_s18, 1 }
 0x1e2   : > { %s5793_s12 = sld [smem:[#allocation26_spill]] (!%p2894_p3)  ;;  %s4918_s1 = scalar_lea.vmem (!%p2894_p3), [#allocation3], %s2889_s21 }
 0x1e3   : > { %827 = sbr.rel (%p2894_p3) target bundleno = 760 (0x2f8), region = 92 }
 0x1e8   : > { %3345 = vmatprep.mubr.f32.mxu0 %v2916_v35  ;;  %3357 = vmatprep.mubr.f32.mxu1 %v2932_v48  ;;  %v844_v9 = vld [vmem:[%s4918_s1 + $0x78] sm:$0xff]  ;;  %v843_v13 = vld [vmem:[%s4918_s1 + $0x70] sm:$0xff]  ;;  %v842_v15 = vld [vmem:[%s4918_s1 + $0x68] sm:$0xff]  ;;  %p2895_p9 = scmp.ne.s32.totalorder %s5793_s12, 0 }
 0x1e9   : > { %3313 = vmatprep.subr.mxu0 %v844_v9  ;;  %3681 = vmatprep.subr.mxu1 %v844_v9  ;;  %v841_v35 = vld [vmem:[%s4918_s1 + $0x60] sm:$0xff]  ;;  %v840_v48 = vld [vmem:[%s4918_s1 + $0x58] sm:$0xff]  ;;  %v839_v17 = vld [vmem:[%s4918_s1 + $0x50] sm:$0xff] }
 0x1ea   : > { %3314 = vmatpush3.msra.mxu0 %v844_v9  ;;  %3697 = vmatpush3.msra.mxu1 %v844_v9  ;;  %v838_v19 = vld [vmem:[%s4918_s1 + $0x48] sm:$0xff]  ;;  %v837_v21 = vld [vmem:[%s4918_s1 + $0x40] sm:$0xff]  ;;  %v836_v22 = vld [vmem:[%s4918_s1 + $0x38] sm:$0xff] }
 0x1eb   : > { %3315 = vmatprep.subr.mxu0 %v843_v13  ;;  %3682 = vmatprep.subr.mxu1 %v843_v13  ;;  %v835_v23 = vld [vmem:[%s4918_s1 + $0x30] sm:$0xff]  ;;  %v834_v24 = vld [vmem:[%s4918_s1 + $0x28] sm:$0xff]  ;;  %v833_v25 = vld [vmem:[%s4918_s1 + $0x20] sm:$0xff] }
 0x1ec   : > { %3316 = vmatpush3.msra.mxu0 %v843_v13  ;;  %3698 = vmatpush3.msra.mxu1 %v843_v13  ;;  %v832_v26 = vld [vmem:[%s4918_s1 + $0x18] sm:$0xff]  ;;  %v831_v27 = vld [vmem:[%s4918_s1 + $0x10] sm:$0xff]  ;;  %v830_v28 = vld [vmem:[%s4918_s1 + $0x8] sm:$0xff] }
 0x1ed   : > { %3317 = vmatprep.subr.mxu0 %v842_v15  ;;  %3683 = vmatprep.subr.mxu1 %v842_v15  ;;  %v829_v29 = vld [vmem:[%s4918_s1] sm:$0xff] }
 0x1ee   : > { %3318 = vmatpush3.msra.mxu0 %v842_v15  ;;  %3699 = vmatpush3.msra.mxu1 %v842_v15 }
 0x1ef   : > { %3319 = vmatprep.subr.mxu0 %v841_v35  ;;  %3684 = vmatprep.subr.mxu1 %v841_v35 }
 0x1f0   : > { %3320 = vmatpush3.msra.mxu0 %v841_v35  ;;  %3700 = vmatpush3.msra.mxu1 %v841_v35 }
 0x1f1   : > { %3321 = vmatprep.subr.mxu0 %v840_v48  ;;  %3685 = vmatprep.subr.mxu1 %v840_v48 }
 0x1f2   : > { %3322 = vmatpush3.msra.mxu0 %v840_v48  ;;  %3701 = vmatpush3.msra.mxu1 %v840_v48 }
 0x1f3   : > { %3323 = vmatprep.subr.mxu0 %v839_v17  ;;  %3686 = vmatprep.subr.mxu1 %v839_v17 }
 0x1f4   : > { %3324 = vmatpush3.msra.mxu0 %v839_v17  ;;  %3702 = vmatpush3.msra.mxu1 %v839_v17 }
 0x1f5   : > { %3325 = vmatprep.subr.mxu0 %v838_v19  ;;  %3687 = vmatprep.subr.mxu1 %v838_v19 }
 0x1f6   : > { %3326 = vmatpush3.msra.mxu0 %v838_v19  ;;  %3703 = vmatpush3.msra.mxu1 %v838_v19 }
 0x1f7   : > { %3327 = vmatprep.subr.mxu0 %v837_v21  ;;  %3688 = vmatprep.subr.mxu1 %v837_v21 }
 0x1f8   : > { %3328 = vmatpush3.msra.mxu0 %v837_v21  ;;  %3704 = vmatpush3.msra.mxu1 %v837_v21 }
 0x1f9   : > { %3329 = vmatprep.subr.mxu0 %v836_v22  ;;  %3689 = vmatprep.subr.mxu1 %v836_v22 }
 0x1fa   : > { %3330 = vmatpush3.msra.mxu0 %v836_v22  ;;  %3705 = vmatpush3.msra.mxu1 %v836_v22 }
 0x1fb   : > { %3331 = vmatprep.subr.mxu0 %v835_v23  ;;  %3690 = vmatprep.subr.mxu1 %v835_v23 }
 0x1fc   : > { %3332 = vmatpush3.msra.mxu0 %v835_v23  ;;  %3706 = vmatpush3.msra.mxu1 %v835_v23 }
 0x1fd   : > { %3333 = vmatprep.subr.mxu0 %v834_v24  ;;  %3691 = vmatprep.subr.mxu1 %v834_v24 }
 0x1fe   : > { %3334 = vmatpush3.msra.mxu0 %v834_v24  ;;  %3707 = vmatpush3.msra.mxu1 %v834_v24 }
 0x1ff   : > { %3335 = vmatprep.subr.mxu0 %v833_v25  ;;  %3692 = vmatprep.subr.mxu1 %v833_v25 }
 0x200   : > { %3336 = vmatpush3.msra.mxu0 %v833_v25  ;;  %3708 = vmatpush3.msra.mxu1 %v833_v25 }
 0x201   : > { %3337 = vmatprep.subr.mxu0 %v832_v26  ;;  %3693 = vmatprep.subr.mxu1 %v832_v26 }
 0x202   : > { %3338 = vmatpush3.msra.mxu0 %v832_v26  ;;  %3709 = vmatpush3.msra.mxu1 %v832_v26 }
 0x203   : > { %3339 = vmatprep.subr.mxu0 %v831_v27  ;;  %3694 = vmatprep.subr.mxu1 %v831_v27 }
 0x204   : > { %3340 = vmatpush3.msra.mxu0 %v831_v27  ;;  %3710 = vmatpush3.msra.mxu1 %v831_v27 }
 0x205   : > { %3341 = vmatprep.subr.mxu0 %v830_v28  ;;  %3695 = vmatprep.subr.mxu1 %v830_v28 }
 0x206   : > { %3342 = vmatpush3.msra.mxu0 %v830_v28  ;;  %3711 = vmatpush3.msra.mxu1 %v830_v28 }
 0x207   : > { %3343 = vmatprep.subr.mxu0 %v829_v29  ;;  %3696 = vmatprep.subr.mxu1 %v829_v29 }
 0x208   : > { %3344 = vmatpush3.msra.mxu0 %v829_v29  ;;  %3712 = vmatpush3.msra.mxu1 %v829_v29 }
 0x209   : > { %3346 = vmatmul.mubr.f32.vlgmr.msra.gmra.mxu0 %v2917_v36  ;;  %3358 = vmatmul.mubr.f32.vlgmr.msra.gmra.mxu1 %v2933_v49 }
 0x20a   : > { %3348 = vmatprep.mubr.f32.mxu0 %v2920_v37  ;;  %3360 = vmatprep.mubr.f32.mxu1 %v2936_v50 }
 0x20d   : > { %3349 = vmatmul.mubr.f32.gmra.mxu0 %v2921_v38  ;;  %3361 = vmatmul.mubr.f32.gmra.mxu1 %v2937_v51 }
 0x20e   : > { %3351 = vmatprep.mubr.f32.mxu0 %v2924_v42  ;;  %3363 = vmatprep.mubr.f32.mxu1 %v2940_v52 }
 0x211   : > { %3352 = vmatmul.mubr.f32.gmra.mxu0 %v2925_v43  ;;  %3364 = vmatmul.mubr.f32.gmra.mxu1 %v2941_v53 }
 0x212   : > { %3354 = vmatprep.mubr.f32.mxu0 %v2928_v44  ;;  %3366 = vmatprep.mubr.f32.mxu1 %v2944_v54 }
 0x215   : > { %3355 = vmatmul.mubr.f32.gmra.mxu0 %v2929_v45  ;;  %3367 = vmatmul.mubr.f32.gmra.mxu1 %v2945_v55 }
 0x2c9   : > { %v3347_v32 = vpop.f32.mrf.mxu0  ;;  %v4964_v33 = vpop.f32.mrf.mxu1 }
 0x2cb   : > { %v911_v34 = vpop.f32.mrf.mxu0  ;;  %v951_v36 = vpop.f32.mrf.mxu1 }
 0x2cd   : > { %v3350_v37 = vpop.f32.mrf.mxu0  ;;  %v3362_v38 = vpop.f32.mrf.mxu1 }
 0x2cf   : > { %v921_v40 = vpop.f32.mrf.mxu0  ;;  %v961_v41 = vpop.f32.mrf.mxu1 }
 0x2d1   : > { %v3353_v42 = vpop.f32.mrf.mxu0  ;;  %v4966_v43 = vpop.f32.mrf.mxu1 }
 0x2d3   : > { %v931_v44 = vpop.f32.mrf.mxu0  ;;  %v971_v46 = vpop.f32.mrf.mxu1  ;;  %992 = sbr.rel (%p2895_p9) target bundleno = 736 (0x2e0), region = 96 }
 0x2d5   : > { %v3356_v49 = vpop.f32.mrf.mxu0  ;;  %v4968_v39 = vpop.f32.mrf.mxu1 }
 0x2d7   : > { %v941_v45 = vpop.f32.mrf.mxu0  ;;  %v981_v47 = vpop.f32.mrf.mxu1 }
 0x2d8   : > { %993 = vst [vmem:[#allocation4 + $0x30] sm:$0xff] %v911_v34  ;;  %994 = vst [vmem:[#allocation4] sm:$0xff] %v3347_v32 }
 0x2d9   : > { %995 = vst [vmem:[#allocation4 + $0x58] sm:$0xff] %v921_v40  ;;  %996 = vst [vmem:[#allocation4 + $0x18] sm:$0xff] %v3350_v37 }
 0x2da   : > { %997 = vst [vmem:[#allocation4 + $0x50] sm:$0xff] %v931_v44  ;;  %998 = vst [vmem:[#allocation4 + $0x68] sm:$0xff] %v3353_v42 }
 0x2db   : > { %999 = vst [vmem:[#allocation4 + $0x8] sm:$0xff] %v941_v45  ;;  %1000 = vst [vmem:[#allocation4 + $0x48] sm:$0xff] %v3356_v49 }
 0x2dc   : > { %1001 = vst [vmem:[#allocation4 + $0x40] sm:$0xff] %v951_v36  ;;  %1002 = vst [vmem:[#allocation4 + $0x20] sm:$0xff] %v4964_v33 }
 0x2dd   : > { %1003 = vst [vmem:[#allocation4 + $0x10] sm:$0xff] %v961_v41  ;;  %1004 = vst [vmem:[#allocation4 + $0x38] sm:$0xff] %v3362_v38 }
 0x2de   : > { %1005 = vst [vmem:[#allocation4 + $0x60] sm:$0xff] %v971_v46  ;;  %1006 = vst [vmem:[#allocation4 + $0x70] sm:$0xff] %v4966_v43 }
 0x2df   : > { %1007 = vst [vmem:[#allocation4 + $0x78] sm:$0xff] %v981_v47  ;;  %1008 = vst [vmem:[#allocation4 + $0x28] sm:$0xff] %v4968_v39 }
 0x2e0 PF: > { %s5794_s21 = sld [smem:[#allocation26_spill]] }
 0x2e6   : > { %p2896_p5 = scmp.le.s32.totalorder %s5794_s21, 0 }
 0x2e8   : > { %1012 = sbr.rel (%p2896_p5) target bundleno = 760 (0x2f8), region = 100 }
 0x2ed   : > { %v1013_v50 = vld [vmem:[#allocation4 + $0x30] sm:$0xff]  ;;  %v1014_v51 = vld [vmem:[#allocation4] sm:$0xff]  ;;  %v1015_v52 = vld [vmem:[#allocation4 + $0x58] sm:$0xff] }
 0x2ee   : > { %v1029_v53 = vadd.f32 %v1013_v50, %v911_v34  ;;  %v1030_v54 = vadd.f32 %v3347_v32, %v1014_v51  ;;  %v1031_v55 = vadd.f32 %v1015_v52, %v921_v40  ;;  %v1016_v30 = vld [vmem:[#allocation4 + $0x18] sm:$0xff]  ;;  %v1017_v31 = vld [vmem:[#allocation4 + $0x50] sm:$0xff]  ;;  %v1018_v56 = vld [vmem:[#allocation4 + $0x68] sm:$0xff] }
 0x2ef   : > { %v1032_v57 = vadd.f32 %v3350_v37, %v1016_v30  ;;  %v1033_v58 = vadd.f32 %v1017_v31, %v931_v44  ;;  %v1034_v59 = vadd.f32 %v3353_v42, %v1018_v56  ;;  %v1019_v60 = vld [vmem:[#allocation4 + $0x8] sm:$0xff]  ;;  %v1021_v62 = vld [vmem:[#allocation4 + $0x40] sm:$0xff]  ;;  %v1023_v3 = vld [vmem:[#allocation4 + $0x10] sm:$0xff] }
 0x2f0   : > { %v1020_v61 = vld [vmem:[#allocation4 + $0x48] sm:$0xff]  ;;  %1045 = vst [vmem:[#allocation4 + $0x30] sm:$0xff] %v1029_v53  ;;  %1046 = vst [vmem:[#allocation4] sm:$0xff] %v1030_v54  ;;  %v1035_v63 = vadd.f32 %v1019_v60, %v941_v45  ;;  %v1037_v1 = vadd.f32 %v1021_v62, %v951_v36  ;;  %v1022_v2 = vld [vmem:[#allocation4 + $0x20] sm:$0xff]  ;;  %v1039_v6 = vadd.f32 %v1023_v3, %v961_v41 }
 0x2f1   : > { %1047 = vst [vmem:[#allocation4 + $0x58] sm:$0xff] %v1031_v55  ;;  %v1036_v0 = vadd.f32 %v3356_v49, %v1020_v61  ;;  %v1024_v4 = vld [vmem:[#allocation4 + $0x38] sm:$0xff]  ;;  %1048 = vst [vmem:[#allocation4 + $0x18] sm:$0xff] %v1032_v57  ;;  %v1038_v5 = vadd.f32 %v4964_v33, %v1022_v2  ;;  %v1025_v8 = vld [vmem:[#allocation4 + $0x60] sm:$0xff] }
 0x2f2   : > { %1049 = vst [vmem:[#allocation4 + $0x50] sm:$0xff] %v1033_v58  ;;  %1050 = vst [vmem:[#allocation4 + $0x68] sm:$0xff] %v1034_v59  ;;  %v1040_v7 = vadd.f32 %v3362_v38, %v1024_v4  ;;  %v1026_v10 = vld [vmem:[#allocation4 + $0x70] sm:$0xff]  ;;  %v1027_v12 = vld [vmem:[#allocation4 + $0x78] sm:$0xff]  ;;  %v1041_v14 = vadd.f32 %v1025_v8, %v971_v46 }
 0x2f3   : > { %1051 = vst [vmem:[#allocation4 + $0x8] sm:$0xff] %v1035_v63  ;;  %1052 = vst [vmem:[#allocation4 + $0x48] sm:$0xff] %v1036_v0  ;;  %v1042_v16 = vadd.f32 %v4966_v43, %v1026_v10  ;;  %v1043_v11 = vadd.f32 %v1027_v12, %v981_v47  ;;  %v1028_v18 = vld [vmem:[#allocation4 + $0x28] sm:$0xff] }
 0x2f4   : > { %1053 = vst [vmem:[#allocation4 + $0x40] sm:$0xff] %v1037_v1  ;;  %1054 = vst [vmem:[#allocation4 + $0x20] sm:$0xff] %v1038_v5  ;;  %v1044_v20 = vadd.f32 %v4968_v39, %v1028_v18 }
 0x2f5   : > { %1055 = vst [vmem:[#allocation4 + $0x10] sm:$0xff] %v1039_v6  ;;  %1056 = vst [vmem:[#allocation4 + $0x38] sm:$0xff] %v1040_v7 }
 0x2f6   : > { %1057 = vst [vmem:[#allocation4 + $0x60] sm:$0xff] %v1041_v14  ;;  %1058 = vst [vmem:[#allocation4 + $0x70] sm:$0xff] %v1042_v16 }
 0x2f7   : > { %1059 = vst [vmem:[#allocation4 + $0x78] sm:$0xff] %v1043_v11  ;;  %1060 = vst [vmem:[#allocation4 + $0x28] sm:$0xff] %v1044_v20 }
 0x2f8 PF: > { %s5795_s20 = sld [smem:[#allocation26_spill]] }
 0x2fe   : > { %p2897_p0 = scmp.ne.s32.totalorder %s5795_s20, 1 }
 0x300   : > { %1063 = sbr.rel (%p2897_p0) target bundleno = 1864 (0x748), region = 104 }
 0x305   : > { %v4979_v9 = vld [vmem:[#allocation4 + $0x30] sm:$0xff]  ;;  %s5796_s23 = sld [smem:[#allocation28_spill]]  ;;  %v4981_v13 = vld [vmem:[#allocation4] sm:$0xff]  ;;  %v4983_v15 = vld [vmem:[#allocation4 + $0x58] sm:$0xff] }
 0x306   : > { %v4986_v35 = vld [vmem:[#allocation4 + $0x18] sm:$0xff]  ;;  %v4988_v48 = vld [vmem:[#allocation4 + $0x50] sm:$0xff]  ;;  %v4990_v17 = vld [vmem:[#allocation4 + $0x68] sm:$0xff] }
 0x307   : > { %5797 = vst [vmem:[#allocation39_spill] sm:$0xff] %v4990_v17  ;;  %v4992_v19 = vld [vmem:[#allocation4 + $0x8] sm:$0xff]  ;;  %v4996_v22 = vld [vmem:[#allocation4 + $0x40] sm:$0xff]  ;;  %v5004_v24 = vld [vmem:[#allocation4 + $0x10] sm:$0xff] }
 0x308   : > { %5798 = vst [vmem:[#allocation40_spill] sm:$0xff] %v4992_v19  ;;  %v4994_v21 = vld [vmem:[#allocation4 + $0x48] sm:$0xff]  ;;  %v5002_v23 = vld [vmem:[#allocation4 + $0x20] sm:$0xff]  ;;  %v5006_v25 = vld [vmem:[#allocation4 + $0x38] sm:$0xff] }
 0x309   : > { %5799 = vst [vmem:[#allocation41_spill] sm:$0xff] %v4994_v21  ;;  %v5008_v26 = vld [vmem:[#allocation4 + $0x60] sm:$0xff]  ;;  %v5010_v27 = vld [vmem:[#allocation4 + $0x70] sm:$0xff]  ;;  %v5012_v28 = vld [vmem:[#allocation4 + $0x78] sm:$0xff] }
 0x30a   : > { %5800 = vst [vmem:[#allocation42_spill] sm:$0xff] %v5010_v27  ;;  %5801 = vst [vmem:[#allocation43_spill] sm:$0xff] %v5012_v28  ;;  %v5014_v29 = vld [vmem:[#allocation4 + $0x28] sm:$0xff] }
 0x30b   : > { %p1080_p2 = scmp.lt.s32.totalorder %s5796_s23, 3  ;;  %5802 = vst [vmem:[#allocation44_spill] sm:$0xff] %v5014_v29 }
 0x30d   : > { %p1081_p8 = pnand %p1080_p2, %p587_p4 }
 0x30e   : > { %s1085_s25 = scalar_lea.vmem (!%p1081_p8), [#allocation3], %s4691_s2 }
 0x30f   : > { %1084 = sbr.rel (%p1081_p8) target bundleno = 796 (0x31c), region = 108 }
 0x314   : > { %1086 = vst [vmem:[%s1085_s25] sm:$0xff] %v4979_v9  ;;  %1087 = vst [vmem:[%s1085_s25 + $0x8] sm:$0xff] %v4981_v13 }
 0x315   : > { %1088 = vst [vmem:[%s1085_s25 + $0x10] sm:$0xff] %v4983_v15  ;;  %1089 = vst [vmem:[%s1085_s25 + $0x18] sm:$0xff] %v4986_v35 }
 0x316   : > { %1090 = vst [vmem:[%s1085_s25 + $0x20] sm:$0xff] %v4988_v48  ;;  %1091 = vst [vmem:[%s1085_s25 + $0x28] sm:$0xff] %v4990_v17 }
 0x317   : > { %1092 = vst [vmem:[%s1085_s25 + $0x30] sm:$0xff] %v4992_v19  ;;  %1093 = vst [vmem:[%s1085_s25 + $0x38] sm:$0xff] %v4994_v21 }
 0x318   : > { %1094 = vst [vmem:[%s1085_s25 + $0x40] sm:$0xff] %v4996_v22  ;;  %1095 = vst [vmem:[%s1085_s25 + $0x48] sm:$0xff] %v5002_v23 }
 0x319   : > { %1096 = vst [vmem:[%s1085_s25 + $0x50] sm:$0xff] %v5004_v24  ;;  %1097 = vst [vmem:[%s1085_s25 + $0x58] sm:$0xff] %v5006_v25 }
 0x31a   : > { %1098 = vst [vmem:[%s1085_s25 + $0x60] sm:$0xff] %v5008_v26  ;;  %1099 = vst [vmem:[%s1085_s25 + $0x68] sm:$0xff] %v5010_v27 }
 0x31b   : > { %1100 = vst [vmem:[%s1085_s25 + $0x70] sm:$0xff] %v5012_v28  ;;  %1101 = vst [vmem:[%s1085_s25 + $0x78] sm:$0xff] %v5014_v29 }
 0x31c PF: > { %p1102_p1 = pnand %p1080_p2, %p824_p12 }
 0x31d   : > { %s1106_s8 = scalar_lea.vmem (!%p1102_p1), [#allocation2], %s4691_s2 }
 0x31e   : > { %1105 = sbr.rel (%p1102_p1) target bundleno = 811 (0x32b), region = 112 }
 0x323   : > { %1107 = vst [vmem:[%s1106_s8] sm:$0xff] %v4979_v9  ;;  %1108 = vst [vmem:[%s1106_s8 + $0x8] sm:$0xff] %v4981_v13 }
 0x324   : > { %1109 = vst [vmem:[%s1106_s8 + $0x10] sm:$0xff] %v4983_v15  ;;  %1110 = vst [vmem:[%s1106_s8 + $0x18] sm:$0xff] %v4986_v35 }
 0x325   : > { %1111 = vst [vmem:[%s1106_s8 + $0x20] sm:$0xff] %v4988_v48  ;;  %1112 = vst [vmem:[%s1106_s8 + $0x28] sm:$0xff] %v4990_v17 }
 0x326   : > { %1113 = vst [vmem:[%s1106_s8 + $0x30] sm:$0xff] %v4992_v19  ;;  %1114 = vst [vmem:[%s1106_s8 + $0x38] sm:$0xff] %v4994_v21 }
 0x327   : > { %1115 = vst [vmem:[%s1106_s8 + $0x40] sm:$0xff] %v4996_v22  ;;  %1116 = vst [vmem:[%s1106_s8 + $0x48] sm:$0xff] %v5002_v23 }
 0x328   : > { %1117 = vst [vmem:[%s1106_s8 + $0x50] sm:$0xff] %v5004_v24  ;;  %1118 = vst [vmem:[%s1106_s8 + $0x58] sm:$0xff] %v5006_v25 }
 0x329   : > { %1119 = vst [vmem:[%s1106_s8 + $0x60] sm:$0xff] %v5008_v26  ;;  %1120 = vst [vmem:[%s1106_s8 + $0x68] sm:$0xff] %v5010_v27 }
 0x32a   : > { %1121 = vst [vmem:[%s1106_s8 + $0x70] sm:$0xff] %v5012_v28  ;;  %1122 = vst [vmem:[%s1106_s8 + $0x78] sm:$0xff] %v5014_v29 }
 0x32b PF: > { %s5804_s18 = sld [smem:[#allocation28_spill]] }
 0x331   : > { %p2898_p10 = scmp.ne.s32.totalorder %s5804_s18, 0 }
 0x332   : > { %s5805_s30 = sld [smem:[#allocation46_spill]] (!%p2898_p10)  ;;  %s5276_s20 = scalar_lea.vmem (!%p2898_p10), [#allocation5], %s4691_s2 }
 0x333   : > { %1125 = sbr.rel (%p2898_p10) target bundleno = 1295 (0x50f), region = 116  ;;  %s5806_s22 = sld [smem:[#allocation45_spill]] (!%p2898_p10) }
 0x334   : > { %s5807_s21 = sld [smem:[#allocation51_spill]] (!%p2898_p10) }
 0x338   : > { %v1191_v32 = vld [vmem:[#allocation11 + $0x78] sm:$0xff]  ;;  %v1190_v33 = vld [vmem:[#allocation11 + $0x70] sm:$0xff]  ;;  %s5059_s27 = scalar_lea.vmem %s5805_s30, %s4691_s2  ;;  %v4348_v34 = vmov 0   ;;  %v1189_v36 = vld [vmem:[#allocation11 + $0x68] sm:$0xff] }
 0x339   : > { %3369 = vmatprep.subr.mxu0 %v1191_v32  ;;  %4001 = vset.pattern.permute.xlu0 %v4348_v34  ;;  %v1144_v37 = vld [vmem:[%s5059_s27] sm:$0xff]  ;;  %v1145_v40 = vld [vmem:[%s5059_s27 + $0x8] sm:$0xff]  ;;  %v1146_v41 = vld [vmem:[%s5059_s27 + $0x10] sm:$0xff]  ;;  %s5101_s29 = scalar_lea.vmem %s5806_s22, %s4691_s2 }
 0x33a   : > { %3370 = vmatpush3.msra.mxu0 %v1191_v32  ;;  %4002 = vset.pattern.permute.xlu1 %v4348_v34  ;;  %v1188_v38 = vld [vmem:[#allocation11 + $0x60] sm:$0xff]  ;;  %v1187_v42 = vld [vmem:[#allocation11 + $0x58] sm:$0xff]  ;;  %v1186_v46 = vld [vmem:[#allocation11 + $0x50] sm:$0xff] }
 0x33b   : > { %3371 = vmatprep.subr.mxu0 %v1190_v33  ;;  %1339 = vperm.xlu0 %4001, %v1144_v37   ;;  %v1147_v43 = vld [vmem:[%s5059_s27 + $0x18] sm:$0xff]  ;;  %v1160_v44 = vld [vmem:[%s4675_s26] sm:$0xff]  ;;  %v1185_v39 = vld [vmem:[#allocation11 + $0x48] sm:$0xff] }
 0x33c   : > { %3372 = vmatpush3.msra.mxu0 %v1190_v33  ;;  %1349 = vperm.xlu1 %4002, %v1146_v41   ;;  %v1148_v49 = vld [vmem:[%s5059_s27 + $0x20] sm:$0xff]  ;;  %v1149_v45 = vld [vmem:[%s5059_s27 + $0x28] sm:$0xff]  ;;  %v1150_v50 = vld [vmem:[%s5059_s27 + $0x30] sm:$0xff] }
 0x33d   : > { %3373 = vmatprep.subr.mxu0 %v1189_v36  ;;  %3401 = vmatprep.mubr.f32.mxu0 %v1160_v44  ;;  %v1184_v47 = vld [vmem:[#allocation11 + $0x40] sm:$0xff]  ;;  %v1183_v51 = vld [vmem:[#allocation11 + $0x38] sm:$0xff]  ;;  %v1182_v53 = vld [vmem:[#allocation11 + $0x30] sm:$0xff] }
 0x33e   : > { %3374 = vmatpush3.msra.mxu0 %v1189_v36  ;;  %v1151_v52 = vld [vmem:[%s5059_s27 + $0x38] sm:$0xff]  ;;  %v1152_v54 = vld [vmem:[%s5059_s27 + $0x40] sm:$0xff]  ;;  %v1181_v31 = vld [vmem:[#allocation11 + $0x28] sm:$0xff] }
 0x33f   : > { %3375 = vmatprep.subr.mxu0 %v1188_v38  ;;  %1344 = vperm.xlu0 %4001, %v1145_v40   ;;  %v1464_v55 = vld [vmem:[#allocation12 + $0xf8] sm:$0xff]  ;;  %v1153_v56 = vld [vmem:[%s5059_s27 + $0x48] sm:$0xff]  ;;  %v1463_v57 = vld [vmem:[#allocation12 + $0xf0] sm:$0xff] }
 0x340   : > { %3376 = vmatpush3.msra.mxu0 %v1188_v38  ;;  %1354 = vperm.xlu1 %4002, %v1147_v43   ;;  %v1448_v30 = vld [vmem:[#allocation12 + $0x78] sm:$0xff]  ;;  %v1180_v58 = vld [vmem:[#allocation11 + $0x20] sm:$0xff]  ;;  %v1154_v59 = vld [vmem:[%s5059_s27 + $0x50] sm:$0xff] }
 0x341   : > { %3377 = vmatprep.subr.mxu0 %v1187_v42  ;;  %3049 = vmatprep.subr.mxu1 %v1464_v55  ;;  %v1447_v60 = vld [vmem:[#allocation12 + $0x70] sm:$0xff]  ;;  %v1179_v61 = vld [vmem:[#allocation11 + $0x18] sm:$0xff]  ;;  %v1462_v63 = vld [vmem:[#allocation12 + $0xe8] sm:$0xff] }
 0x342   : > { %3378 = vmatpush3.msra.mxu0 %v1187_v42  ;;  %3050 = vmatpush3.msra.mxu1 %v1448_v30  ;;  %v1155_v62 = vld [vmem:[%s5059_s27 + $0x58] sm:$0xff]  ;;  %v1178_v0 = vld [vmem:[#allocation11 + $0x10] sm:$0xff]  ;;  %v1156_v1 = vld [vmem:[%s5059_s27 + $0x60] sm:$0xff] }
 0x343   : > { %3379 = vmatprep.subr.mxu0 %v1186_v46  ;;  %1359 = vperm.xlu0 %4001, %v1148_v49   ;;  %v1446_v2 = vld [vmem:[#allocation12 + $0x68] sm:$0xff]  ;;  %v1461_v5 = vld [vmem:[#allocation12 + $0xe0] sm:$0xff]  ;;  %v1158_v7 = vld [vmem:[%s5059_s27 + $0x70] sm:$0xff] }
 0x344   : > { %3380 = vmatpush3.msra.mxu0 %v1186_v46  ;;  %1364 = vperm.xlu1 %4002, %v1149_v45   ;;  %v1177_v3 = vld [vmem:[#allocation11 + $0x8] sm:$0xff]  ;;  %v1176_v6 = vld [vmem:[#allocation11] sm:$0xff]  ;;  %v1159_v12 = vld [vmem:[%s5059_s27 + $0x78] sm:$0xff] }
 0x345   : > { %3381 = vmatprep.subr.mxu0 %v1185_v39  ;;  %3051 = vmatprep.subr.mxu1 %v1463_v57  ;;  %v1157_v4 = vld [vmem:[%s5059_s27 + $0x68] sm:$0xff]  ;;  %v1445_v8 = vld [vmem:[#allocation12 + $0x60] sm:$0xff]  ;;  %v1162_v14 = vld [vmem:[%s4675_s26 + $0x10] sm:$0xff] }
 0x346   : > { %3382 = vmatpush3.msra.mxu0 %v1185_v39  ;;  %3052 = vmatpush3.msra.mxu1 %v1447_v60  ;;  %v1161_v10 = vld [vmem:[%s4675_s26 + $0x8] sm:$0xff]  ;;  %v1460_v16 = vld [vmem:[#allocation12 + $0xd8] sm:$0xff]  ;;  %v1459_v18 = vld [vmem:[#allocation12 + $0xd0] sm:$0xff] }
 0x347   : > { %3383 = vmatprep.subr.mxu0 %v1184_v47  ;;  %1369 = vperm.xlu0 %4001, %v1150_v50   ;;  %v1444_v11 = vld [vmem:[#allocation12 + $0x58] sm:$0xff]  ;;  %v1443_v32 = vld [vmem:[#allocation12 + $0x50] sm:$0xff]  ;;  %v1164_v33 = vld [vmem:[%s4675_s26 + $0x20] sm:$0xff] }
 0x348   : > { %3384 = vmatpush3.msra.mxu0 %v1184_v47  ;;  %1374 = vperm.xlu1 %4002, %v1151_v52   ;;  %v1163_v20 = vld [vmem:[%s4675_s26 + $0x18] sm:$0xff]  ;;  %v1458_v34 = vld [vmem:[#allocation12 + $0xc8] sm:$0xff]  ;;  %v1457_v37 = vld [vmem:[#allocation12 + $0xc0] sm:$0xff] }
 0x349   : > { %3385 = vmatprep.subr.mxu0 %v1183_v51  ;;  %3053 = vmatprep.subr.mxu1 %v1462_v63  ;;  %v1442_v36 = vld [vmem:[#allocation12 + $0x48] sm:$0xff]  ;;  %v1441_v40 = vld [vmem:[#allocation12 + $0x40] sm:$0xff]  ;;  %v1166_v41 = vld [vmem:[%s4675_s26 + $0x30] sm:$0xff] }
 0x34a   : > { %3386 = vmatpush3.msra.mxu0 %v1183_v51  ;;  %3054 = vmatpush3.msra.mxu1 %v1446_v2  ;;  %v1165_v38 = vld [vmem:[%s4675_s26 + $0x28] sm:$0xff]  ;;  %v1456_v42 = vld [vmem:[#allocation12 + $0xb8] sm:$0xff]  ;;  %v1455_v44 = vld [vmem:[#allocation12 + $0xb0] sm:$0xff] }
 0x34b   : > { %3387 = vmatprep.subr.mxu0 %v1182_v53  ;;  %1379 = vperm.xlu0 %4001, %v1152_v54   ;;  %v1440_v43 = vld [vmem:[#allocation12 + $0x38] sm:$0xff]  ;;  %v1439_v49 = vld [vmem:[#allocation12 + $0x30] sm:$0xff]  ;;  %v1168_v39 = vld [vmem:[%s4675_s26 + $0x40] sm:$0xff] }
 0x34c   : > { %3388 = vmatpush3.msra.mxu0 %v1182_v53  ;;  %1384 = vperm.xlu1 %4002, %v1153_v56   ;;  %v1167_v46 = vld [vmem:[%s4675_s26 + $0x38] sm:$0xff]  ;;  %v1454_v45 = vld [vmem:[#allocation12 + $0xa8] sm:$0xff]  ;;  %v1453_v50 = vld [vmem:[#allocation12 + $0xa0] sm:$0xff] }
 0x34d   : > { %3389 = vmatprep.subr.mxu0 %v1181_v31  ;;  %3055 = vmatprep.subr.mxu1 %v1461_v5  ;;  %v1438_v47 = vld [vmem:[#allocation12 + $0x28] sm:$0xff]  ;;  %v1437_v52 = vld [vmem:[#allocation12 + $0x20] sm:$0xff]  ;;  %v1170_v53 = vld [vmem:[%s4675_s26 + $0x50] sm:$0xff] }
 0x34e   : > { %3390 = vmatpush3.msra.mxu0 %v1181_v31  ;;  %3056 = vmatpush3.msra.mxu1 %v1445_v8  ;;  %v1169_v51 = vld [vmem:[%s4675_s26 + $0x48] sm:$0xff]  ;;  %v1452_v54 = vld [vmem:[#allocation12 + $0x98] sm:$0xff]  ;;  %v1451_v30 = vld [vmem:[#allocation12 + $0x90] sm:$0xff] }
 0x34f   : > { %3391 = vmatprep.subr.mxu0 %v1180_v58  ;;  %1389 = vperm.xlu0 %4001, %v1154_v59   ;;  %v1436_v55 = vld [vmem:[#allocation12 + $0x18] sm:$0xff]  ;;  %v1435_v56 = vld [vmem:[#allocation12 + $0x10] sm:$0xff]  ;;  %v1172_v57 = vld [vmem:[%s4675_s26 + $0x60] sm:$0xff] }
 0x350   : > { %3392 = vmatpush3.msra.mxu0 %v1180_v58  ;;  %1394 = vperm.xlu1 %4002, %v1155_v62   ;;  %v1171_v31 = vld [vmem:[%s4675_s26 + $0x58] sm:$0xff]  ;;  %v1450_v58 = vld [vmem:[#allocation12 + $0x88] sm:$0xff]  ;;  %v1449_v60 = vld [vmem:[#allocation12 + $0x80] sm:$0xff] }
 0x351   : > { %3393 = vmatprep.subr.mxu0 %v1179_v61  ;;  %3057 = vmatprep.subr.mxu1 %v1460_v16  ;;  %v1434_v59 = vld [vmem:[#allocation12 + $0x8] sm:$0xff]  ;;  %v1433_v62 = vld [vmem:[#allocation12] sm:$0xff]  ;;  %v1174_v63 = vld [vmem:[%s4675_s26 + $0x70] sm:$0xff] }
 0x352   : > { %3394 = vmatpush3.msra.mxu0 %v1179_v61  ;;  %3058 = vmatpush3.msra.mxu1 %v1444_v11  ;;  %v1173_v61 = vld [vmem:[%s4675_s26 + $0x68] sm:$0xff]  ;;  %v1479_v2 = vld [vmem:[#allocation12 + $0x170] sm:$0xff]  ;;  %v1477_v5 = vld [vmem:[#allocation12 + $0x160] sm:$0xff] }
 0x353   : > { %3395 = vmatprep.subr.mxu0 %v1178_v0  ;;  %1399 = vperm.xlu0 %4001, %v1156_v1   ;;  %v5092_v1 = vld [vmem:[#allocation14 + $0x78] sm:$0xff]  ;;  %v1474_v8 = vld [vmem:[#allocation12 + $0x148] sm:$0xff]  ;;  %v1469_v11 = vld [vmem:[#allocation12 + $0x120] sm:$0xff] }
 0x354   : > { %3396 = vmatpush3.msra.mxu0 %v1178_v0  ;;  %1404 = vperm.xlu1 %4002, %v1157_v4   ;;  %v1480_v0 = vld [vmem:[#allocation12 + $0x178] sm:$0xff]  ;;  %v1478_v4 = vld [vmem:[#allocation12 + $0x168] sm:$0xff] }
 0x355   : > { %3397 = vmatprep.subr.mxu0 %v1177_v3  ;;  %3059 = vmatprep.subr.mxu1 %v1459_v18  ;;  %v1470_v16 = vld [vmem:[#allocation12 + $0x128] sm:$0xff]  ;;  %v1468_v18 = vld [vmem:[#allocation12 + $0x118] sm:$0xff] }
 0x356   : > { %3398 = vmatpush3.msra.mxu0 %v1177_v3  ;;  %3060 = vmatpush3.msra.mxu1 %v1443_v32  ;;  %v1175_v3 = vld [vmem:[%s4675_s26 + $0x78] sm:$0xff]  ;;  %v1466_v32 = vld [vmem:[#allocation12 + $0x108] sm:$0xff] }
 0x357   : > { %3399 = vmatprep.subr.mxu0 %v1176_v6  ;;  %1409 = vperm.xlu0 %4001, %v1158_v7   ;;  %v1475_v7 = vld [vmem:[#allocation12 + $0x150] sm:$0xff] }
 0x358   : > { %3400 = vmatpush3.msra.mxu0 %v1176_v6  ;;  %1414 = vperm.xlu1 %4002, %v1159_v12   ;;  %v1476_v6 = vld [vmem:[#allocation12 + $0x158] sm:$0xff] }
 0x359   : > { %3402 = vmatmul.mubr.f32.vlgmr.msra.gmra.mxu0 %v1161_v10  ;;  %3061 = vmatprep.subr.mxu1 %v1458_v34  ;;  %v1473_v10 = vld [vmem:[#allocation12 + $0x140] sm:$0xff]  ;;  %v1472_v12 = vld [vmem:[#allocation12 + $0x138] sm:$0xff] }
 0x35a   : > { %3404 = vmatprep.mubr.f32.mxu0 %v1162_v14  ;;  %3062 = vmatpush3.msra.mxu1 %v1442_v36  ;;  %v1471_v14 = vld [vmem:[#allocation12 + $0x130] sm:$0xff]  ;;  %v1127_v34 = vld [vmem:[%s5101_s29] sm:$0xff] }
 0x35b   : > { %3063 = vmatprep.subr.mxu1 %v1457_v37  ;;  %3425 = vmatprep.subr.mxu0 %v1480_v0 }
 0x35c   : > { %3064 = vmatpush3.msra.mxu1 %v1441_v40  ;;  %3426 = vmatpush3.msra.mxu0 %v1480_v0  ;;  %v5145_v0 = vld [vmem:[#allocation14 + $0x28] sm:$0xff] }
 0x35d   : > { %3405 = vmatmul.mubr.f32.gmra.mxu0 %v1163_v20  ;;  %3065 = vmatprep.subr.mxu1 %v1456_v42  ;;  %v1467_v20 = vld [vmem:[#allocation12 + $0x110] sm:$0xff] }
 0x35e   : > { %3407 = vmatprep.mubr.f32.mxu0 %v1164_v33  ;;  %3066 = vmatpush3.msra.mxu1 %v1440_v43  ;;  %v1465_v33 = vld [vmem:[#allocation12 + $0x100] sm:$0xff]  ;;  %v5106_v42 = vld [vmem:[#allocation14 + $0x70] sm:$0xff] }
 0x35f   : > { %3067 = vmatprep.subr.mxu1 %v1455_v44  ;;  %3427 = vmatprep.subr.mxu0 %v1479_v2 }
 0x360   : > { %3068 = vmatpush3.msra.mxu1 %v1439_v49  ;;  %3428 = vmatpush3.msra.mxu0 %v1479_v2  ;;  %v5109_v49 = vld [vmem:[#allocation14 + $0x68] sm:$0xff] }
 0x361   : > { %3408 = vmatmul.mubr.f32.gmra.mxu0 %v1165_v38  ;;  %3069 = vmatprep.subr.mxu1 %v1454_v45  ;;  %v1128_v38 = vld [vmem:[%s5101_s29 + $0x8] sm:$0xff]  ;;  %v1130_v45 = vld [vmem:[%s5101_s29 + $0x18] sm:$0xff] }
 0x362   : > { %3410 = vmatprep.mubr.f32.mxu0 %v1166_v41  ;;  %3070 = vmatpush3.msra.mxu1 %v1438_v47  ;;  %v1129_v41 = vld [vmem:[%s5101_s29 + $0x10] sm:$0xff]  ;;  %v5114_v47 = vld [vmem:[#allocation14 + $0x60] sm:$0xff] }
 0x363   : > { %3071 = vmatprep.subr.mxu1 %v1453_v50  ;;  %3429 = vmatprep.subr.mxu0 %v1478_v4 }
 0x364   : > { %3072 = vmatpush3.msra.mxu1 %v1437_v52  ;;  %3430 = vmatpush3.msra.mxu0 %v1478_v4  ;;  %v5150_v4 = vld [vmem:[#allocation14 + $0x20] sm:$0xff] }
 0x365   : > { %3411 = vmatmul.mubr.f32.gmra.mxu0 %v1167_v46  ;;  %3073 = vmatprep.subr.mxu1 %v1452_v54  ;;  %v5123_v54 = vld [vmem:[#allocation14 + $0x50] sm:$0xff] }
 0x366   : > { %3413 = vmatprep.mubr.f32.mxu0 %v1168_v39  ;;  %3074 = vmatpush3.msra.mxu1 %v1436_v55 }
 0x367   : > { %3075 = vmatprep.subr.mxu1 %v1451_v30  ;;  %3431 = vmatprep.subr.mxu0 %v1477_v5  ;;  %v5127_v30 = vld [vmem:[#allocation14 + $0x48] sm:$0xff] }
 0x368   : > { %3076 = vmatpush3.msra.mxu1 %v1435_v56  ;;  %3432 = vmatpush3.msra.mxu0 %v1477_v5  ;;  %v1132_v56 = vld [vmem:[%s5101_s29 + $0x28] sm:$0xff] }
 0x369   : > { %3414 = vmatmul.mubr.f32.gmra.mxu0 %v1169_v51  ;;  %3077 = vmatprep.subr.mxu1 %v1450_v58  ;;  %v5118_v51 = vld [vmem:[#allocation14 + $0x58] sm:$0xff] }
 0x36a   : > { %3416 = vmatprep.mubr.f32.mxu0 %v1170_v53  ;;  %3078 = vmatpush3.msra.mxu1 %v1434_v59  ;;  %v1131_v53 = vld [vmem:[%s5101_s29 + $0x20] sm:$0xff]  ;;  %v5136_v59 = vld [vmem:[#allocation14 + $0x38] sm:$0xff] }
 0x36b   : > { %3079 = vmatprep.subr.mxu1 %v1449_v60  ;;  %3433 = vmatprep.subr.mxu0 %v1476_v6 }
 0x36c   : > { %3080 = vmatpush3.msra.mxu1 %v1433_v62  ;;  %3434 = vmatpush3.msra.mxu0 %v1476_v6  ;;  %v5141_v62 = vld [vmem:[#allocation14 + $0x30] sm:$0xff]  ;;  %v5154_v6 = vld [vmem:[#allocation14 + $0x18] sm:$0xff] }
 0x36d   : > { %3417 = vmatmul.mubr.f32.gmra.mxu0 %v1171_v31  ;;  %3713 = vmatprep.subr.mxu1 %v5092_v1 }
 0x36e   : > { %3419 = vmatprep.mubr.f32.mxu0 %v1172_v57  ;;  %3435 = vmatprep.subr.mxu0 %v1475_v7  ;;  %v5132_v57 = vld [vmem:[#allocation14 + $0x40] sm:$0xff] }
 0x36f   : > { %3436 = vmatpush3.msra.mxu0 %v1475_v7 }
 0x370   : > { %3437 = vmatprep.subr.mxu0 %v1474_v8 }
 0x371   : > { %3420 = vmatmul.mubr.f32.gmra.mxu0 %v1173_v61  ;;  %v1133_v61 = vld [vmem:[%s5101_s29 + $0x30] sm:$0xff] }
 0x372   : > { %3422 = vmatprep.mubr.f32.mxu0 %v1174_v63  ;;  %3438 = vmatpush3.msra.mxu0 %v1474_v8  ;;  %v1135_v8 = vld [vmem:[%s5101_s29 + $0x40] sm:$0xff] }
 0x373   : > { %3439 = vmatprep.subr.mxu0 %v1473_v10 }
 0x374   : > { %3440 = vmatpush3.msra.mxu0 %v1473_v10  ;;  %v5159_v10 = vld [vmem:[#allocation14 + $0x10] sm:$0xff] }
 0x375   : > { %3423 = vmatmul.mubr.f32.gmra.mxu0 %v1175_v3  ;;  %3441 = vmatprep.subr.mxu0 %v1472_v12  ;;  %v1134_v3 = vld [vmem:[%s5101_s29 + $0x38] sm:$0xff] }
 0x376   : > { %3442 = vmatpush3.msra.mxu0 %v1472_v12 }
 0x377   : > { %3443 = vmatprep.subr.mxu0 %v1471_v14 }
 0x378   : > { %3444 = vmatpush3.msra.mxu0 %v1471_v14  ;;  %v5163_v14 = vld [vmem:[#allocation14 + $0x8] sm:$0xff] }
 0x379   : > { %3445 = vmatprep.subr.mxu0 %v1470_v16 }
 0x37a   : > { %3446 = vmatpush3.msra.mxu0 %v1470_v16 }
 0x37b   : > { %3447 = vmatprep.subr.mxu0 %v1469_v11 }
 0x37c   : > { %3448 = vmatpush3.msra.mxu0 %v1469_v11  ;;  %v1136_v11 = vld [vmem:[%s5101_s29 + $0x48] sm:$0xff] }
 0x37d   : > { %3449 = vmatprep.subr.mxu0 %v1468_v18 }
 0x37e   : > { %3450 = vmatpush3.msra.mxu0 %v1468_v18  ;;  %v5168_v18 = vld [vmem:[#allocation14] sm:$0xff] }
 0x37f   : > { %3451 = vmatprep.subr.mxu0 %v1467_v20 }
 0x380   : > { %3452 = vmatpush3.msra.mxu0 %v1467_v20 }
 0x381   : > { %3453 = vmatprep.subr.mxu0 %v1466_v32 }
 0x382   : > { %3454 = vmatpush3.msra.mxu0 %v1466_v32 }
 0x383   : > { %3455 = vmatprep.subr.mxu0 %v1465_v33 }
 0x384   : > { %3456 = vmatpush3.msra.mxu0 %v1465_v33  ;;  %v1137_v33 = vld [vmem:[%s5101_s29 + $0x50] sm:$0xff] }
 0x385   : > { %3481 = vmatprep.subr.mxu0 %v5092_v1 }
 0x3b6   : > { %v1340_v36 = vpop.permute.xlu0 %1339 }
 0x3b7   : > { %v1417_v37 = vmul.f32 %v1340_v36, %v1127_v34  ;;  %v1350_v40 = vpop.permute.xlu1 %1349 }
 0x3b8   : > { %v1419_v46 = vmul.f32 %v1350_v40, %v1129_v41 }
 0x3b9   : > { %1552 = vmatprep.mubr.f32.mxu1 %v1417_v37  ;;  %v1138_v37 = vld [vmem:[%s5101_s29 + $0x58] sm:$0xff] }
 0x3ba   : > { %v1345_v43 = vpop.permute.xlu0 %1344  ;;  %1553 = vmatmul.mubr.f32.vlgmr.msra.gmra.mxu1 %v1127_v34 }
 0x3bb   : > { %v1418_v44 = vmul.f32 %v1345_v43, %v1128_v38  ;;  %3729 = vmatpush3.msra.mxu1 %v5092_v1  ;;  %v1355_v39 = vpop.permute.xlu1 %1354 }
 0x3bc   : > { %3714 = vmatprep.subr.mxu1 %v5106_v42  ;;  %v1420_v50 = vmul.f32 %v1355_v39, %v1130_v45 }
 0x3bd   : > { %1557 = vmatprep.mubr.f32.mxu1 %v1418_v44  ;;  %3730 = vmatpush3.msra.mxu1 %v5106_v42 }
 0x3be   : > { %1558 = vmatmul.mubr.f32.gmra.mxu1 %v1128_v38  ;;  %3715 = vmatprep.subr.mxu1 %v5109_v49  ;;  %v1360_v52 = vpop.permute.xlu0 %1359 }
 0x3bf   : > { %1562 = vmatprep.mubr.f32.mxu1 %v1419_v46  ;;  %3731 = vmatpush3.msra.mxu1 %v5109_v49  ;;  %v1421_v55 = vmul.f32 %v1360_v52, %v1131_v53  ;;  %v1365_v31 = vpop.permute.xlu1 %1364  ;;  %v1140_v46 = vld [vmem:[%s5101_s29 + $0x68] sm:$0xff] }
 0x3c0   : > { %3716 = vmatprep.subr.mxu1 %v5114_v47  ;;  %v1422_v58 = vmul.f32 %v1365_v31, %v1132_v56 }
 0x3c1   : > { %3732 = vmatpush3.msra.mxu1 %v5114_v47 }
 0x3c2   : > { %1563 = vmatmul.mubr.f32.gmra.mxu1 %v1129_v41  ;;  %3717 = vmatprep.subr.mxu1 %v5118_v51  ;;  %v1370_v60 = vpop.permute.xlu0 %1369  ;;  %v1139_v41 = vld [vmem:[%s5101_s29 + $0x60] sm:$0xff] }
 0x3c3   : > { %1567 = vmatprep.mubr.f32.mxu1 %v1420_v50  ;;  %3733 = vmatpush3.msra.mxu1 %v5118_v51  ;;  %v1423_v63 = vmul.f32 %v1370_v60, %v1133_v61  ;;  %v1375_v2 = vpop.permute.xlu1 %1374  ;;  %v1141_v50 = vld [vmem:[%s5101_s29 + $0x70] sm:$0xff] }
 0x3c4   : > { %3718 = vmatprep.subr.mxu1 %v5123_v54  ;;  %v1424_v5 = vmul.f32 %v1375_v2, %v1134_v3 }
 0x3c5   : > { %3734 = vmatpush3.msra.mxu1 %v5123_v54 }
 0x3c6   : > { %1568 = vmatmul.mubr.f32.gmra.mxu1 %v1130_v45  ;;  %3719 = vmatprep.subr.mxu1 %v5127_v30  ;;  %v1380_v7 = vpop.permute.xlu0 %1379 }
 0x3c7   : > { %1572 = vmatprep.mubr.f32.mxu1 %v1421_v55  ;;  %3735 = vmatpush3.msra.mxu1 %v5127_v30  ;;  %v1425_v12 = vmul.f32 %v1380_v7, %v1135_v8  ;;  %v1385_v16 = vpop.permute.xlu1 %1384  ;;  %v1142_v55 = vld [vmem:[%s5101_s29 + $0x78] sm:$0xff] }
 0x3c8   : > { %3720 = vmatprep.subr.mxu1 %v5132_v57  ;;  %v1426_v20 = vmul.f32 %v1385_v16, %v1136_v11 }
 0x3c9   : > { %3736 = vmatpush3.msra.mxu1 %v5132_v57 }
 0x3ca   : > { %1573 = vmatmul.mubr.f32.gmra.mxu1 %v1131_v53  ;;  %3721 = vmatprep.subr.mxu1 %v5136_v59  ;;  %v1390_v32 = vpop.permute.xlu0 %1389 }
 0x3cb   : > { %1577 = vmatprep.mubr.f32.mxu1 %v1422_v58  ;;  %3737 = vmatpush3.msra.mxu1 %v5136_v59  ;;  %v1427_v34 = vmul.f32 %v1390_v32, %v1137_v33  ;;  %v1395_v36 = vpop.permute.xlu1 %1394 }
 0x3cc   : > { %3722 = vmatprep.subr.mxu1 %v5141_v62  ;;  %v1428_v38 = vmul.f32 %v1395_v36, %v1138_v37 }
 0x3cd   : > { %3738 = vmatpush3.msra.mxu1 %v5141_v62 }
 0x3ce   : > { %1578 = vmatmul.mubr.f32.gmra.mxu1 %v1132_v56  ;;  %3723 = vmatprep.subr.mxu1 %v5145_v0  ;;  %v1400_v40 = vpop.permute.xlu0 %1399 }
 0x3cf   : > { %1582 = vmatprep.mubr.f32.mxu1 %v1423_v63  ;;  %3739 = vmatpush3.msra.mxu1 %v5145_v0  ;;  %v1429_v43 = vmul.f32 %v1400_v40, %v1139_v41  ;;  %v1405_v44 = vpop.permute.xlu1 %1404 }
 0x3d0   : > { %3724 = vmatprep.subr.mxu1 %v5150_v4  ;;  %v1430_v39 = vmul.f32 %v1405_v44, %v1140_v46 }
 0x3d1   : > { %3740 = vmatpush3.msra.mxu1 %v5150_v4 }
 0x3d2   : > { %1583 = vmatmul.mubr.f32.gmra.mxu1 %v1133_v61  ;;  %3725 = vmatprep.subr.mxu1 %v5154_v6  ;;  %v1410_v45 = vpop.permute.xlu0 %1409 }
 0x3d3   : > { %1587 = vmatprep.mubr.f32.mxu1 %v1424_v5  ;;  %3741 = vmatpush3.msra.mxu1 %v5154_v6  ;;  %v1431_v52 = vmul.f32 %v1410_v45, %v1141_v50  ;;  %v1415_v53 = vpop.permute.xlu1 %1414 }
 0x3d4   : > { %3726 = vmatprep.subr.mxu1 %v5159_v10  ;;  %v1432_v31 = vmul.f32 %v1415_v53, %v1142_v55 }
 0x3d5   : > { %3742 = vmatpush3.msra.mxu1 %v5159_v10 }
 0x3d6   : > { %1588 = vmatmul.mubr.f32.gmra.mxu1 %v1134_v3  ;;  %3727 = vmatprep.subr.mxu1 %v5163_v14 }
 0x3d7   : > { %1592 = vmatprep.mubr.f32.mxu1 %v1425_v12  ;;  %3743 = vmatpush3.msra.mxu1 %v5163_v14 }
 0x3d8   : > { %3728 = vmatprep.subr.mxu1 %v5168_v18 }
 0x3d9   : > { %3744 = vmatpush3.msra.mxu1 %v5168_v18 }
 0x3da   : > { %1593 = vmatmul.mubr.f32.gmra.mxu1 %v1135_v8 }
 0x3db   : > { %1597 = vmatprep.mubr.f32.mxu1 %v1426_v20 }
 0x3de   : > { %1598 = vmatmul.mubr.f32.gmra.mxu1 %v1136_v11 }
 0x3df   : > { %1602 = vmatprep.mubr.f32.mxu1 %v1427_v34 }
 0x3e2   : > { %1603 = vmatmul.mubr.f32.gmra.mxu1 %v1137_v33 }
 0x3e3   : > { %1607 = vmatprep.mubr.f32.mxu1 %v1428_v38 }
 0x3e6   : > { %1608 = vmatmul.mubr.f32.gmra.mxu1 %v1138_v37 }
 0x3e7   : > { %1612 = vmatprep.mubr.f32.mxu1 %v1429_v43 }
 0x3ea   : > { %1613 = vmatmul.mubr.f32.gmra.mxu1 %v1139_v41 }
 0x3eb   : > { %1617 = vmatprep.mubr.f32.mxu1 %v1430_v39 }
 0x3ee   : > { %1618 = vmatmul.mubr.f32.gmra.mxu1 %v1140_v46 }
 0x3ef   : > { %1622 = vmatprep.mubr.f32.mxu1 %v1431_v52 }
 0x3f2   : > { %1623 = vmatmul.mubr.f32.gmra.mxu1 %v1141_v50 }
 0x3f3   : > { %1627 = vmatprep.mubr.f32.mxu1 %v1432_v31 }
 0x3f6   : > { %1628 = vmatmul.mubr.f32.gmra.mxu1 %v1142_v55 }
 0x3f7   : > { %3525 = vmatprep.mubr.f32.mxu1 %v4996_v22 }
 0x3fa   : > { %3526 = vmatmul.mubr.f32.vlgmr.msra.gmra.mxu1 %v5002_v23 }
 0x3fb   : > { %3528 = vmatprep.mubr.f32.mxu1 %v5004_v24 }
 0x3fe   : > { %3529 = vmatmul.mubr.f32.gmra.mxu1 %v5006_v25 }
 0x3ff   : > { %3531 = vmatprep.mubr.f32.mxu1 %v5008_v26 }
 0x402   : > { %3532 = vmatmul.mubr.f32.gmra.mxu1 %v5010_v27 }
 0x403   : > { %3534 = vmatprep.mubr.f32.mxu1 %v5012_v28 }
 0x406   : > { %3535 = vmatmul.mubr.f32.gmra.mxu1 %v5014_v29 }
 0x419   : > { %v3403_v56 = vpop.f32.mrf.mxu0 }
 0x41b   : > { %v1258_v58 = vpop.f32.mrf.mxu0 }
 0x41c   : > { %3457 = vmatprep.mubr.f32.mxu0 %v1258_v58 }
 0x41d   : > { %v3406_v60 = vpop.f32.mrf.mxu0  ;;  %3458 = vmatmul.mubr.f32.vlgmr.msra.gmra.mxu0 %v3403_v56 }
 0x41e   : > { %3482 = vmatpush3.msra.mxu0 %v5092_v1 }
 0x41f   : > { %3483 = vmatprep.subr.mxu0 %v5106_v42  ;;  %v1268_v61 = vpop.f32.mrf.mxu0 }
 0x420   : > { %3484 = vmatpush3.msra.mxu0 %v5106_v42  ;;  %3460 = vmatprep.mubr.f32.mxu0 %v1268_v61 }
 0x421   : > { %3485 = vmatprep.subr.mxu0 %v5109_v49  ;;  %v3409_v63 = vpop.f32.mrf.mxu0  ;;  %3461 = vmatmul.mubr.f32.gmra.mxu0 %v3406_v60 }
 0x422   : > { %3486 = vmatpush3.msra.mxu0 %v5109_v49 }
 0x423   : > { %3487 = vmatprep.subr.mxu0 %v5114_v47  ;;  %v1278_v2 = vpop.f32.mrf.mxu0 }
 0x424   : > { %3488 = vmatpush3.msra.mxu0 %v5114_v47  ;;  %3463 = vmatprep.mubr.f32.mxu0 %v1278_v2 }
 0x425   : > { %3489 = vmatprep.subr.mxu0 %v5118_v51  ;;  %v3412_v1 = vpop.f32.mrf.mxu0  ;;  %3464 = vmatmul.mubr.f32.gmra.mxu0 %v3409_v63 }
 0x426   : > { %3490 = vmatpush3.msra.mxu0 %v5118_v51 }
 0x427   : > { %3491 = vmatprep.subr.mxu0 %v5123_v54  ;;  %v1288_v42 = vpop.f32.mrf.mxu0 }
 0x428   : > { %3492 = vmatpush3.msra.mxu0 %v5123_v54  ;;  %3466 = vmatprep.mubr.f32.mxu0 %v1288_v42 }
 0x429   : > { %3493 = vmatprep.subr.mxu0 %v5127_v30  ;;  %v3415_v49 = vpop.f32.mrf.mxu0  ;;  %3467 = vmatmul.mubr.f32.gmra.mxu0 %v3412_v1 }
 0x42a   : > { %3494 = vmatpush3.msra.mxu0 %v5127_v30 }
 0x42b   : > { %3495 = vmatprep.subr.mxu0 %v5132_v57  ;;  %v1298_v47 = vpop.f32.mrf.mxu0 }
 0x42c   : > { %3496 = vmatpush3.msra.mxu0 %v5132_v57  ;;  %3469 = vmatprep.mubr.f32.mxu0 %v1298_v47 }
 0x42d   : > { %3497 = vmatprep.subr.mxu0 %v5136_v59  ;;  %v3418_v51 = vpop.f32.mrf.mxu0  ;;  %3470 = vmatmul.mubr.f32.gmra.mxu0 %v3415_v49 }
 0x42e   : > { %3498 = vmatpush3.msra.mxu0 %v5136_v59 }
 0x42f   : > { %3499 = vmatprep.subr.mxu0 %v5141_v62  ;;  %v1308_v54 = vpop.f32.mrf.mxu0 }
 0x430   : > { %3500 = vmatpush3.msra.mxu0 %v5141_v62  ;;  %3472 = vmatprep.mubr.f32.mxu0 %v1308_v54 }
 0x431   : > { %3501 = vmatprep.subr.mxu0 %v5145_v0  ;;  %v3421_v30 = vpop.f32.mrf.mxu0  ;;  %3473 = vmatmul.mubr.f32.gmra.mxu0 %v3418_v51 }
 0x432   : > { %3502 = vmatpush3.msra.mxu0 %v5145_v0 }
 0x433   : > { %3503 = vmatprep.subr.mxu0 %v5150_v4  ;;  %v1318_v57 = vpop.f32.mrf.mxu0 }
 0x434   : > { %3504 = vmatpush3.msra.mxu0 %v5150_v4  ;;  %3475 = vmatprep.mubr.f32.mxu0 %v1318_v57 }
 0x435   : > { %3505 = vmatprep.subr.mxu0 %v5154_v6  ;;  %v3424_v59 = vpop.f32.mrf.mxu0  ;;  %3476 = vmatmul.mubr.f32.gmra.mxu0 %v3421_v30 }
 0x436   : > { %3506 = vmatpush3.msra.mxu0 %v5154_v6 }
 0x437   : > { %3507 = vmatprep.subr.mxu0 %v5159_v10  ;;  %v1328_v62 = vpop.f32.mrf.mxu0 }
 0x438   : > { %3508 = vmatpush3.msra.mxu0 %v5159_v10  ;;  %3478 = vmatprep.mubr.f32.mxu0 %v1328_v62 }
 0x439   : > { %3509 = vmatprep.subr.mxu0 %v5163_v14  ;;  %3479 = vmatmul.mubr.f32.gmra.mxu0 %v3424_v59 }
 0x43a   : > { %3510 = vmatpush3.msra.mxu0 %v5163_v14  ;;  %3513 = vmatprep.mubr.f32.mxu0 %v4979_v9 }
 0x43b   : > { %3511 = vmatprep.subr.mxu0 %v5168_v18 }
 0x43c   : > { %3512 = vmatpush3.msra.mxu0 %v5168_v18 }
 0x43d   : > { %3514 = vmatmul.mubr.f32.vlgmr.msra.gmra.mxu0 %v4981_v13 }
 0x43e   : > { %3516 = vmatprep.mubr.f32.mxu0 %v4983_v15 }
 0x441   : > { %3517 = vmatmul.mubr.f32.gmra.mxu0 %v4986_v35 }
 0x442   : > { %3519 = vmatprep.mubr.f32.mxu0 %v4988_v48 }
 0x445   : > { %3520 = vmatmul.mubr.f32.gmra.mxu0 %v4990_v17 }
 0x446   : > { %3522 = vmatprep.mubr.f32.mxu0 %v4992_v19 }
 0x449   : > { %3523 = vmatmul.mubr.f32.gmra.mxu0 %v4994_v21 }
 0x47a   : > { %v3081_v0 = vpop.f32.mrf.mxu1 }
 0x47c   : > { %v3082_v3 = vpop.f32.mrf.mxu1 }
 0x47d   : > { %v5227_v4 = vadd.f32 %v3082_v3, %v3081_v0  ;;  %v5266_v0 = vld [vmem:[%s5807_s21] ss:$0 sm:$0xff] }
 0x47e   : > { %v3084_v5 = vpop.f32.mrf.mxu1 }
 0x480   : > { %v3085_v6 = vpop.f32.mrf.mxu1 }
 0x481   : > { %v5229_v7 = vadd.f32 %v3085_v6, %v3084_v5 }
 0x482   : > { %v3087_v8 = vpop.f32.mrf.mxu1 }
 0x484   : > { %v3088_v10 = vpop.f32.mrf.mxu1 }
 0x485   : > { %v5231_v12 = vadd.f32 %v3088_v10, %v3087_v8 }
 0x486   : > { %v5233_v14 = vpop.f32.mrf.mxu1 }
 0x488   : > { %v5235_v16 = vpop.f32.mrf.mxu1 }
 0x48a   : > { %v3093_v11 = vpop.f32.mrf.mxu1 }
 0x48c   : > { %v3094_v18 = vpop.f32.mrf.mxu1 }
 0x48d   : > { %v5237_v20 = vadd.f32 %v3094_v18, %v3093_v11 }
 0x48e   : > { %v5239_v32 = vpop.f32.mrf.mxu1 }
 0x490   : > { %v5241_v33 = vpop.f32.mrf.mxu1 }
 0x492   : > { %v5243_v34 = vpop.f32.mrf.mxu1 }
 0x494   : > { %v5245_v36 = vpop.f32.mrf.mxu1 }
 0x496   : > { %v5247_v37 = vpop.f32.mrf.mxu1 }
 0x498   : > { %v5249_v38 = vpop.f32.mrf.mxu1 }
 0x49a   : > { %v3105_v40 = vpop.f32.mrf.mxu1 }
 0x49c   : > { %v3106_v41 = vpop.f32.mrf.mxu1 }
 0x49d   : > { %v3107_v62 = vadd.f32 %v3106_v41, %v3105_v40 }
 0x49e   : > { %v3108_v43 = vpop.f32.mrf.mxu1 }
 0x4a0   : > { %v3109_v44 = vpop.f32.mrf.mxu1 }
 0x4a1   : > { %v3110_v57 = vadd.f32 %v3109_v44, %v3108_v43  ;;  %v1595_v43 = vadd.f32 %v3107_v62, %v5266_v0 }
 0x4a2   : > { %v3111_v46 = vpop.f32.mrf.mxu1 }
 0x4a3   : > { %v1600_v8 = vadd.f32 %v3110_v57, %v5266_v0 }
 0x4a4   : > { %v3112_v39 = vpop.f32.mrf.mxu1 }
 0x4a5   : > { %v3113_v10 = vadd.f32 %v3112_v39, %v3111_v46 }
 0x4a6   : > { %v3114_v45 = vpop.f32.mrf.mxu1 }
 0x4a7   : > { %v1605_v17 = vadd.f32 %v3113_v10, %v5266_v0 }
 0x4a8   : > { %v3115_v50 = vpop.f32.mrf.mxu1 }
 0x4a9   : > { %v3116_v6 = vadd.f32 %v3115_v50, %v3114_v45 }
 0x4aa   : > { %v3117_v52 = vpop.f32.mrf.mxu1 }
 0x4ab   : > { %v1610_v21 = vadd.f32 %v3116_v6, %v5266_v0 }
 0x4ac   : > { %v3118_v53 = vpop.f32.mrf.mxu1 }
 0x4ad   : > { %v3119_v19 = vadd.f32 %v3118_v53, %v3117_v52 }
 0x4ae   : > { %v3120_v55 = vpop.f32.mrf.mxu1 }
 0x4af   : > { %v1615_v53 = vadd.f32 %v3119_v19, %v5266_v0  ;;  %v1560_v19 = vadd.f32 %v5229_v7, %v5266_v0 }
 0x4b0   : > { %v3121_v31 = vpop.f32.mrf.mxu1 }
 0x4b1   : > { %v3122_v18 = vadd.f32 %v3121_v31, %v3120_v55 }
 0x4b2   : > { %v3123_v56 = vpop.f32.mrf.mxu1 }
 0x4b3   : > { %v1620_v46 = vadd.f32 %v3122_v18, %v5266_v0 }
 0x4b4   : > { %v3124_v58 = vpop.f32.mrf.mxu1 }
 0x4b6   : > { %v3126_v60 = vpop.f32.mrf.mxu1 }
 0x4b8   : > { %v3127_v61 = vpop.f32.mrf.mxu1 }
 0x4b9   : > { %v3128_v50 = vadd.f32 %v3127_v61, %v3126_v60 }
 0x4ba   : > { %v3527_v1 = vpop.f32.mrf.mxu1 }
 0x4bb   : > { %v1630_v60 = vadd.f32 %v3128_v50, %v5266_v0 }
 0x4bc   : > { %v1933_v47 = vpop.f32.mrf.mxu1 }
 0x4be   : > { %v3530_v30 = vpop.f32.mrf.mxu1 }
 0x4c0   : > { %v1943_v5 = vpop.f32.mrf.mxu1 }
 0x4c2   : > { %v3533_v40 = vpop.f32.mrf.mxu1 }
 0x4c4   : > { %v1953_v31 = vpop.f32.mrf.mxu1 }
 0x4c6   : > { %v3536_v62 = vpop.f32.mrf.mxu1 }
 0x4dd   : > { %v3459_v63 = vpop.f32.mrf.mxu0 }
 0x4de   : > { %v1705_v10 = vadd.f32 %v3459_v63, %v1560_v19 }
 0x4df   : > { %v5251_v2 = vpop.f32.mrf.mxu0 }
 0x4e1   : > { %v5253_v42 = vpop.f32.mrf.mxu0 }
 0x4e3   : > { %v5255_v49 = vpop.f32.mrf.mxu0 }
 0x4e5   : > { %v5257_v51 = vpop.f32.mrf.mxu0 }
 0x4e7   : > { %v5259_v54 = vpop.f32.mrf.mxu0 }
 0x4e9   : > { %v5261_v59 = vpop.f32.mrf.mxu0 }
 0x4eb   : > { %v5268_v3 = vpop.f32.mrf.mxu0 }
 0x4ed   : > { %v3471_v11 = vpop.f32.mrf.mxu0 }
 0x4ee   : > { %v1745_v29 = vadd.f32 %v3471_v11, %v1600_v8  ;;  %v1963_v8 = vpop.f32.mrf.mxu1  ;;  %v1555_v11 = vadd.f32 %v5227_v4, %v5266_v0 }
 0x4ef   : > { %v1739_v44 = vpop.f32.mrf.mxu0 }
 0x4f0   : > { %v1740_v41 = vadd.f32 %v1739_v44, %v1595_v43  ;;  %v1981_v28 = vadd.f32 %v3527_v1, %v1745_v29  ;;  %v3098_v43 = vadd.f32 %v5241_v33, %v5239_v32  ;;  %v1700_v44 = vadd.f32 %v5251_v2, %v1555_v11 }
 0x4f1   : > { %v3474_v27 = vpop.f32.mrf.mxu0  ;;  %v3104_v32 = vadd.f32 %v5249_v38, %v5247_v37 }
 0x4f2   : > { %v1755_v45 = vadd.f32 %v3474_v27, %v1610_v21  ;;  %1997 = vst [vmem:[%s5276_s20 + $0x48] sm:$0xff] %v1981_v28  ;;  %v1980_v39 = vadd.f32 %v1933_v47, %v1740_v41  ;;  %v3125_v21 = vadd.f32 %v3124_v58, %v3123_v56  ;;  %v1580_v2 = vadd.f32 %v3098_v43, %v5266_v0 }
 0x4f3   : > { %v1749_v55 = vpop.f32.mrf.mxu0 }
 0x4f4   : > { %v1750_v57 = vadd.f32 %v1749_v55, %v1605_v17  ;;  %1996 = vst [vmem:[%s5276_s20 + $0x40] sm:$0xff] %v1980_v39  ;;  %v1983_v29 = vadd.f32 %v3530_v30, %v1755_v45  ;;  %v3092_v17 = vadd.f32 %v5235_v16, %v5233_v14  ;;  %v1625_v56 = vadd.f32 %v3125_v21, %v5266_v0 }
 0x4f5   : > { %v3477_v52 = vpop.f32.mrf.mxu0  ;;  %v1565_v45 = vadd.f32 %v5231_v12, %v5266_v0  ;;  %v1725_v12 = vadd.f32 %v5257_v51, %v1580_v2 }
 0x4f6   : > { %v1765_v27 = vadd.f32 %v3477_v52, %v1620_v46  ;;  %1999 = vst [vmem:[%s5276_s20 + $0x58] sm:$0xff] %v1983_v29  ;;  %v1982_v61 = vadd.f32 %v1943_v5, %v1750_v57  ;;  %v1570_v16 = vadd.f32 %v3092_v17, %v5266_v0 }
 0x4f7   : > { %v1759_v1 = vpop.f32.mrf.mxu0  ;;  %v1710_v33 = vadd.f32 %v5255_v49, %v1565_v45  ;;  %v1590_v49 = vadd.f32 %v3104_v32, %v5266_v0 }
 0x4f8   : > { %v1760_v28 = vadd.f32 %v1759_v1, %v1615_v53  ;;  %1998 = vst [vmem:[%s5276_s20 + $0x50] sm:$0xff] %v1982_v61  ;;  %v1985_v47 = vadd.f32 %v3533_v40, %v1765_v27  ;;  %v1715_v4 = vadd.f32 %v5253_v42, %v1570_v16  ;;  %v3101_v42 = vadd.f32 %v5245_v36, %v5243_v34 }
 0x4f9   : > { %v3480_v30 = vpop.f32.mrf.mxu0  ;;  %v1735_v34 = vadd.f32 %v5261_v59, %v1590_v49 }
 0x4fa   : > { %v1775_v6 = vadd.f32 %v3480_v30, %v1630_v60  ;;  %2001 = vst [vmem:[%s5276_s20 + $0x68] sm:$0xff] %v1985_v47  ;;  %v1984_v58 = vadd.f32 %v1953_v31, %v1760_v28  ;;  %v1575_v31 = vadd.f32 %v5237_v20, %v5266_v0  ;;  %v1585_v36 = vadd.f32 %v3101_v42, %v5266_v0 }
 0x4fb   : > { %v1769_v5 = vpop.f32.mrf.mxu0 }
 0x4fc   : > { %v1770_v18 = vadd.f32 %v1769_v5, %v1625_v56  ;;  %2000 = vst [vmem:[%s5276_s20 + $0x60] sm:$0xff] %v1984_v58  ;;  %v1987_v14 = vadd.f32 %v3536_v62, %v1775_v6  ;;  %v1720_v38 = vadd.f32 %v5259_v54, %v1575_v31  ;;  %v1730_v20 = vadd.f32 %v5268_v3, %v1585_v36 }
 0x4fd   : > { %v3515_v7 = vpop.f32.mrf.mxu0 }
 0x4fe   : > { %v1973_v40 = vadd.f32 %v3515_v7, %v1705_v10  ;;  %2003 = vst [vmem:[%s5276_s20 + $0x78] sm:$0xff] %v1987_v14  ;;  %v1986_v41 = vadd.f32 %v1963_v8, %v1770_v18 }
 0x4ff   : > { %v1893_v63 = vpop.f32.mrf.mxu0 }
 0x500   : > { %1989 = vst [vmem:[%s5276_s20 + $0x8] sm:$0xff] %v1973_v40  ;;  %v1972_v50 = vadd.f32 %v1893_v63, %v1700_v44  ;;  %2002 = vst [vmem:[%s5276_s20 + $0x70] sm:$0xff] %v1986_v41 }
 0x501   : > { %v3518_v46 = vpop.f32.mrf.mxu0 }
 0x502   : > { %1988 = vst [vmem:[%s5276_s20] sm:$0xff] %v1972_v50  ;;  %v1975_v39 = vadd.f32 %v3518_v46, %v1715_v4 }
 0x503   : > { %v1903_v55 = vpop.f32.mrf.mxu0 }
 0x504   : > { %1991 = vst [vmem:[%s5276_s20 + $0x18] sm:$0xff] %v1975_v39  ;;  %v1974_v57 = vadd.f32 %v1903_v55, %v1710_v33 }
 0x505   : > { %v3521_v37 = vpop.f32.mrf.mxu0 }
 0x506   : > { %1990 = vst [vmem:[%s5276_s20 + $0x10] sm:$0xff] %v1974_v57  ;;  %v1977_v29 = vadd.f32 %v3521_v37, %v1725_v12 }
 0x507   : > { %v1913_v52 = vpop.f32.mrf.mxu0 }
 0x508   : > { %1993 = vst [vmem:[%s5276_s20 + $0x28] sm:$0xff] %v1977_v29  ;;  %v1976_v51 = vadd.f32 %v1913_v52, %v1720_v38 }
 0x509   : > { %v3524_v53 = vpop.f32.mrf.mxu0 }
 0x50a   : > { %1992 = vst [vmem:[%s5276_s20 + $0x20] sm:$0xff] %v1976_v51  ;;  %v1979_v21 = vadd.f32 %v3524_v53, %v1735_v34 }
 0x50b   : > { %v1923_v27 = vpop.f32.mrf.mxu0 }
 0x50c   : > { %1995 = vst [vmem:[%s5276_s20 + $0x38] sm:$0xff] %v1979_v21  ;;  %v1978_v54 = vadd.f32 %v1923_v27, %v1730_v20 }
 0x50e   : > { %1994 = vst [vmem:[%s5276_s20 + $0x30] sm:$0xff] %v1978_v54 }
 0x50f PF: > { %s5808_s23 = sld [smem:[#allocation28_spill]] }
 0x515   : > { %p2900_p11 = scmp.ne.s32.totalorder %s5808_s23, 1 }
 0x516   : > { %s5342_s25 = scalar_lea.vmem (!%p2900_p11), [#allocation5], %s4691_s2 }
 0x517   : > { %2007 = sbr.rel (%p2900_p11) target bundleno = 1551 (0x60f), region = 120 }
 0x51c   : > { %v2023_v60 = vld [vmem:[#allocation14 + $0xf8] sm:$0xff]  ;;  %v2022_v61 = vld [vmem:[#allocation14 + $0xf0] sm:$0xff]  ;;  %3569 = vmatprep.mubr.f32.mxu0 %v4979_v9  ;;  %3581 = vmatprep.mubr.f32.mxu1 %v4996_v22  ;;  %v2021_v59 = vld [vmem:[#allocation14 + $0xe8] sm:$0xff] }
 0x51d   : > { %3537 = vmatprep.subr.mxu0 %v2023_v60  ;;  %3745 = vmatprep.subr.mxu1 %v2023_v60  ;;  %v2020_v0 = vld [vmem:[#allocation14 + $0xe0] sm:$0xff]  ;;  %v2019_v3 = vld [vmem:[#allocation14 + $0xd8] sm:$0xff]  ;;  %v2018_v1 = vld [vmem:[#allocation14 + $0xd0] sm:$0xff] }
 0x51e   : > { %3538 = vmatpush3.msra.mxu0 %v2023_v60  ;;  %3761 = vmatpush3.msra.mxu1 %v2023_v60  ;;  %v2017_v62 = vld [vmem:[#allocation14 + $0xc8] sm:$0xff]  ;;  %v2016_v28 = vld [vmem:[#allocation14 + $0xc0] sm:$0xff]  ;;  %v2015_v47 = vld [vmem:[#allocation14 + $0xb8] sm:$0xff] }
 0x51f   : > { %3539 = vmatprep.subr.mxu0 %v2022_v61  ;;  %3746 = vmatprep.subr.mxu1 %v2022_v61  ;;  %v2014_v17 = vld [vmem:[#allocation14 + $0xb0] sm:$0xff]  ;;  %v2013_v30 = vld [vmem:[#allocation14 + $0xa8] sm:$0xff]  ;;  %v2012_v19 = vld [vmem:[#allocation14 + $0xa0] sm:$0xff] }
 0x520   : > { %3540 = vmatpush3.msra.mxu0 %v2022_v61  ;;  %3762 = vmatpush3.msra.mxu1 %v2022_v61  ;;  %v2011_v6 = vld [vmem:[#allocation14 + $0x98] sm:$0xff]  ;;  %v2010_v56 = vld [vmem:[#allocation14 + $0x90] sm:$0xff]  ;;  %v2009_v58 = vld [vmem:[#allocation14 + $0x88] sm:$0xff] }
 0x521   : > { %3541 = vmatprep.subr.mxu0 %v2021_v59  ;;  %3747 = vmatprep.subr.mxu1 %v2021_v59  ;;  %v2008_v5 = vld [vmem:[#allocation14 + $0x80] sm:$0xff]  ;;  %v5811_v11 = vld [vmem:[#allocation40_spill] sm:$0xff]  ;;  %v5813_v14 = vld [vmem:[#allocation41_spill] sm:$0xff] }
 0x522   : > { %3542 = vmatpush3.msra.mxu0 %v2021_v59  ;;  %3763 = vmatpush3.msra.mxu1 %v2021_v59  ;;  %v5809_v8 = vld [vmem:[#allocation39_spill] sm:$0xff]  ;;  %v5810_v10 = vld [vmem:[#allocation42_spill] sm:$0xff]  ;;  %v5814_v16 = vld [vmem:[#allocation44_spill] sm:$0xff] }
 0x523   : > { %3543 = vmatprep.subr.mxu0 %v2020_v0  ;;  %3748 = vmatprep.subr.mxu1 %v2020_v0  ;;  %v5812_v18 = vld [vmem:[#allocation43_spill] sm:$0xff]  ;;  %v2028_v32 = vld [vmem:[%s5342_s25 + $0x18] sm:$0xff]  ;;  %v2027_v12 = vld [vmem:[%s5342_s25 + $0x10] sm:$0xff] }
 0x524   : > { %3544 = vmatpush3.msra.mxu0 %v2020_v0  ;;  %3764 = vmatpush3.msra.mxu1 %v2020_v0  ;;  %v2026_v7 = vld [vmem:[%s5342_s25 + $0x8] sm:$0xff]  ;;  %v2025_v41 = vld [vmem:[%s5342_s25] sm:$0xff]  ;;  %v2036_v33 = vld [vmem:[%s5342_s25 + $0x58] sm:$0xff] }
 0x525   : > { %3545 = vmatprep.subr.mxu0 %v2019_v3  ;;  %3749 = vmatprep.subr.mxu1 %v2019_v3  ;;  %v2034_v43 = vld [vmem:[%s5342_s25 + $0x48] sm:$0xff]  ;;  %v2033_v63 = vld [vmem:[%s5342_s25 + $0x40] sm:$0xff]  ;;  %v2035_v31 = vld [vmem:[%s5342_s25 + $0x50] sm:$0xff] }
 0x526   : > { %3546 = vmatpush3.msra.mxu0 %v2019_v3  ;;  %3765 = vmatpush3.msra.mxu1 %v2019_v3  ;;  %v2030_v29 = vld [vmem:[%s5342_s25 + $0x28] sm:$0xff]  ;;  %v2029_v20 = vld [vmem:[%s5342_s25 + $0x20] sm:$0xff]  ;;  %v2032_v59 = vld [vmem:[%s5342_s25 + $0x38] sm:$0xff] }
 0x527   : > { %3547 = vmatprep.subr.mxu0 %v2018_v1  ;;  %3750 = vmatprep.subr.mxu1 %v2018_v1  ;;  %v2038_v52 = vld [vmem:[%s5342_s25 + $0x68] sm:$0xff]  ;;  %v2037_v21 = vld [vmem:[%s5342_s25 + $0x60] sm:$0xff]  ;;  %v2040_v0 = vld [vmem:[%s5342_s25 + $0x78] sm:$0xff] }
 0x528   : > { %3548 = vmatpush3.msra.mxu0 %v2018_v1  ;;  %3766 = vmatpush3.msra.mxu1 %v2018_v1 }
 0x529   : > { %3549 = vmatprep.subr.mxu0 %v2017_v62  ;;  %3751 = vmatprep.subr.mxu1 %v2017_v62 }
 0x52a   : > { %3550 = vmatpush3.msra.mxu0 %v2017_v62  ;;  %3767 = vmatpush3.msra.mxu1 %v2017_v62 }
 0x52b   : > { %3551 = vmatprep.subr.mxu0 %v2016_v28  ;;  %3752 = vmatprep.subr.mxu1 %v2016_v28 }
 0x52c   : > { %3552 = vmatpush3.msra.mxu0 %v2016_v28  ;;  %3768 = vmatpush3.msra.mxu1 %v2016_v28 }
 0x52d   : > { %3553 = vmatprep.subr.mxu0 %v2015_v47  ;;  %3753 = vmatprep.subr.mxu1 %v2015_v47 }
 0x52e   : > { %3554 = vmatpush3.msra.mxu0 %v2015_v47  ;;  %3769 = vmatpush3.msra.mxu1 %v2015_v47  ;;  %v2031_v47 = vld [vmem:[%s5342_s25 + $0x30] sm:$0xff] }
 0x52f   : > { %3555 = vmatprep.subr.mxu0 %v2014_v17  ;;  %3754 = vmatprep.subr.mxu1 %v2014_v17 }
 0x530   : > { %3556 = vmatpush3.msra.mxu0 %v2014_v17  ;;  %3770 = vmatpush3.msra.mxu1 %v2014_v17  ;;  %v2039_v17 = vld [vmem:[%s5342_s25 + $0x70] sm:$0xff] }
 0x531   : > { %3557 = vmatprep.subr.mxu0 %v2013_v30  ;;  %3755 = vmatprep.subr.mxu1 %v2013_v30 }
 0x532   : > { %3558 = vmatpush3.msra.mxu0 %v2013_v30  ;;  %3771 = vmatpush3.msra.mxu1 %v2013_v30 }
 0x533   : > { %3559 = vmatprep.subr.mxu0 %v2012_v19  ;;  %3756 = vmatprep.subr.mxu1 %v2012_v19 }
 0x534   : > { %3560 = vmatpush3.msra.mxu0 %v2012_v19  ;;  %3772 = vmatpush3.msra.mxu1 %v2012_v19 }
 0x535   : > { %3561 = vmatprep.subr.mxu0 %v2011_v6  ;;  %3757 = vmatprep.subr.mxu1 %v2011_v6 }
 0x536   : > { %3562 = vmatpush3.msra.mxu0 %v2011_v6  ;;  %3773 = vmatpush3.msra.mxu1 %v2011_v6 }
 0x537   : > { %3563 = vmatprep.subr.mxu0 %v2010_v56  ;;  %3758 = vmatprep.subr.mxu1 %v2010_v56 }
 0x538   : > { %3564 = vmatpush3.msra.mxu0 %v2010_v56  ;;  %3774 = vmatpush3.msra.mxu1 %v2010_v56 }
 0x539   : > { %3565 = vmatprep.subr.mxu0 %v2009_v58  ;;  %3759 = vmatprep.subr.mxu1 %v2009_v58 }
 0x53a   : > { %3566 = vmatpush3.msra.mxu0 %v2009_v58  ;;  %3775 = vmatpush3.msra.mxu1 %v2009_v58 }
 0x53b   : > { %3567 = vmatprep.subr.mxu0 %v2008_v5  ;;  %3760 = vmatprep.subr.mxu1 %v2008_v5 }
 0x53c   : > { %3568 = vmatpush3.msra.mxu0 %v2008_v5  ;;  %3776 = vmatpush3.msra.mxu1 %v2008_v5 }
 0x53d   : > { %3570 = vmatmul.mubr.f32.vlgmr.msra.gmra.mxu0 %v4981_v13  ;;  %3582 = vmatmul.mubr.f32.vlgmr.msra.gmra.mxu1 %v5002_v23 }
 0x53e   : > { %3572 = vmatprep.mubr.f32.mxu0 %v4983_v15  ;;  %3584 = vmatprep.mubr.f32.mxu1 %v5004_v24 }
 0x541   : > { %3573 = vmatmul.mubr.f32.gmra.mxu0 %v4986_v35  ;;  %3585 = vmatmul.mubr.f32.gmra.mxu1 %v5006_v25 }
 0x542   : > { %3575 = vmatprep.mubr.f32.mxu0 %v4988_v48  ;;  %3587 = vmatprep.mubr.f32.mxu1 %v5008_v26 }
 0x545   : > { %3576 = vmatmul.mubr.f32.gmra.mxu0 %v5809_v8  ;;  %3588 = vmatmul.mubr.f32.gmra.mxu1 %v5810_v10 }
 0x546   : > { %3578 = vmatprep.mubr.f32.mxu0 %v5811_v11  ;;  %3590 = vmatprep.mubr.f32.mxu1 %v5812_v18 }
 0x549   : > { %3579 = vmatmul.mubr.f32.gmra.mxu0 %v5813_v14  ;;  %3591 = vmatmul.mubr.f32.gmra.mxu1 %v5814_v16 }
 0x5fd   : > { %v3571_v44 = vpop.f32.mrf.mxu0  ;;  %v3583_v40 = vpop.f32.mrf.mxu1 }
 0x5fe   : > { %v2187_v4 = vadd.f32 %v3571_v44, %v2026_v7  ;;  %v2195_v45 = vadd.f32 %v3583_v40, %v2034_v43 }
 0x5ff   : > { %v2107_v50 = vpop.f32.mrf.mxu0  ;;  %v2147_v46 = vpop.f32.mrf.mxu1 }
 0x600   : > { %2203 = vst [vmem:[%s5342_s25 + $0x8] sm:$0xff] %v2187_v4  ;;  %2211 = vst [vmem:[%s5342_s25 + $0x48] sm:$0xff] %v2195_v45  ;;  %v2186_v2 = vadd.f32 %v2107_v50, %v2025_v41  ;;  %v2194_v39 = vadd.f32 %v2147_v46, %v2033_v63 }
 0x601   : > { %v3574_v55 = vpop.f32.mrf.mxu0  ;;  %v3586_v42 = vpop.f32.mrf.mxu1 }
 0x602   : > { %2202 = vst [vmem:[%s5342_s25] sm:$0xff] %v2186_v2  ;;  %2210 = vst [vmem:[%s5342_s25 + $0x40] sm:$0xff] %v2194_v39  ;;  %v2189_v57 = vadd.f32 %v3574_v55, %v2028_v32  ;;  %v2197_v37 = vadd.f32 %v3586_v42, %v2036_v33 }
 0x603   : > { %v2117_v38 = vpop.f32.mrf.mxu0  ;;  %v2157_v49 = vpop.f32.mrf.mxu1 }
 0x604   : > { %2205 = vst [vmem:[%s5342_s25 + $0x18] sm:$0xff] %v2189_v57  ;;  %2213 = vst [vmem:[%s5342_s25 + $0x58] sm:$0xff] %v2197_v37  ;;  %v2188_v34 = vadd.f32 %v2117_v38, %v2027_v12  ;;  %v2196_v36 = vadd.f32 %v2157_v49, %v2035_v31 }
 0x605   : > { %v3577_v51 = vpop.f32.mrf.mxu0  ;;  %v3589_v53 = vpop.f32.mrf.mxu1 }
 0x606   : > { %2204 = vst [vmem:[%s5342_s25 + $0x10] sm:$0xff] %v2188_v34  ;;  %2212 = vst [vmem:[%s5342_s25 + $0x50] sm:$0xff] %v2196_v36  ;;  %v2191_v27 = vadd.f32 %v3577_v51, %v2030_v29  ;;  %v2199_v54 = vadd.f32 %v3589_v53, %v2038_v52 }
 0x607   : > { %v2127_v60 = vpop.f32.mrf.mxu0  ;;  %v2167_v61 = vpop.f32.mrf.mxu1 }
 0x608   : > { %2207 = vst [vmem:[%s5342_s25 + $0x28] sm:$0xff] %v2191_v27  ;;  %2215 = vst [vmem:[%s5342_s25 + $0x68] sm:$0xff] %v2199_v54  ;;  %v2190_v3 = vadd.f32 %v2127_v60, %v2029_v20  ;;  %v2198_v1 = vadd.f32 %v2167_v61, %v2037_v21 }
 0x609   : > { %v3580_v62 = vpop.f32.mrf.mxu0  ;;  %v3592_v28 = vpop.f32.mrf.mxu1 }
 0x60a   : > { %2206 = vst [vmem:[%s5342_s25 + $0x20] sm:$0xff] %v2190_v3  ;;  %2214 = vst [vmem:[%s5342_s25 + $0x60] sm:$0xff] %v2198_v1  ;;  %v2193_v30 = vadd.f32 %v3580_v62, %v2032_v59  ;;  %v2201_v19 = vadd.f32 %v3592_v28, %v2040_v0 }
 0x60b   : > { %v2137_v6 = vpop.f32.mrf.mxu0  ;;  %v2177_v56 = vpop.f32.mrf.mxu1 }
 0x60c   : > { %2209 = vst [vmem:[%s5342_s25 + $0x38] sm:$0xff] %v2193_v30  ;;  %2217 = vst [vmem:[%s5342_s25 + $0x78] sm:$0xff] %v2201_v19  ;;  %v2192_v58 = vadd.f32 %v2137_v6, %v2031_v47  ;;  %v2200_v5 = vadd.f32 %v2177_v56, %v2039_v17 }
 0x60e   : > { %2208 = vst [vmem:[%s5342_s25 + $0x30] sm:$0xff] %v2192_v58  ;;  %2216 = vst [vmem:[%s5342_s25 + $0x70] sm:$0xff] %v2200_v5 }
 0x60f PF: > { %s5815_s28 = sld [smem:[#allocation28_spill]] }
 0x615   : > { %p2901_p4 = scmp.ne.s32.totalorder %s5815_s28, 3 }
 0x616   : > { %s5406_s8 = scalar_lea.vmem (!%p2901_p4), [#allocation5], %s4691_s2 }
 0x617   : > { %2221 = sbr.rel (%p2901_p4) target bundleno = 1864 (0x748), region = 124 }
 0x61c   : > { %v2237_v8 = vld [vmem:[#allocation14 + $0x178] sm:$0xff]  ;;  %v2236_v10 = vld [vmem:[#allocation14 + $0x170] sm:$0xff]  ;;  %3625 = vmatprep.mubr.f32.mxu0 %v4979_v9  ;;  %3637 = vmatprep.mubr.f32.mxu1 %v4996_v22  ;;  %v2235_v11 = vld [vmem:[#allocation14 + $0x168] sm:$0xff]  ;;  %v5399_v33 = vstv %s4691_s2  ;;  %s5822_s2 = sld [smem:[#allocation27_spill]] }
 0x61d   : > { %3593 = vmatprep.subr.mxu0 %v2237_v8  ;;  %3777 = vmatprep.subr.mxu1 %v2237_v8  ;;  %v2234_v18 = vld [vmem:[#allocation14 + $0x160] sm:$0xff]  ;;  %v2233_v14 = vld [vmem:[#allocation14 + $0x158] sm:$0xff]  ;;  %v2232_v9 = vld [vmem:[#allocation14 + $0x150] sm:$0xff] }
 0x61e   : > { %3594 = vmatpush3.msra.mxu0 %v2237_v8  ;;  %3793 = vmatpush3.msra.mxu1 %v2237_v8  ;;  %v2231_v22 = vld [vmem:[#allocation14 + $0x148] sm:$0xff]  ;;  %v2230_v16 = vld [vmem:[#allocation14 + $0x140] sm:$0xff]  ;;  %v2229_v7 = vld [vmem:[#allocation14 + $0x138] sm:$0xff] }
 0x61f   : > { %3595 = vmatprep.subr.mxu0 %v2236_v10  ;;  %3778 = vmatprep.subr.mxu1 %v2236_v10  ;;  %v2228_v43 = vld [vmem:[#allocation14 + $0x130] sm:$0xff]  ;;  %v2227_v44 = vld [vmem:[#allocation14 + $0x128] sm:$0xff]  ;;  %v2226_v40 = vld [vmem:[#allocation14 + $0x120] sm:$0xff] }
 0x620   : > { %3596 = vmatpush3.msra.mxu0 %v2236_v10  ;;  %3794 = vmatpush3.msra.mxu1 %v2236_v10  ;;  %v2225_v41 = vld [vmem:[#allocation14 + $0x118] sm:$0xff]  ;;  %v2224_v63 = vld [vmem:[#allocation14 + $0x110] sm:$0xff]  ;;  %v2223_v4 = vld [vmem:[#allocation14 + $0x108] sm:$0xff] }
 0x621   : > { %3597 = vmatprep.subr.mxu0 %v2235_v11  ;;  %3779 = vmatprep.subr.mxu1 %v2235_v11  ;;  %v2222_v45 = vld [vmem:[#allocation14 + $0x100] sm:$0xff]  ;;  %v2240_v42 = vld [vmem:[%s5406_s8 + $0x8] sm:$0xff]  ;;  %v2242_v60 = vld [vmem:[%s5406_s8 + $0x18] sm:$0xff] }
 0x622   : > { %3598 = vmatpush3.msra.mxu0 %v2235_v11  ;;  %3795 = vmatpush3.msra.mxu1 %v2235_v11  ;;  %v5816_v50 = vld [vmem:[#allocation39_spill] sm:$0xff]  ;;  %v5817_v46 = vld [vmem:[#allocation42_spill] sm:$0xff]  ;;  %v2241_v47 = vld [vmem:[%s5406_s8 + $0x10] sm:$0xff]  ;;  %p2902_p6 = scmp.ne.s32.totalorder %s5822_s2, 0 }
 0x623   : > { %3599 = vmatprep.subr.mxu0 %v2234_v18  ;;  %3780 = vmatprep.subr.mxu1 %v2234_v18  ;;  %v2248_v38 = vld [vmem:[%s5406_s8 + $0x48] sm:$0xff]  ;;  %v2239_v29 = vld [vmem:[%s5406_s8] sm:$0xff]  ;;  %v2250_v62 = vld [vmem:[%s5406_s8 + $0x58] sm:$0xff] }
 0x624   : > { %3600 = vmatpush3.msra.mxu0 %v2234_v18  ;;  %3796 = vmatpush3.msra.mxu1 %v2234_v18  ;;  %v2247_v51 = vld [vmem:[%s5406_s8 + $0x40] sm:$0xff] }
 0x625   : > { %3601 = vmatprep.subr.mxu0 %v2233_v14  ;;  %3781 = vmatprep.subr.mxu1 %v2233_v14 }
 0x626   : > { %3602 = vmatpush3.msra.mxu0 %v2233_v14  ;;  %3797 = vmatpush3.msra.mxu1 %v2233_v14 }
 0x627   : > { %3603 = vmatprep.subr.mxu0 %v2232_v9  ;;  %3782 = vmatprep.subr.mxu1 %v2232_v9 }
 0x628   : > { %3604 = vmatpush3.msra.mxu0 %v2232_v9  ;;  %3798 = vmatpush3.msra.mxu1 %v2232_v9 }
 0x629   : > { %3605 = vmatprep.subr.mxu0 %v2231_v22  ;;  %3783 = vmatprep.subr.mxu1 %v2231_v22 }
 0x62a   : > { %3606 = vmatpush3.msra.mxu0 %v2231_v22  ;;  %3799 = vmatpush3.msra.mxu1 %v2231_v22 }
 0x62b   : > { %3607 = vmatprep.subr.mxu0 %v2230_v16  ;;  %3784 = vmatprep.subr.mxu1 %v2230_v16 }
 0x62c   : > { %3608 = vmatpush3.msra.mxu0 %v2230_v16  ;;  %3800 = vmatpush3.msra.mxu1 %v2230_v16 }
 0x62d   : > { %3609 = vmatprep.subr.mxu0 %v2229_v7  ;;  %3785 = vmatprep.subr.mxu1 %v2229_v7 }
 0x62e   : > { %3610 = vmatpush3.msra.mxu0 %v2229_v7  ;;  %3801 = vmatpush3.msra.mxu1 %v2229_v7 }
 0x62f   : > { %3611 = vmatprep.subr.mxu0 %v2228_v43  ;;  %3786 = vmatprep.subr.mxu1 %v2228_v43 }
 0x630   : > { %3612 = vmatpush3.msra.mxu0 %v2228_v43  ;;  %3802 = vmatpush3.msra.mxu1 %v2228_v43 }
 0x631   : > { %3613 = vmatprep.subr.mxu0 %v2227_v44  ;;  %3787 = vmatprep.subr.mxu1 %v2227_v44 }
 0x632   : > { %3614 = vmatpush3.msra.mxu0 %v2227_v44  ;;  %3803 = vmatpush3.msra.mxu1 %v2227_v44 }
 0x633   : > { %3615 = vmatprep.subr.mxu0 %v2226_v40  ;;  %3788 = vmatprep.subr.mxu1 %v2226_v40 }
 0x634   : > { %3616 = vmatpush3.msra.mxu0 %v2226_v40  ;;  %3804 = vmatpush3.msra.mxu1 %v2226_v40 }
 0x635   : > { %3617 = vmatprep.subr.mxu0 %v2225_v41  ;;  %3789 = vmatprep.subr.mxu1 %v2225_v41 }
 0x636   : > { %3618 = vmatpush3.msra.mxu0 %v2225_v41  ;;  %3805 = vmatpush3.msra.mxu1 %v2225_v41  ;;  %v2244_v41 = vld [vmem:[%s5406_s8 + $0x28] sm:$0xff] }
 0x637   : > { %3619 = vmatprep.subr.mxu0 %v2224_v63  ;;  %3790 = vmatprep.subr.mxu1 %v2224_v63 }
 0x638   : > { %3620 = vmatpush3.msra.mxu0 %v2224_v63  ;;  %3806 = vmatpush3.msra.mxu1 %v2224_v63 }
 0x639   : > { %3621 = vmatprep.subr.mxu0 %v2223_v4  ;;  %3791 = vmatprep.subr.mxu1 %v2223_v4 }
 0x63a   : > { %3622 = vmatpush3.msra.mxu0 %v2223_v4  ;;  %3807 = vmatpush3.msra.mxu1 %v2223_v4 }
 0x63b   : > { %3623 = vmatprep.subr.mxu0 %v2222_v45  ;;  %3792 = vmatprep.subr.mxu1 %v2222_v45 }
 0x63c   : > { %3624 = vmatpush3.msra.mxu0 %v2222_v45  ;;  %3808 = vmatpush3.msra.mxu1 %v2222_v45  ;;  %v2243_v45 = vld [vmem:[%s5406_s8 + $0x20] sm:$0xff] }
 0x63d   : > { %3626 = vmatmul.mubr.f32.vlgmr.msra.gmra.mxu0 %v4981_v13  ;;  %3638 = vmatmul.mubr.f32.vlgmr.msra.gmra.mxu1 %v5002_v23  ;;  %v5818_v13 = vld [vmem:[#allocation40_spill] sm:$0xff]  ;;  %v5819_v23 = vld [vmem:[#allocation43_spill] sm:$0xff] }
 0x63e   : > { %3628 = vmatprep.mubr.f32.mxu0 %v4983_v15  ;;  %3640 = vmatprep.mubr.f32.mxu1 %v5004_v24  ;;  %v5820_v15 = vld [vmem:[#allocation41_spill] sm:$0xff]  ;;  %v5821_v24 = vld [vmem:[#allocation44_spill] sm:$0xff] }
 0x641   : > { %3629 = vmatmul.mubr.f32.gmra.mxu0 %v4986_v35  ;;  %3641 = vmatmul.mubr.f32.gmra.mxu1 %v5006_v25  ;;  %v2448_v35 = vlaneseq }
 0x642   : > { %3631 = vmatprep.mubr.f32.mxu0 %v4988_v48  ;;  %3643 = vmatprep.mubr.f32.mxu1 %v5008_v26 }
 0x643   : > { %v5393_v32 = vshrl.u32 %v2448_v35, 7  ;;  %v5401_v2 = vand.u32 127, %v2448_v35 }
 0x645   : > { %3632 = vmatmul.mubr.f32.gmra.mxu0 %v5816_v50  ;;  %3644 = vmatmul.mubr.f32.gmra.mxu1 %v5817_v46  ;;  %v2501_v48 = vadd.s32 8, %v5393_v32  ;;  %v2503_v25 = vadd.s32 24, %v5393_v32  ;;  %v2502_v26 = vadd.s32 16, %v5393_v32  ;;  %v2505_v39 = vadd.s32 40, %v5393_v32 }
 0x646   : > { %3634 = vmatprep.mubr.f32.mxu0 %v5818_v13  ;;  %3646 = vmatprep.mubr.f32.mxu1 %v5819_v23  ;;  %v2504_v55 = vadd.s32 32, %v5393_v32  ;;  %v2517_v31 = vadd.s32 %v5399_v33, %v5393_v32  ;;  %vm2450_vm0 = vcmp.lt.s32.totalorder %v5401_v2, 8  ;;  %v2507_v52 = vadd.s32 56, %v5393_v32 }
 0x647   : > { %v2518_v12 = vadd.s32 %v5399_v33, %v2501_v48  ;;  %v5413_v57 = vadd.s32 %v5399_v33, %v2503_v25  ;;  %v5416_v37 = vadd.s32 %v5399_v33, %v2502_v26  ;;  %v2506_v36 = vadd.s32 48, %v5393_v32 }
 0x648   : > { %v5425_v20 = vadd.s32 %v5399_v33, %v2505_v39  ;;  %v5428_v21 = vadd.s32 %v5399_v33, %v2504_v55  ;;  %vm2533_vm2 = vcmp.lt.s32.totalorder %v2517_v31, 250  ;;  %v5438_v17 = vadd.s32 %v5399_v33, %v2507_v52  ;;  %v2246_v55 = vld [vmem:[%s5406_s8 + $0x38] sm:$0xff] }
 0x649   : > { %3635 = vmatmul.mubr.f32.gmra.mxu0 %v5820_v15  ;;  %3647 = vmatmul.mubr.f32.gmra.mxu1 %v5821_v24  ;;  %vm2534_vm1 = vcmp.lt.s32.totalorder %v2518_v12, 250  ;;  %vm2536_vm3 = vcmp.lt.s32.totalorder %v5413_v57, 250  ;;  %vm2535_vm4 = vcmp.lt.s32.totalorder %v5416_v37, 250  ;;  %v2509_v30 = vadd.s32 72, %v5393_v32  ;;  %v2245_v57 = vld [vmem:[%s5406_s8 + $0x30] sm:$0xff] }
 0x64a   : > { %v5442_v19 = vadd.s32 %v5399_v33, %v2506_v36  ;;  %v2508_v6 = vadd.s32 64, %v5393_v32  ;;  %vm2538_vm5 = vcmp.lt.s32.totalorder %v5425_v20, 250  ;;  %vm2537_vm6 = vcmp.lt.s32.totalorder %v5428_v21, 250 }
 0x64b   : > { %v2511_v9 = vadd.s32 88, %v5393_v32  ;;  %v2510_v16 = vadd.s32 80, %v5393_v32  ;;  %v5480_v48 = vadd.s32 %v5399_v33, %v2509_v30  ;;  %vm2540_vm7 = vcmp.lt.s32.totalorder %v5438_v17, 250 }
 0x64c   : > { %v5473_v46 = vadd.s32 %v5399_v33, %v2508_v6  ;;  %vm2539_vm8 = vcmp.lt.s32.totalorder %v5442_v19, 250  ;;  %v2514_v19 = vadd.s32 112, %v5393_v32 }
 0x64d   : > { %v5493_v12 = vadd.s32 %v5399_v33, %v2511_v9  ;;  %v5501_v52 = vadd.s32 %v5399_v33, %v2510_v16  ;;  %vm2542_vm10 = vcmp.lt.s32.totalorder %v5480_v48, 250 }
 0x64e   : > { %vm2541_vm9 = vcmp.lt.s32.totalorder %v5473_v46, 250 }
 0x64f   : > { %vm2544_vm11 = vcmp.lt.s32.totalorder %v5493_v12, 250  ;;  %vm2543_vm12 = vcmp.lt.s32.totalorder %v5501_v52, 250 }
 0x6fd   : > { %v3627_v49 = vpop.f32.mrf.mxu0  ;;  %v3639_v34 = vpop.f32.mrf.mxu1 }
 0x6fe   : > { %v2401_v53 = vadd.f32 %v3627_v49, %v2240_v42  ;;  %v2409_v27 = vadd.f32 %v3639_v34, %v2248_v38  ;;  %v2252_v34 = vld [vmem:[%s5406_s8 + $0x68] sm:$0xff] }
 0x6ff   : > { %v2321_v54 = vpop.f32.mrf.mxu0  ;;  %v2361_v61 = vpop.f32.mrf.mxu1 }
 0x700   : > { %2417 = vst [vmem:[%s5406_s8 + $0x8] sm:$0xff] %v2401_v53  ;;  %v2452_v59 = vmax.f32 %v2401_v53, 0.0  ;;  %v2400_v0 = vadd.f32 %v2321_v54, %v2239_v29  ;;  %2425 = vst [vmem:[%s5406_s8 + $0x48] sm:$0xff] %v2409_v27  ;;  %v2460_v3 = vmax.f32 %v2409_v27, 0.0  ;;  %v2408_v1 = vadd.f32 %v2361_v61, %v2247_v51  ;;  %v2249_v29 = vld [vmem:[%s5406_s8 + $0x50] sm:$0xff] }
 0x701   : > { %v3630_v28 = vpop.f32.mrf.mxu0  ;;  %v3642_v56 = vpop.f32.mrf.mxu1 }
 0x702   : > { %v2468_v58 = vsel %vm2450_vm0, %v2401_v53, %v2452_v59  ;;  %2416 = vst [vmem:[%s5406_s8] sm:$0xff] %v2400_v0  ;;  %v2451_v5 = vmax.f32 %v2400_v0, 0.0  ;;  %v2403_v8 = vadd.f32 %v3630_v28, %v2242_v60  ;;  %v5452_v10 = vsel %vm2450_vm0, %v2409_v27, %v2460_v3  ;;  %2424 = vst [vmem:[%s5406_s8 + $0x40] sm:$0xff] %v2408_v1 }
 0x703   : > { %2484 = vst [vmem:[%s4704_s4 + $0x8] sm:$0xff] %v2468_v58  ;;  %v2331_v11 = vpop.f32.mrf.mxu0  ;;  %2492 = vst [vmem:[%s4704_s4 + $0x48] sm:$0xff] %v5452_v10  ;;  %v2459_v18 = vmax.f32 %v2408_v1, 0.0  ;;  %v2411_v14 = vadd.f32 %v3642_v56, %v2250_v62  ;;  %v2371_v22 = vpop.f32.mrf.mxu1  ;;  %v2582_v7 = vsel %vm2534_vm1, %v2468_v58, 0.0  ;;  %vm2655_vm1 = vcmask 1040384  }
 0x704   : > { %v2467_v43 = vsel %vm2450_vm0, %v2400_v0, %v2451_v5  ;;  %2419 = vst [vmem:[%s5406_s8 + $0x18] sm:$0xff] %v2403_v8  ;;  %v2454_v44 = vmax.f32 %v2403_v8, 0.0  ;;  %v2402_v40 = vadd.f32 %v2331_v11, %v2241_v47  ;;  %v2619_v25 = vmul.f32 %v2582_v7, %v2582_v7  ;;  %v2251_v5 = vld [vmem:[%s5406_s8 + $0x60] sm:$0xff] }
 0x705   : > { %2483 = vst [vmem:[%s4704_s4] sm:$0xff] %v2467_v43  ;;  %v2581_v63 = vsel %vm2533_vm2, %v2467_v43, 0.0  ;;  %v3633_v4 = vpop.f32.mrf.mxu0  ;;  %v5470_v50 = vsel %vm2450_vm0, %v2408_v1, %v2459_v18  ;;  %2427 = vst [vmem:[%s5406_s8 + $0x58] sm:$0xff] %v2411_v14  ;;  %v2462_v13 = vmax.f32 %v2411_v14, 0.0  ;;  %v3645_v23 = vpop.f32.mrf.mxu1  ;;  %v2410_v62 = vadd.f32 %v2371_v22, %v2249_v29 }
 0x706   : > { %v2618_v15 = vmul.f32 %v2581_v63, %v2581_v63  ;;  %v2470_v24 = vsel %vm2450_vm0, %v2403_v8, %v2454_v44  ;;  %2418 = vst [vmem:[%s5406_s8 + $0x10] sm:$0xff] %v2402_v40  ;;  %v2453_v35 = vmax.f32 %v2402_v40, 0.0  ;;  %2491 = vst [vmem:[%s4704_s4 + $0x40] sm:$0xff] %v5470_v50  ;;  %v2405_v26 = vadd.f32 %v3633_v4, %v2244_v41 }
 0x707   : > { %2486 = vst [vmem:[%s4704_s4 + $0x18] sm:$0xff] %v2470_v24  ;;  %v2341_v39 = vpop.f32.mrf.mxu0  ;;  %v5490_v42 = vsel %vm2450_vm0, %v2411_v14, %v2462_v13  ;;  %v2597_v31 = vadd.f32 %v2582_v7, %v2581_v63  ;;  %v2584_v51 = vsel %vm2536_vm3, %v2470_v24, 0.0  ;;  %v2381_v60 = vpop.f32.mrf.mxu1  ;;  %v2413_v28 = vadd.f32 %v3645_v23, %v2252_v34  ;;  %2426 = vst [vmem:[%s5406_s8 + $0x50] sm:$0xff] %v2410_v62  ;;  %v2253_v24 = vld [vmem:[%s5406_s8 + $0x70] sm:$0xff] }
 0x708   : > { %v2469_v38 = vsel %vm2450_vm0, %v2402_v40, %v2453_v35  ;;  %v2404_v49 = vadd.f32 %v2341_v39, %v2243_v45  ;;  %2494 = vst [vmem:[%s4704_s4 + $0x58] sm:$0xff] %v5490_v42  ;;  %v2634_v36 = vadd.f32 %v2619_v25, %v2618_v15  ;;  %2421 = vst [vmem:[%s5406_s8 + $0x28] sm:$0xff] %v2405_v26  ;;  %v2456_v27 = vmax.f32 %v2405_v26, 0.0  ;;  %v2254_v15 = vld [vmem:[%s5406_s8 + $0x78] sm:$0xff] }
 0x709   : > { %2485 = vst [vmem:[%s4704_s4 + $0x10] sm:$0xff] %v2469_v38  ;;  %v2583_v53 = vsel %vm2535_vm4, %v2469_v38, 0.0  ;;  %v3636_v54 = vpop.f32.mrf.mxu0  ;;  %v2512_v47 = vadd.s32 96, %v5393_v32  ;;  %v2621_v30 = vmul.f32 %v2584_v51, %v2584_v51  ;;  %2429 = vst [vmem:[%s5406_s8 + $0x68] sm:$0xff] %v2413_v28  ;;  %v3648_v9 = vpop.f32.mrf.mxu1  ;;  %v2461_v43 = vmax.f32 %v2410_v62, 0.0 }
 0x70a   : > { %v2598_v61 = vadd.f32 %v2597_v31, %v2583_v53  ;;  %v2620_v59 = vmul.f32 %v2583_v53, %v2583_v53  ;;  %2420 = vst [vmem:[%s5406_s8 + $0x20] sm:$0xff] %v2404_v49  ;;  %v2455_v0 = vmax.f32 %v2404_v49, 0.0  ;;  %v2407_v3 = vadd.f32 %v3636_v54, %v2246_v55 }
 0x70b   : > { %v2472_v37 = vsel %vm2450_vm0, %v2405_v26, %v2456_v27  ;;  %v2351_v1 = vpop.f32.mrf.mxu0  ;;  %v2464_v44 = vmax.f32 %v2413_v28, 0.0  ;;  %v2412_v40 = vadd.f32 %v2381_v60, %v2251_v5  ;;  %v2477_v45 = vsel %vm2450_vm0, %v2410_v62, %v2461_v43  ;;  %v2391_v35 = vpop.f32.mrf.mxu1 }
 0x70c   : > { %v2635_v6 = vadd.f32 %v2634_v36, %v2620_v59  ;;  %2488 = vst [vmem:[%s4704_s4 + $0x28] sm:$0xff] %v2472_v37  ;;  %v2471_v56 = vsel %vm2450_vm0, %v2404_v49, %v2455_v0  ;;  %v2599_v58 = vadd.f32 %v2598_v61, %v2584_v51  ;;  %2423 = vst [vmem:[%s5406_s8 + $0x38] sm:$0xff] %v2407_v3  ;;  %v2586_v8 = vsel %vm2538_vm5, %v2472_v37, 0.0 }
 0x70d   : > { %2487 = vst [vmem:[%s4704_s4 + $0x20] sm:$0xff] %v2471_v56  ;;  %v2585_v11 = vsel %vm2537_vm6, %v2471_v56, 0.0  ;;  %v2458_v18 = vmax.f32 %v2407_v3, 0.0  ;;  %v2406_v14 = vadd.f32 %v2351_v1, %v2245_v57  ;;  %v2623_v41 = vmul.f32 %v2586_v8, %v2586_v8  ;;  %2493 = vst [vmem:[%s4704_s4 + $0x50] sm:$0xff] %v2477_v45 }
 0x70e   : > { %v2600_v22 = vadd.f32 %v2599_v58, %v2585_v11  ;;  %v2622_v16 = vmul.f32 %v2585_v11, %v2585_v11  ;;  %v2636_v7 = vadd.f32 %v2635_v6, %v2621_v30  ;;  %v2480_v23 = vsel %vm2450_vm0, %v2413_v28, %v2464_v44  ;;  %2428 = vst [vmem:[%s5406_s8 + $0x60] sm:$0xff] %v2412_v40 }
 0x70f   : > { %v2474_v20 = vsel %vm2450_vm0, %v2407_v3, %v2458_v18  ;;  %2422 = vst [vmem:[%s5406_s8 + $0x30] sm:$0xff] %v2406_v14  ;;  %v2457_v21 = vmax.f32 %v2406_v14, 0.0  ;;  %2496 = vst [vmem:[%s4704_s4 + $0x68] sm:$0xff] %v2480_v23  ;;  %v2513_v55 = vadd.s32 104, %v5393_v32  ;;  %v2463_v49 = vmax.f32 %v2412_v40, 0.0 }
 0x710   : > { %v2637_v63 = vadd.f32 %v2636_v7, %v2622_v16  ;;  %2490 = vst [vmem:[%s4704_s4 + $0x38] sm:$0xff] %v2474_v20  ;;  %v2601_v4 = vadd.f32 %v2600_v22, %v2586_v8  ;;  %v2588_v25 = vsel %vm2540_vm7, %v2474_v20, 0.0  ;;  %v2529_v29 = vadd.s32 %v5399_v33, %v2512_v47 }
 0x711   : > { %v2473_v13 = vsel %vm2450_vm0, %v2406_v14, %v2457_v21  ;;  %v2589_v17 = vsel %vm2541_vm9, %v5470_v50, 0.0  ;;  %v2415_v34 = vadd.f32 %v3648_v9, %v2254_v15  ;;  %v2414_v36 = vadd.f32 %v2391_v35, %v2253_v24 }
 0x712   : > { %2489 = vst [vmem:[%s4704_s4 + $0x30] sm:$0xff] %v2473_v13  ;;  %v2587_v26 = vsel %vm2539_vm8, %v2473_v13, 0.0  ;;  %v2638_v39 = vadd.f32 %v2637_v63, %v2623_v41  ;;  %v2625_v51 = vmul.f32 %v2588_v25, %v2588_v25  ;;  %v2479_v54 = vsel %vm2450_vm0, %v2412_v40, %v2463_v49 }
 0x713   : > { %v2602_v31 = vadd.f32 %v2601_v4, %v2587_v26  ;;  %v2624_v38 = vmul.f32 %v2587_v26, %v2587_v26  ;;  %v2590_v60 = vsel %vm2542_vm10, %v5452_v10, 0.0  ;;  %v2530_v61 = vadd.s32 %v5399_v33, %v2513_v55  ;;  %2495 = vst [vmem:[%s4704_s4 + $0x60] sm:$0xff] %v2479_v54  ;;  %2431 = vst [vmem:[%s5406_s8 + $0x78] sm:$0xff] %v2415_v34 }
 0x714   : > { %v2466_v50 = vmax.f32 %v2415_v34, 0.0  ;;  %2430 = vst [vmem:[%s5406_s8 + $0x70] sm:$0xff] %v2414_v36  ;;  %v2465_v46 = vmax.f32 %v2414_v36, 0.0  ;;  %v2626_v0 = vmul.f32 %v2589_v17, %v2589_v17  ;;  %v2515_v57 = vadd.s32 120, %v5393_v32 }
 0x715   : > { %v2639_v53 = vadd.f32 %v2638_v39, %v2624_v38  ;;  %v2603_v27 = vadd.f32 %v2602_v31, %v2588_v25  ;;  %v2591_v37 = vsel %vm2543_vm12, %v2477_v45, 0.0  ;;  %vm2545_vm13 = vcmp.lt.s32.totalorder %v2529_v29, 250 }
 0x716   : > { %v2482_v10 = vsel %vm2450_vm0, %v2415_v34, %v2466_v50  ;;  %v2481_v48 = vsel %vm2450_vm0, %v2414_v36, %v2465_v46  ;;  %v2627_v1 = vmul.f32 %v2590_v60, %v2590_v60  ;;  %v2531_v47 = vadd.s32 %v5399_v33, %v2514_v19 }
 0x717   : > { %v2604_v59 = vadd.f32 %v2603_v27, %v2589_v17  ;;  %v2640_v3 = vadd.f32 %v2639_v53, %v2625_v51  ;;  %2498 = vst [vmem:[%s4704_s4 + $0x78] sm:$0xff] %v2482_v10  ;;  %2497 = vst [vmem:[%s4704_s4 + $0x70] sm:$0xff] %v2481_v48  ;;  %v2592_v32 = vsel %vm2544_vm11, %v5490_v42, 0.0  ;;  %vm2546_vm14 = vcmp.lt.s32.totalorder %v2530_v61, 250 }
 0x718   : > { %v2628_v30 = vmul.f32 %v2591_v37, %v2591_v37  ;;  %v2532_v56 = vadd.s32 %v5399_v33, %v2515_v57  ;;  %v2593_v58 = vsel %vm2545_vm13, %v2479_v54, 0.0  ;;  %v2629_v2 = vmul.f32 %v2592_v32, %v2592_v32 }
 0x719   : > { %v2641_v62 = vadd.f32 %v2640_v3, %v2626_v0  ;;  %v2605_v28 = vadd.f32 %v2604_v59, %v2590_v60  ;;  %vm2547_vm15 = vcmp.lt.s32.totalorder %v2531_v47, 250  ;;  %v2594_v11 = vsel %vm2546_vm14, %v2480_v23, 0.0 }
 0x71a   : > { %v2630_v14 = vmul.f32 %v2593_v58, %v2593_v58  ;;  %vm2548_vm0 = vcmp.lt.s32.totalorder %v2532_v56, 250  ;;  %v2595_v22 = vsel %vm2547_vm15, %v2481_v48, 0.0  ;;  %v2631_v16 = vmul.f32 %v2594_v11, %v2594_v11 }
 0x71b   : > { %v2606_v52 = vadd.f32 %v2605_v28, %v2591_v37  ;;  %v2642_v6 = vadd.f32 %v2641_v62, %v2627_v1  ;;  %v2596_v7 = vsel %vm2548_vm0, %v2482_v10, 0.0  ;;  %v2632_v20 = vmul.f32 %v2595_v22, %v2595_v22 }
 0x71c   : > { %v2633_v44 = vmul.f32 %v2596_v7, %v2596_v7 }
 0x71d   : > { %v2643_v5 = vadd.f32 %v2642_v6, %v2628_v30  ;;  %v2607_v8 = vadd.f32 %v2606_v52, %v2592_v32 }
 0x71f   : > { %v2608_v18 = vadd.f32 %v2607_v8, %v2593_v58  ;;  %v2644_v9 = vadd.f32 %v2643_v5, %v2629_v2 }
 0x721   : > { %v2645_v12 = vadd.f32 %v2644_v9, %v2630_v14  ;;  %v2609_v42 = vadd.f32 %v2608_v18, %v2594_v11 }
 0x723   : > { %v2610_v43 = vadd.f32 %v2609_v42, %v2595_v22  ;;  %v2646_v21 = vadd.f32 %v2645_v12, %v2631_v16 }
 0x725   : > { %v2611_v33 = vadd.f32 %v2610_v43, %v2596_v7  ;;  %v2647_v40 = vadd.f32 %v2646_v21, %v2632_v20 }
 0x727   : > { %v2612_v41 = vrot.slane %v2611_v33, 4  ;;  %v2648_v63 = vadd.f32 %v2647_v40, %v2633_v44 }
 0x729   : > { %v2613_v4 = vadd.f32 %v2612_v41, %v2611_v33  ;;  %v2649_v45 = vrot.slane %v2648_v63, 4 }
 0x72b   : > { %v2614_v13 = vrot.slane %v2613_v4, 2  ;;  %v2650_v23 = vadd.f32 %v2649_v45, %v2648_v63 }
 0x72d   : > { %v2615_v15 = vadd.f32 %v2614_v13, %v2613_v4  ;;  %v2651_v24 = vrot.slane %v2650_v23, 2 }
 0x72f   : > { %v2616_v35 = vrot.slane %v2615_v15, 1  ;;  %v2652_v25 = vadd.f32 %v2651_v24, %v2650_v23 }
 0x731   : > { %v2653_v26 = vrot.slane %v2652_v25, 1  ;;  %v2617_v39 = vadd.f32 %v2616_v35, %v2615_v15  ;;  %2659 = sbr.rel (%p2902_p6) target bundleno = 1847 (0x737), region = 128 }
 0x733   : > { %v2654_v55 = vadd.f32 %v2653_v26, %v2652_v25 }
 0x735   : > { %v2656_v31 = vsel %vm2655_vm1, %v2617_v39, %v2654_v55 }
 0x736   : > { %2660 = vst [vmem:[#allocation16] sm:$0x3] %v2656_v31 }
 0x737 PF: > { %s5823_s18 = sld [smem:[#allocation27_spill]] }
 0x73d   : > { %p2903_p7 = scmp.le.s32.totalorder %s5823_s18, 0 }
 0x73f   : > { %2664 = sbr.rel (%p2903_p7) target bundleno = 1864 (0x748), region = 132 }
 0x744   : > { %v2665_v38 = vld [vmem:[#allocation16] sm:$0x3] }
 0x745   : > { %v2666_v49 = vadd.f32 %v2665_v38, %v2656_v31 }
 0x747   : > { %2667 = vst [vmem:[#allocation16] sm:$0x3] %v2666_v49 }
 0x748 PF: > { %s5824_s9 = sld [smem:[#allocation28_spill]]  ;;  %s2684_s26 = sshll.u32 %s4704_s4, 4  ;;  %s5585_s26 = int_to_ptr.vmem [resolvable:$true] %s2684_s26 }
 0x749   : > { %s5825_s5 = sld [smem:[#allocation27_spill]]  ;;  %s5594_s20 = scalar_lea.sflag [#allocation8], %s461_s7 }
 0x74a   : > { %s5827_s27 = sld [smem:[#allocation35_spill]]  ;;  %s4137_s23 = scalar_lea.vmem %s5585_s26, 2048 }
 0x74b   : > { %s5828_s12 = sld [smem:[#allocation52_spill]]  ;;  %p4138_p12 = scmp.ne.s32.totalorder %s5585_s26, %s4137_s23 }
 0x74c   : > { %s4349_s4 = smov [#allocation15]  }
 0x74d   : > { %s4141_s25 = sshll.u32 %s4349_s4, 4  ;;  %s4142_s25 = int_to_ptr.vmem [resolvable:$false] %s4141_s25 }
 0x74e   : > { %p2676_p13 = scmp.eq.s32.totalorder %s5824_s9, 3  ;;  %s4143_s28 = scalar_lea.vmem %s4142_s25, 4096 }
 0x74f   : > { %p4144_p0 = scmp.lt.s32.totalorder %s5585_s26, %s4142_s25  ;;  %p4145_p2 = scmp.lt.s32.totalorder %s4143_s28, %s4137_s23 }
 0x750   : > { %s5869_s5 = smov (!%p2676_p13, %s5825_s5), 0  ;;  %p5830_p3 = scmp.ne.s32.totalorder %s5827_s27, 0 }
 0x751   : > { %s2913_s15 = sshll.u32 %s5869_s5, 11  ;;  %s5829_s1 = smov %s5828_s12 }
 0x752   : > { %s5590_s21 = scalar_lea.hbm %s5828_s12, %s2913_s15  ;;  %p4139_p9 = pnand %p4138_p12, %p5830_p3 }
 0x753   : > { %p4146_p8 = por %p4145_p2, %p4144_p0 }
 0x754   : > { %p4140_p5 = pneg %p4139_p9 }
 0x756   : > { %p4147_p1 = pnand %p4146_p8, %p4140_p5 }
 0x758   : > { %4150 = shalt.err (!%p4147_p1)
}
 0x759   : > { %s4151_s7 = scalar_lea.hbm %s5590_s21, 2048  ;;  %s4155_s18 = scalar_lea.hbm %s5829_s1, 4096 }
 0x75a   : > { %p4152_p10 = scmp.ne.s32.totalorder %s5590_s21, %s4151_s7  ;;  %p4156_p6 = scmp.lt.s32.totalorder %s5590_s21, %s5829_s1 }
 0x75b   : > { %p4157_p7 = scmp.lt.s32.totalorder %s4155_s18, %s4151_s7 }
 0x75c   : > { %p4153_p11 = pnand %p4152_p10, %p5830_p3 }
 0x75d   : > { %p4158_p13 = por %p4157_p7, %p4156_p6 }
 0x75e   : > { %p4154_p4 = pneg %p4153_p11 }
 0x760   : > { %p4159_p12 = pnand %p4158_p13, %p4154_p4 }
 0x762   : > { %4162 = shalt.err (!%p4159_p12)
}
 0x763   : > { %s4350_s30 = smov 128   ;;  %s5831_s15 = sld [smem:[#allocation32_spill]] }
 0x764   : > { %s4351_s22 = smov 8   ;;  %s4352_s29 = smov [#allocation16]  }
 0x765   : > { %3825 = dma.vmem_to_hbm [thread:$0]  (%p5830_p3), %s5585_s26, 2048, %s5590_s21, %s5594_s20, %s4350_s30, %s4350_s30, %s4351_s22  }
 0x766   : > { %s2698_s12 = sshll.u32 %s4352_s29, 4  ;;  %s2699_s12 = int_to_ptr.vmem [resolvable:$true] %s2698_s12 }
 0x767   : > { %s4163_s23 = scalar_lea.vmem %s2699_s12, 32  ;;  %p4170_p8 = scmp.lt.s32.totalorder %s2699_s12, %s2699_s12 }
 0x768   : > { %p4164_p9 = scmp.ne.s32.totalorder %s2699_s12, %s4163_s23  ;;  %p4171_p1 = scmp.lt.s32.totalorder %s4163_s23, %s4163_s23 }
 0x769   : > { %p5832_p5 = scmp.eq.s32.totalorder %s5831_s15, 15 }
 0x76a   : > { %p4172_p10 = por %p4171_p1, %p4170_p8 }
 0x76b   : > { %p4165_p0 = pnand %p4164_p9, %p5832_p5 }
 0x76d   : > { %p4166_p2 = pneg %p4165_p0 }
 0x76f   : > { %p4173_p11 = pnand %p4172_p10, %p4166_p2 }
 0x771   : > { %4176 = shalt.err (!%p4173_p11)
}
 0x772   : > { %p5833_p4 = pmov %p5832_p5  ;;  %s5834_s28 = sld [smem:[#allocation53_spill]] }
 0x774   : > { %p5835_p3 = pmov %p5833_p4 }
 0x778   : > { %3827 = dma.vmem_to_hbm [thread:$0]  (%p5833_p4), %s2699_s12, 32, %s5834_s28, [#allocation17]  }
 0x779   : > { %4268 = dma.done.wait (%p5835_p3), [#allocation17], 32   ;;  %p5836_p6 = pmov %p5835_p3 }
 0x77b   : > { %4270 = vsyncadd (%p5836_p6), [#allocation17], 4294967264 }
 0x77c PF: > { %s5837_s27 = sld [smem:[#allocation24_spill]]  ;;  %p3861_p7 = scmp.ge.s32.totalorder %s4337_s24, 2 }
 0x77d   : > { %s5838_s26 = sld [smem:[#allocation36_spill]] }
 0x782   : > { %s2714_s21 = sand.u32 1, %s5837_s27  }
 0x783   : > { %p5839_p13 = scmp.ne.s32.totalorder %s5838_s26, 0  ;;  %s2715_s20 = scalar_lea.sflag [#allocation8], %s2714_s21 }
 0x785   : > { %p3849_p12 = pnand %p3861_p7, %p5839_p13 }
 0x787   : > { %p3850_p9 = pneg %p3849_p12 }
 0x789   : > { %4272 = dma.done.wait (%p3850_p9), %s2715_s20, 2048  }
 0x78a   : > { %4274 = vsyncadd (%p3850_p9), %s2715_s20, 4294965248  ;;  %s31_s24 = sadd.s32 1, %s4337_s24   ;;  %s5841_s30 = sld [smem:[#allocation25_spill]] }
 0x78b   : > { %p5633_p5 = scmp.ge.s32.totalorder %s31_s24, 18   ;;  %s5842_s8 = smov %s4644_s10 }
 0x78c   : > { %s5843_s18 = sld [smem:[#allocation29_spill]]  ;;  %s5848_s10 = smov %s4285_s11 }
 0x78d   : > { %s5844_s2 = sld [smem:[#allocation30_spill]]  ;;  %s5849_s11 = smov %s5842_s8 }
 0x78e   : > { %s5845_s20 = sld [smem:[#allocation31_spill]]  ;;  %s5850_s12 = smov %s4293_s13 }
 0x78f   : > { %s5846_s21 = sld [smem:[#allocation37_spill]]  ;;  %s5851_s13 = smov %s4297_s14 }
 0x790   : > { %s5847_s23 = sld [smem:[#allocation38_spill]]  ;;  %s5852_s14 = smov %s4639_s6 }
 0x791   : > { %s5853_s15 = smov %s4305_s16  ;;  %s5854_s16 = smov %s4309_s17 }
 0x792   : > { %s5855_s17 = smov %s4595_s19  ;;  %s5857_s22 = smov %s4588_s0 }
 0x793   : > { %s5856_s19 = smov %s5844_s2  ;;  %30 = sbr.rel (!%p5633_p5) target bundleno = 25 (0x19), region = 199 }
 0x798   :  { %2720 = vsyncpa [#allocation7], 1 }
 0x799   :  { %2722 = vsyncpa [#allocation7 + $0x1], 1 }
 0x79a   :  { %2723 = vsyncpa [#allocation10], 1 }
 0x79b   :  { %2725 = vsyncpa [#allocation10 + $0x1], 1 }
 0x79c   :  { %2726 = vsyncpa [#allocation13], 1 }
 0x79d   :  { %2727 = vsyncpa [#allocation8], 1 }
 0x79e   :  { %2729 = vsyncpa [#allocation8 + $0x1], 1 }
 0x79f   :  { %2730 = vsyncpa [#allocation17], 1 }

</bundles_post_ra>
